<compile_context>
chip_gen: v5e
topology: v5e:2x2
jax: 0.10.0
libtpu: 0.0.40
codegen_flags: <defaults>
</compile_context>

<pallas_src>
import functools
import math

import jax
import jax.numpy as jnp
from jax import lax
from jax.experimental import pallas as pl
from jax.experimental.pallas import tpu as pltpu


# ------------------------------ cell helpers ---------------------------------
def _sigmoid(x):
    # Exact: sigmoid(x) = 0.5 * (1 + tanh(x/2)); single EUP tanh push instead of
    # exp + reciprocal/divide.
    return 0.5 * jnp.tanh(0.5 * x) + 0.5


def _lstm_cell(gates, c, H):
    # gates: (B, 4H) f32, order [i, f, g, o]; c: (B, H) f32
    i_g = _sigmoid(gates[:, 0 * H:1 * H])
    f_g = _sigmoid(gates[:, 1 * H:2 * H])
    g_g = jnp.tanh(gates[:, 2 * H:3 * H])
    o_g = _sigmoid(gates[:, 3 * H:4 * H])
    c_new = f_g * c + i_g * g_g
    h_new = o_g * jnp.tanh(c_new)
    return h_new, c_new


# ------------------------------ fused kernel ---------------------------------
def fused_lstm_kernel(x_ref, w_ih1_ref, w_hh1_ref, b1_ref,
                      w2_hbm_ref, b2_ref, w_lin_ref, b_lin_ref,
                      out_ref,
                      xp_scr, h1_seq_scr, w2_buf, w2_sem, *, T, B):
    # x_ref:      (T*B, D)  bf16      w_ih1_ref: (D, 4H)  bf16
    # w_hh1_ref:  (H, 4H)   bf16      b1_ref:    (1, 4H)  f32
    # w2_hbm_ref: (2H, 4H)  bf16 HBM  b2_ref:    (1, 4H)  f32
    # w_lin_ref:  (H, O_pad) bf16     b_lin_ref: (1, O_pad) f32
    # out_ref:    (B, O_pad) f32
    # xp_scr:     (T*B, 4H) f32  -- hoisted layer-1 input projections
    # h1_seq_scr: (T*B, H)  f32  -- layer-1 per-step hidden states (VMEM only)
    # w2_buf:     (2H, 4H)  bf16 -- layer-2 fused [w_ih2; w_hh2] weights
    H = w_hh1_ref.shape[0]

    # Prefetch layer-2 fused weights HBM -> VMEM; hidden behind layer-1 compute.
    w2_cp = pltpu.make_async_copy(w2_hbm_ref, w2_buf, w2_sem)
    w2_cp.start()

    # ------------------------------ layer 1 -----------------------------------
    # Hoisted input projection + bias (one MXU call for all T timesteps).
    xp_scr[...] = (
        jnp.dot(x_ref[...], w_ih1_ref[...], preferred_element_type=jnp.float32)
        + b1_ref[...]
    )

    zeros = jnp.zeros((B, H), jnp.float32)
    w_hh1 = w_hh1_ref[...]                       # hoisted load (bf16, no cast)

    def l1_step(t, carry):
        h, c = carry
        off = pl.multiple_of(t * B, B)
        gates = xp_scr[pl.ds(off, B), :] + jnp.dot(
            h.astype(jnp.bfloat16), w_hh1, preferred_element_type=jnp.float32)
        h_new, c_new = _lstm_cell(gates, c, H)
        h1_seq_scr[pl.ds(off, B), :] = h_new     # stays in VMEM, never hits HBM
        return (h_new, c_new)

    lax.fori_loop(0, T, l1_step, (zeros, zeros), unroll=True)

    # ------------------------------ layer 2 -----------------------------------
    # Wait for the prefetched fused weights, then run the recurrence with
    # K-concatenation: [h1_t, h2_{t-1}] (B,2H) @ [w_ih2; w_hh2] (2H,4H) is a
    # single K=256 MXU pass on v6e/v7x (no separate hoisted projection needed).
    w2_cp.wait()
    w2 = w2_buf[...]
    b2_b = jnp.broadcast_to(b2_ref[...], (B, 4 * H))   # hoisted broadcast

    def l2_step(t, carry):
        h, c = carry
        off = pl.multiple_of(t * B, B)
        inp = jnp.concatenate(
            [h1_seq_scr[pl.ds(off, B), :].astype(jnp.bfloat16),
             h.astype(jnp.bfloat16)], axis=-1)           # (B, 2H)
        gates = jnp.dot(inp, w2, preferred_element_type=jnp.float32) + b2_b
        return _lstm_cell(gates, c, H)

    h_last, _ = lax.fori_loop(0, T, l2_step, (zeros, zeros), unroll=True)

    # ---------------------------- linear head ---------------------------------
    # Single bf16 MXU pass; lane-dense (B, O_pad) unmasked store.
    out_ref[...] = (
        jnp.dot(h_last.astype(jnp.bfloat16), w_lin_ref[...],
                preferred_element_type=jnp.float32)
        + b_lin_ref[...]
    )


# ------------------------------ model wrapper ---------------------------------
def init_params(key, input_dim, hidden_dim, output_dim=1, num_layers=2):
    """Deterministic init (uniform(-1/sqrt(H), 1/sqrt(H)) like PyTorch)."""
    k = 1.0 / math.sqrt(hidden_dim)
    layers = []
    in_dim = input_dim
    for _ in range(num_layers):
        key, k1, k2, k3, k4 = jax.random.split(key, 5)
        w_ih = jax.random.uniform(k1, (in_dim, 4 * hidden_dim), jnp.float32, -k, k)
        w_hh = jax.random.uniform(k2, (hidden_dim, 4 * hidden_dim), jnp.float32, -k, k)
        b_ih = jax.random.uniform(k3, (1, 4 * hidden_dim), jnp.float32, -k, k)
        b_hh = jax.random.uniform(k4, (1, 4 * hidden_dim), jnp.float32, -k, k)
        layers.append({"w_ih": w_ih, "w_hh": w_hh, "b": b_ih + b_hh})
        in_dim = hidden_dim
    key, k5, k6 = jax.random.split(key, 3)
    w_lin = jax.random.uniform(k5, (hidden_dim, output_dim), jnp.float32, -k, k)
    b_lin = jax.random.uniform(k6, (1, output_dim), jnp.float32, -k, k)
    return {"lstm": layers, "w_lin": w_lin, "b_lin": b_lin}


def lstm_forward(x, params):
    """x: (seq_len, batch, input_dim) -> (batch * output_dim,) (= (batch,) for O=1)."""
    assert len(params["lstm"]) == 2, "fused kernel is specialized for num_layers=2"
    T, B, D = x.shape
    l1, l2 = params["lstm"]
    H = l1["w_hh"].shape[0]
    assert B % 8 == 0, "batch must be a multiple of 8 (sublane-aligned pl.ds stores)"
    assert H % 128 == 0, "hidden_dim must be a multiple of 128 (lane-aligned gates)"

    w_lin, b_lin = params["w_lin"], params["b_lin"]
    O = w_lin.shape[1]
    O_pad = ((O + 127) // 128) * 128  # lane-dense head output

    # Wrapper-side layout/dtype prep (free in XLA, halves weight/x DMA).
    x2d = x.reshape(T * B, D).astype(jnp.bfloat16)
    w_ih1_bf = l1["w_ih"].astype(jnp.bfloat16)
    w_hh1_bf = l1["w_hh"].astype(jnp.bfloat16)
    w2_cat = jnp.concatenate([l2["w_ih"], l2["w_hh"]], axis=0).astype(jnp.bfloat16)
    w_lin_p = jnp.zeros((H, O_pad), jnp.bfloat16).at[:, :O].set(
        w_lin.astype(jnp.bfloat16))
    b_lin_p = jnp.zeros((1, O_pad), jnp.float32).at[:, :O].set(b_lin)

    vmem = pltpu.MemorySpace.VMEM
    out = pl.pallas_call(
        functools.partial(fused_lstm_kernel, T=T, B=B),
        out_shape=jax.ShapeDtypeStruct((B, O_pad), jnp.float32),
        in_specs=[
            pl.BlockSpec(memory_space=vmem),     # x2d
            pl.BlockSpec(memory_space=vmem),     # w_ih1 (bf16)
            pl.BlockSpec(memory_space=vmem),     # w_hh1 (bf16)
            pl.BlockSpec(memory_space=vmem),     # b1 (f32)
            pl.BlockSpec(memory_space=pl.ANY),   # w2_cat: stays in HBM, manual DMA
            pl.BlockSpec(memory_space=vmem),     # b2 (f32)
            pl.BlockSpec(memory_space=vmem),     # w_lin (bf16, padded)
            pl.BlockSpec(memory_space=vmem),     # b_lin (f32, padded)
        ],
        out_specs=pl.BlockSpec(memory_space=vmem),
        scratch_shapes=[
            pltpu.VMEM((T * B, 4 * H), jnp.float32),   # hoisted L1 projections
            pltpu.VMEM((T * B, H), jnp.float32),       # layer-1 hidden sequence
            pltpu.VMEM((2 * H, 4 * H), jnp.bfloat16),  # prefetched L2 weights
            pltpu.SemaphoreType.DMA,                   # L2 weight DMA semaphore
        ],
        # Working set ~1 MiB: well inside default scoped VMEM on v5e/v6e/v7x.
        # TODO(synk): for large T*B, switch xp_scr/h1_seq_scr to bf16 or T-chunk
        #             the hoisted projection and set vmem_limit_bytes explicitly.
    )(x2d, w_ih1_bf, w_hh1_bf, l1["b"], w2_cat, l2["b"], w_lin_p, b_lin_p)

    return out[:, :O].reshape(-1)   # y_pred.view(-1)


# ------------------------------ pure-JAX reference -----------------------------
def lstm_forward_ref(x, params):
    h = x
    for layer in params["lstm"]:
        H = layer["w_hh"].shape[0]
        B = x.shape[1]

        def step(carry, x_t):
            h_t, c_t = carry
            gates = x_t @ layer["w_ih"] + h_t @ layer["w_hh"] + layer["b"]
            i_g = jax.nn.sigmoid(gates[:, 0 * H:1 * H])
            f_g = jax.nn.sigmoid(gates[:, 1 * H:2 * H])
            g_g = jnp.tanh(gates[:, 2 * H:3 * H])
            o_g = jax.nn.sigmoid(gates[:, 3 * H:4 * H])
            c_n = f_g * c_t + i_g * g_g
            h_n = o_g * jnp.tanh(c_n)
            return (h_n, c_n), h_n

        init = (jnp.zeros((B, H), jnp.float32), jnp.zeros((B, H), jnp.float32))
        _, h = jax.lax.scan(step, init, h)
    y = h[-1] @ params["w_lin"] + params["b_lin"]
    return y.reshape(-1)


if __name__ == "__main__":
    seq_len, batch, input_dim, hidden_dim = 8, 8, 32, 128
    output_dim, num_layers = 1, 2

    key = jax.random.PRNGKey(0)
    kx, kp = jax.random.split(key)
    x = jax.random.normal(kx, (seq_len, batch, input_dim), jnp.float32)
    params = init_params(kp, input_dim, hidden_dim, output_dim, num_layers)

    fwd = jax.jit(lstm_forward)
    y = jax.block_until_ready(fwd(x, params))
    y_ref = jax.block_until_ready(lstm_forward_ref(x, params))

    assert y.shape == (batch,), y.shape
    # bf16 MXU operands (f32 accumulate) vs pure-f32 reference -> looser tolerance.
    assert jnp.allclose(y, y_ref, atol=1e-2, rtol=1e-2), (y, y_ref)
    print("KERNEL_OK")
</pallas_src>

<mosaic_0001>
module attributes {stable_mosaic.version = 11 : i64} {
  func.func @fused_lstm_kernel(%arg0: memref<64x32xbf16, #tpu.memory_space<vmem>>, %arg1: memref<32x512xbf16, #tpu.memory_space<vmem>>, %arg2: memref<128x512xbf16, #tpu.memory_space<vmem>>, %arg3: memref<1x512xf32, #tpu.memory_space<vmem>>, %arg4: memref<256x512xbf16, #tpu.memory_space<any>>, %arg5: memref<1x512xf32, #tpu.memory_space<vmem>>, %arg6: memref<128x128xbf16, #tpu.memory_space<vmem>>, %arg7: memref<1x128xf32, #tpu.memory_space<vmem>>, %arg8: memref<8x128xf32, #tpu.memory_space<vmem>>, %arg9: memref<64x512xf32, #tpu.memory_space<vmem>>, %arg10: memref<64x128xf32, #tpu.memory_space<vmem>>, %arg11: memref<256x512xbf16, #tpu.memory_space<vmem>>, %arg12: memref<!tpu.dma_semaphore, #tpu.memory_space<semaphore_mem>>) attributes {dimension_semantics = [], scalar_prefetch = 0 : i64, scratch_operands = 4 : i64, tpu.core_type = #tpu.core_type<tc>} {
    tpu.enqueue_dma source(%arg4 : memref<256x512xbf16, #tpu.memory_space<any>>) target(%arg11 : memref<256x512xbf16, #tpu.memory_space<vmem>>) target_semaphore(%arg12 : memref<!tpu.dma_semaphore, #tpu.memory_space<semaphore_mem>>)
    %c0 = arith.constant 0 : index
    %c0_0 = arith.constant 0 : index
    %0 = vector.load %arg0[%c0, %c0_0] : memref<64x32xbf16, #tpu.memory_space<vmem>>, vector<64x32xbf16>
    %c0_1 = arith.constant 0 : index
    %c0_2 = arith.constant 0 : index
    %1 = vector.load %arg1[%c0_1, %c0_2] : memref<32x512xbf16, #tpu.memory_space<vmem>>, vector<32x512xbf16>
    %cst = arith.constant dense<0.000000e+00> : vector<64x512xf32>
    %2 = tpu.matmul %0, %1, %cst {dimension_numbers = #tpu.dot_dimension_numbers<[1], [0], [0], [1], [0, 0, 1, 1], [], []>} : vector<64x32xbf16>, vector<32x512xbf16>, vector<64x512xf32> -> vector<64x512xf32>
    %c0_3 = arith.constant 0 : index
    %c0_4 = arith.constant 0 : index
    %3 = vector.load %arg3[%c0_3, %c0_4] : memref<1x512xf32, #tpu.memory_space<vmem>>, vector<1x512xf32>
    %4 = vector.broadcast %3 : vector<1x512xf32> to vector<64x512xf32>
    %5 = arith.addf %2, %4 : vector<64x512xf32>
    %c0_5 = arith.constant 0 : index
    %c0_6 = arith.constant 0 : index
    %6 = vector.load %arg9[%c0_5, %c0_6] : memref<64x512xf32, #tpu.memory_space<vmem>>, vector<64x512xf32>
    tpu.vector_store %arg9[%c0_5, %c0_6], %5 {strides = array<i32>} : memref<64x512xf32, #tpu.memory_space<vmem>>, vector<64x512xf32>,
    %cst_7 = arith.constant 0.000000e+00 : f32
    %7 = vector.broadcast %cst_7 : f32 to vector<8x128xf32>
    %c0_8 = arith.constant 0 : index
    %c0_9 = arith.constant 0 : index
    %8 = vector.load %arg2[%c0_8, %c0_9] : memref<128x512xbf16, #tpu.memory_space<vmem>>, vector<128x512xbf16>
    %c0_i32 = arith.constant 0 : i32
    %c8_i32 = arith.constant 8 : i32
    %9 = arith.muli %c0_i32, %c8_i32 : i32
    %10 = tpu.assume_multiple %9, 8 : i32
    %11 = arith.index_cast %10 : i32 to index
    %c0_10 = arith.constant 0 : index
    %12 = vector.load %arg9[%11, %c0_10] : memref<64x512xf32, #tpu.memory_space<vmem>>, vector<8x512xf32>
    %13 = arith.truncf %7 : vector<8x128xf32> to vector<8x128xbf16>
    %cst_11 = arith.constant dense<0.000000e+00> : vector<8x512xf32>
    %14 = tpu.matmul %13, %8, %cst_11 {dimension_numbers = #tpu.dot_dimension_numbers<[1], [0], [0], [1], [0, 0, 1, 1], [], []>} : vector<8x128xbf16>, vector<128x512xbf16>, vector<8x512xf32> -> vector<8x512xf32>
    %15 = arith.addf %12, %14 : vector<8x512xf32>
    %16 = vector.extract_strided_slice %15 {offsets = [0, 0], sizes = [8, 128], strides = [1, 1]} : vector<8x512xf32> to vector<8x128xf32>
    %cst_12 = arith.constant 5.000000e-01 : f32
    %17 = vector.broadcast %cst_12 : f32 to vector<8x128xf32>
    %18 = arith.mulf %17, %16 : vector<8x128xf32>
    %19 = math.tanh %18 : vector<8x128xf32>
    %cst_13 = arith.constant 5.000000e-01 : f32
    %20 = vector.broadcast %cst_13 : f32 to vector<8x128xf32>
    %21 = arith.mulf %20, %19 : vector<8x128xf32>
    %cst_14 = arith.constant 5.000000e-01 : f32
    %22 = vector.broadcast %cst_14 : f32 to vector<8x128xf32>
    %23 = arith.addf %21, %22 : vector<8x128xf32>
    %24 = vector.extract_strided_slice %15 {offsets = [0, 128], sizes = [8, 128], strides = [1, 1]} : vector<8x512xf32> to vector<8x128xf32>
    %cst_15 = arith.constant 5.000000e-01 : f32
    %25 = vector.broadcast %cst_15 : f32 to vector<8x128xf32>
    %26 = arith.mulf %25, %24 : vector<8x128xf32>
    %27 = math.tanh %26 : vector<8x128xf32>
    %cst_16 = arith.constant 5.000000e-01 : f32
    %28 = vector.broadcast %cst_16 : f32 to vector<8x128xf32>
    %29 = arith.mulf %28, %27 : vector<8x128xf32>
    %cst_17 = arith.constant 5.000000e-01 : f32
    %30 = vector.broadcast %cst_17 : f32 to vector<8x128xf32>
    %31 = arith.addf %29, %30 : vector<8x128xf32>
    %32 = vector.extract_strided_slice %15 {offsets = [0, 256], sizes = [8, 128], strides = [1, 1]} : vector<8x512xf32> to vector<8x128xf32>
    %33 = math.tanh %32 : vector<8x128xf32>
    %34 = vector.extract_strided_slice %15 {offsets = [0, 384], sizes = [8, 128], strides = [1, 1]} : vector<8x512xf32> to vector<8x128xf32>
    %cst_18 = arith.constant 5.000000e-01 : f32
    %35 = vector.broadcast %cst_18 : f32 to vector<8x128xf32>
    %36 = arith.mulf %35, %34 : vector<8x128xf32>
    %37 = math.tanh %36 : vector<8x128xf32>
    %cst_19 = arith.constant 5.000000e-01 : f32
    %38 = vector.broadcast %cst_19 : f32 to vector<8x128xf32>
    %39 = arith.mulf %38, %37 : vector<8x128xf32>
    %cst_20 = arith.constant 5.000000e-01 : f32
    %40 = vector.broadcast %cst_20 : f32 to vector<8x128xf32>
    %41 = arith.addf %39, %40 : vector<8x128xf32>
    %42 = arith.mulf %31, %7 : vector<8x128xf32>
    %43 = arith.mulf %23, %33 : vector<8x128xf32>
    %44 = arith.addf %42, %43 : vector<8x128xf32>
    %45 = math.tanh %44 : vector<8x128xf32>
    %46 = arith.mulf %41, %45 : vector<8x128xf32>
    %47 = arith.index_cast %10 : i32 to index
    %c0_21 = arith.constant 0 : index
    %48 = vector.load %arg10[%47, %c0_21] : memref<64x128xf32, #tpu.memory_space<vmem>>, vector<8x128xf32>
    tpu.vector_store %arg10[%47, %c0_21], %46 {strides = array<i32>} : memref<64x128xf32, #tpu.memory_space<vmem>>, vector<8x128xf32>,
    %c1_i32 = arith.constant 1 : i32
    %c8_i32_22 = arith.constant 8 : i32
    %49 = arith.muli %c1_i32, %c8_i32_22 : i32
    %50 = tpu.assume_multiple %49, 8 : i32
    %51 = arith.index_cast %50 : i32 to index
    %c0_23 = arith.constant 0 : index
    %52 = vector.load %arg9[%51, %c0_23] : memref<64x512xf32, #tpu.memory_space<vmem>>, vector<8x512xf32>
    %53 = arith.truncf %46 : vector<8x128xf32> to vector<8x128xbf16>
    %cst_24 = arith.constant dense<0.000000e+00> : vector<8x512xf32>
    %54 = tpu.matmul %53, %8, %cst_24 {dimension_numbers = #tpu.dot_dimension_numbers<[1], [0], [0], [1], [0, 0, 1, 1], [], []>} : vector<8x128xbf16>, vector<128x512xbf16>, vector<8x512xf32> -> vector<8x512xf32>
    %55 = arith.addf %52, %54 : vector<8x512xf32>
    %56 = vector.extract_strided_slice %55 {offsets = [0, 0], sizes = [8, 128], strides = [1, 1]} : vector<8x512xf32> to vector<8x128xf32>
    %cst_25 = arith.constant 5.000000e-01 : f32
    %57 = vector.broadcast %cst_25 : f32 to vector<8x128xf32>
    %58 = arith.mulf %57, %56 : vector<8x128xf32>
    %59 = math.tanh %58 : vector<8x128xf32>
    %cst_26 = arith.constant 5.000000e-01 : f32
    %60 = vector.broadcast %cst_26 : f32 to vector<8x128xf32>
    %61 = arith.mulf %60, %59 : vector<8x128xf32>
    %cst_27 = arith.constant 5.000000e-01 : f32
    %62 = vector.broadcast %cst_27 : f32 to vector<8x128xf32>
    %63 = arith.addf %61, %62 : vector<8x128xf32>
    %64 = vector.extract_strided_slice %55 {offsets = [0, 128], sizes = [8, 128], strides = [1, 1]} : vector<8x512xf32> to vector<8x128xf32>
    %cst_28 = arith.constant 5.000000e-01 : f32
    %65 = vector.broadcast %cst_28 : f32 to vector<8x128xf32>
    %66 = arith.mulf %65, %64 : vector<8x128xf32>
    %67 = math.tanh %66 : vector<8x128xf32>
    %cst_29 = arith.constant 5.000000e-01 : f32
    %68 = vector.broadcast %cst_29 : f32 to vector<8x128xf32>
    %69 = arith.mulf %68, %67 : vector<8x128xf32>
    %cst_30 = arith.constant 5.000000e-01 : f32
    %70 = vector.broadcast %cst_30 : f32 to vector<8x128xf32>
    %71 = arith.addf %69, %70 : vector<8x128xf32>
    %72 = vector.extract_strided_slice %55 {offsets = [0, 256], sizes = [8, 128], strides = [1, 1]} : vector<8x512xf32> to vector<8x128xf32>
    %73 = math.tanh %72 : vector<8x128xf32>
    %74 = vector.extract_strided_slice %55 {offsets = [0, 384], sizes = [8, 128], strides = [1, 1]} : vector<8x512xf32> to vector<8x128xf32>
    %cst_31 = arith.constant 5.000000e-01 : f32
    %75 = vector.broadcast %cst_31 : f32 to vector<8x128xf32>
    %76 = arith.mulf %75, %74 : vector<8x128xf32>
    %77 = math.tanh %76 : vector<8x128xf32>
    %cst_32 = arith.constant 5.000000e-01 : f32
    %78 = vector.broadcast %cst_32 : f32 to vector<8x128xf32>
    %79 = arith.mulf %78, %77 : vector<8x128xf32>
    %cst_33 = arith.constant 5.000000e-01 : f32
    %80 = vector.broadcast %cst_33 : f32 to vector<8x128xf32>
    %81 = arith.addf %79, %80 : vector<8x128xf32>
    %82 = arith.mulf %71, %44 : vector<8x128xf32>
    %83 = arith.mulf %63, %73 : vector<8x128xf32>
    %84 = arith.addf %82, %83 : vector<8x128xf32>
    %85 = math.tanh %84 : vector<8x128xf32>
    %86 = arith.mulf %81, %85 : vector<8x128xf32>
    %87 = arith.index_cast %50 : i32 to index
    %c0_34 = arith.constant 0 : index
    %88 = vector.load %arg10[%87, %c0_34] : memref<64x128xf32, #tpu.memory_space<vmem>>, vector<8x128xf32>
    tpu.vector_store %arg10[%87, %c0_34], %86 {strides = array<i32>} : memref<64x128xf32, #tpu.memory_space<vmem>>, vector<8x128xf32>,
    %c2_i32 = arith.constant 2 : i32
    %c8_i32_35 = arith.constant 8 : i32
    %89 = arith.muli %c2_i32, %c8_i32_35 : i32
    %90 = tpu.assume_multiple %89, 8 : i32
    %91 = arith.index_cast %90 : i32 to index
    %c0_36 = arith.constant 0 : index
    %92 = vector.load %arg9[%91, %c0_36] : memref<64x512xf32, #tpu.memory_space<vmem>>, vector<8x512xf32>
    %93 = arith.truncf %86 : vector<8x128xf32> to vector<8x128xbf16>
    %cst_37 = arith.constant dense<0.000000e+00> : vector<8x512xf32>
    %94 = tpu.matmul %93, %8, %cst_37 {dimension_numbers = #tpu.dot_dimension_numbers<[1], [0], [0], [1], [0, 0, 1, 1], [], []>} : vector<8x128xbf16>, vector<128x512xbf16>, vector<8x512xf32> -> vector<8x512xf32>
    %95 = arith.addf %92, %94 : vector<8x512xf32>
    %96 = vector.extract_strided_slice %95 {offsets = [0, 0], sizes = [8, 128], strides = [1, 1]} : vector<8x512xf32> to vector<8x128xf32>
    %cst_38 = arith.constant 5.000000e-01 : f32
    %97 = vector.broadcast %cst_38 : f32 to vector<8x128xf32>
    %98 = arith.mulf %97, %96 : vector<8x128xf32>
    %99 = math.tanh %98 : vector<8x128xf32>
    %cst_39 = arith.constant 5.000000e-01 : f32
    %100 = vector.broadcast %cst_39 : f32 to vector<8x128xf32>
    %101 = arith.mulf %100, %99 : vector<8x128xf32>
    %cst_40 = arith.constant 5.000000e-01 : f32
    %102 = vector.broadcast %cst_40 : f32 to vector<8x128xf32>
    %103 = arith.addf %101, %102 : vector<8x128xf32>
    %104 = vector.extract_strided_slice %95 {offsets = [0, 128], sizes = [8, 128], strides = [1, 1]} : vector<8x512xf32> to vector<8x128xf32>
    %cst_41 = arith.constant 5.000000e-01 : f32
    %105 = vector.broadcast %cst_41 : f32 to vector<8x128xf32>
    %106 = arith.mulf %105, %104 : vector<8x128xf32>
    %107 = math.tanh %106 : vector<8x128xf32>
    %cst_42 = arith.constant 5.000000e-01 : f32
    %108 = vector.broadcast %cst_42 : f32 to vector<8x128xf32>
    %109 = arith.mulf %108, %107 : vector<8x128xf32>
    %cst_43 = arith.constant 5.000000e-01 : f32
    %110 = vector.broadcast %cst_43 : f32 to vector<8x128xf32>
    %111 = arith.addf %109, %110 : vector<8x128xf32>
    %112 = vector.extract_strided_slice %95 {offsets = [0, 256], sizes = [8, 128], strides = [1, 1]} : vector<8x512xf32> to vector<8x128xf32>
    %113 = math.tanh %112 : vector<8x128xf32>
    %114 = vector.extract_strided_slice %95 {offsets = [0, 384], sizes = [8, 128], strides = [1, 1]} : vector<8x512xf32> to vector<8x128xf32>
    %cst_44 = arith.constant 5.000000e-01 : f32
    %115 = vector.broadcast %cst_44 : f32 to vector<8x128xf32>
    %116 = arith.mulf %115, %114 : vector<8x128xf32>
    %117 = math.tanh %116 : vector<8x128xf32>
    %cst_45 = arith.constant 5.000000e-01 : f32
    %118 = vector.broadcast %cst_45 : f32 to vector<8x128xf32>
    %119 = arith.mulf %118, %117 : vector<8x128xf32>
    %cst_46 = arith.constant 5.000000e-01 : f32
    %120 = vector.broadcast %cst_46 : f32 to vector<8x128xf32>
    %121 = arith.addf %119, %120 : vector<8x128xf32>
    %122 = arith.mulf %111, %84 : vector<8x128xf32>
    %123 = arith.mulf %103, %113 : vector<8x128xf32>
    %124 = arith.addf %122, %123 : vector<8x128xf32>
    %125 = math.tanh %124 : vector<8x128xf32>
    %126 = arith.mulf %121, %125 : vector<8x128xf32>
    %127 = arith.index_cast %90 : i32 to index
    %c0_47 = arith.constant 0 : index
    %128 = vector.load %arg10[%127, %c0_47] : memref<64x128xf32, #tpu.memory_space<vmem>>, vector<8x128xf32>
    tpu.vector_store %arg10[%127, %c0_47], %126 {strides = array<i32>} : memref<64x128xf32, #tpu.memory_space<vmem>>, vector<8x128xf32>,
    %c3_i32 = arith.constant 3 : i32
    %c8_i32_48 = arith.constant 8 : i32
    %129 = arith.muli %c3_i32, %c8_i32_48 : i32
    %130 = tpu.assume_multiple %129, 8 : i32
    %131 = arith.index_cast %130 : i32 to index
    %c0_49 = arith.constant 0 : index
    %132 = vector.load %arg9[%131, %c0_49] : memref<64x512xf32, #tpu.memory_space<vmem>>, vector<8x512xf32>
    %133 = arith.truncf %126 : vector<8x128xf32> to vector<8x128xbf16>
    %cst_50 = arith.constant dense<0.000000e+00> : vector<8x512xf32>
    %134 = tpu.matmul %133, %8, %cst_50 {dimension_numbers = #tpu.dot_dimension_numbers<[1], [0], [0], [1], [0, 0, 1, 1], [], []>} : vector<8x128xbf16>, vector<128x512xbf16>, vector<8x512xf32> -> vector<8x512xf32>
    %135 = arith.addf %132, %134 : vector<8x512xf32>
    %136 = vector.extract_strided_slice %135 {offsets = [0, 0], sizes = [8, 128], strides = [1, 1]} : vector<8x512xf32> to vector<8x128xf32>
    %cst_51 = arith.constant 5.000000e-01 : f32
    %137 = vector.broadcast %cst_51 : f32 to vector<8x128xf32>
    %138 = arith.mulf %137, %136 : vector<8x128xf32>
    %139 = math.tanh %138 : vector<8x128xf32>
    %cst_52 = arith.constant 5.000000e-01 : f32
    %140 = vector.broadcast %cst_52 : f32 to vector<8x128xf32>
    %141 = arith.mulf %140, %139 : vector<8x128xf32>
    %cst_53 = arith.constant 5.000000e-01 : f32
    %142 = vector.broadcast %cst_53 : f32 to vector<8x128xf32>
    %143 = arith.addf %141, %142 : vector<8x128xf32>
    %144 = vector.extract_strided_slice %135 {offsets = [0, 128], sizes = [8, 128], strides = [1, 1]} : vector<8x512xf32> to vector<8x128xf32>
    %cst_54 = arith.constant 5.000000e-01 : f32
    %145 = vector.broadcast %cst_54 : f32 to vector<8x128xf32>
    %146 = arith.mulf %145, %144 : vector<8x128xf32>
    %147 = math.tanh %146 : vector<8x128xf32>
    %cst_55 = arith.constant 5.000000e-01 : f32
    %148 = vector.broadcast %cst_55 : f32 to vector<8x128xf32>
    %149 = arith.mulf %148, %147 : vector<8x128xf32>
    %cst_56 = arith.constant 5.000000e-01 : f32
    %150 = vector.broadcast %cst_56 : f32 to vector<8x128xf32>
    %151 = arith.addf %149, %150 : vector<8x128xf32>
    %152 = vector.extract_strided_slice %135 {offsets = [0, 256], sizes = [8, 128], strides = [1, 1]} : vector<8x512xf32> to vector<8x128xf32>
    %153 = math.tanh %152 : vector<8x128xf32>
    %154 = vector.extract_strided_slice %135 {offsets = [0, 384], sizes = [8, 128], strides = [1, 1]} : vector<8x512xf32> to vector<8x128xf32>
    %cst_57 = arith.constant 5.000000e-01 : f32
    %155 = vector.broadcast %cst_57 : f32 to vector<8x128xf32>
    %156 = arith.mulf %155, %154 : vector<8x128xf32>
    %157 = math.tanh %156 : vector<8x128xf32>
    %cst_58 = arith.constant 5.000000e-01 : f32
    %158 = vector.broadcast %cst_58 : f32 to vector<8x128xf32>
    %159 = arith.mulf %158, %157 : vector<8x128xf32>
    %cst_59 = arith.constant 5.000000e-01 : f32
    %160 = vector.broadcast %cst_59 : f32 to vector<8x128xf32>
    %161 = arith.addf %159, %160 : vector<8x128xf32>
    %162 = arith.mulf %151, %124 : vector<8x128xf32>
    %163 = arith.mulf %143, %153 : vector<8x128xf32>
    %164 = arith.addf %162, %163 : vector<8x128xf32>
    %165 = math.tanh %164 : vector<8x128xf32>
    %166 = arith.mulf %161, %165 : vector<8x128xf32>
    %167 = arith.index_cast %130 : i32 to index
    %c0_60 = arith.constant 0 : index
    %168 = vector.load %arg10[%167, %c0_60] : memref<64x128xf32, #tpu.memory_space<vmem>>, vector<8x128xf32>
    tpu.vector_store %arg10[%167, %c0_60], %166 {strides = array<i32>} : memref<64x128xf32, #tpu.memory_space<vmem>>, vector<8x128xf32>,
    %c4_i32 = arith.constant 4 : i32
    %c8_i32_61 = arith.constant 8 : i32
    %169 = arith.muli %c4_i32, %c8_i32_61 : i32
    %170 = tpu.assume_multiple %169, 8 : i32
    %171 = arith.index_cast %170 : i32 to index
    %c0_62 = arith.constant 0 : index
    %172 = vector.load %arg9[%171, %c0_62] : memref<64x512xf32, #tpu.memory_space<vmem>>, vector<8x512xf32>
    %173 = arith.truncf %166 : vector<8x128xf32> to vector<8x128xbf16>
    %cst_63 = arith.constant dense<0.000000e+00> : vector<8x512xf32>
    %174 = tpu.matmul %173, %8, %cst_63 {dimension_numbers = #tpu.dot_dimension_numbers<[1], [0], [0], [1], [0, 0, 1, 1], [], []>} : vector<8x128xbf16>, vector<128x512xbf16>, vector<8x512xf32> -> vector<8x512xf32>
    %175 = arith.addf %172, %174 : vector<8x512xf32>
    %176 = vector.extract_strided_slice %175 {offsets = [0, 0], sizes = [8, 128], strides = [1, 1]} : vector<8x512xf32> to vector<8x128xf32>
    %cst_64 = arith.constant 5.000000e-01 : f32
    %177 = vector.broadcast %cst_64 : f32 to vector<8x128xf32>
    %178 = arith.mulf %177, %176 : vector<8x128xf32>
    %179 = math.tanh %178 : vector<8x128xf32>
    %cst_65 = arith.constant 5.000000e-01 : f32
    %180 = vector.broadcast %cst_65 : f32 to vector<8x128xf32>
    %181 = arith.mulf %180, %179 : vector<8x128xf32>
    %cst_66 = arith.constant 5.000000e-01 : f32
    %182 = vector.broadcast %cst_66 : f32 to vector<8x128xf32>
    %183 = arith.addf %181, %182 : vector<8x128xf32>
    %184 = vector.extract_strided_slice %175 {offsets = [0, 128], sizes = [8, 128], strides = [1, 1]} : vector<8x512xf32> to vector<8x128xf32>
    %cst_67 = arith.constant 5.000000e-01 : f32
    %185 = vector.broadcast %cst_67 : f32 to vector<8x128xf32>
    %186 = arith.mulf %185, %184 : vector<8x128xf32>
    %187 = math.tanh %186 : vector<8x128xf32>
    %cst_68 = arith.constant 5.000000e-01 : f32
    %188 = vector.broadcast %cst_68 : f32 to vector<8x128xf32>
    %189 = arith.mulf %188, %187 : vector<8x128xf32>
    %cst_69 = arith.constant 5.000000e-01 : f32
    %190 = vector.broadcast %cst_69 : f32 to vector<8x128xf32>
    %191 = arith.addf %189, %190 : vector<8x128xf32>
    %192 = vector.extract_strided_slice %175 {offsets = [0, 256], sizes = [8, 128], strides = [1, 1]} : vector<8x512xf32> to vector<8x128xf32>
    %193 = math.tanh %192 : vector<8x128xf32>
    %194 = vector.extract_strided_slice %175 {offsets = [0, 384], sizes = [8, 128], strides = [1, 1]} : vector<8x512xf32> to vector<8x128xf32>
    %cst_70 = arith.constant 5.000000e-01 : f32
    %195 = vector.broadcast %cst_70 : f32 to vector<8x128xf32>
    %196 = arith.mulf %195, %194 : vector<8x128xf32>
    %197 = math.tanh %196 : vector<8x128xf32>
    %cst_71 = arith.constant 5.000000e-01 : f32
    %198 = vector.broadcast %cst_71 : f32 to vector<8x128xf32>
    %199 = arith.mulf %198, %197 : vector<8x128xf32>
    %cst_72 = arith.constant 5.000000e-01 : f32
    %200 = vector.broadcast %cst_72 : f32 to vector<8x128xf32>
    %201 = arith.addf %199, %200 : vector<8x128xf32>
    %202 = arith.mulf %191, %164 : vector<8x128xf32>
    %203 = arith.mulf %183, %193 : vector<8x128xf32>
    %204 = arith.addf %202, %203 : vector<8x128xf32>
    %205 = math.tanh %204 : vector<8x128xf32>
    %206 = arith.mulf %201, %205 : vector<8x128xf32>
    %207 = arith.index_cast %170 : i32 to index
    %c0_73 = arith.constant 0 : index
    %208 = vector.load %arg10[%207, %c0_73] : memref<64x128xf32, #tpu.memory_space<vmem>>, vector<8x128xf32>
    tpu.vector_store %arg10[%207, %c0_73], %206 {strides = array<i32>} : memref<64x128xf32, #tpu.memory_space<vmem>>, vector<8x128xf32>,
    %c5_i32 = arith.constant 5 : i32
    %c8_i32_74 = arith.constant 8 : i32
    %209 = arith.muli %c5_i32, %c8_i32_74 : i32
    %210 = tpu.assume_multiple %209, 8 : i32
    %211 = arith.index_cast %210 : i32 to index
    %c0_75 = arith.constant 0 : index
    %212 = vector.load %arg9[%211, %c0_75] : memref<64x512xf32, #tpu.memory_space<vmem>>, vector<8x512xf32>
    %213 = arith.truncf %206 : vector<8x128xf32> to vector<8x128xbf16>
    %cst_76 = arith.constant dense<0.000000e+00> : vector<8x512xf32>
    %214 = tpu.matmul %213, %8, %cst_76 {dimension_numbers = #tpu.dot_dimension_numbers<[1], [0], [0], [1], [0, 0, 1, 1], [], []>} : vector<8x128xbf16>, vector<128x512xbf16>, vector<8x512xf32> -> vector<8x512xf32>
    %215 = arith.addf %212, %214 : vector<8x512xf32>
    %216 = vector.extract_strided_slice %215 {offsets = [0, 0], sizes = [8, 128], strides = [1, 1]} : vector<8x512xf32> to vector<8x128xf32>
    %cst_77 = arith.constant 5.000000e-01 : f32
    %217 = vector.broadcast %cst_77 : f32 to vector<8x128xf32>
    %218 = arith.mulf %217, %216 : vector<8x128xf32>
    %219 = math.tanh %218 : vector<8x128xf32>
    %cst_78 = arith.constant 5.000000e-01 : f32
    %220 = vector.broadcast %cst_78 : f32 to vector<8x128xf32>
    %221 = arith.mulf %220, %219 : vector<8x128xf32>
    %cst_79 = arith.constant 5.000000e-01 : f32
    %222 = vector.broadcast %cst_79 : f32 to vector<8x128xf32>
    %223 = arith.addf %221, %222 : vector<8x128xf32>
    %224 = vector.extract_strided_slice %215 {offsets = [0, 128], sizes = [8, 128], strides = [1, 1]} : vector<8x512xf32> to vector<8x128xf32>
    %cst_80 = arith.constant 5.000000e-01 : f32
    %225 = vector.broadcast %cst_80 : f32 to vector<8x128xf32>
    %226 = arith.mulf %225, %224 : vector<8x128xf32>
    %227 = math.tanh %226 : vector<8x128xf32>
    %cst_81 = arith.constant 5.000000e-01 : f32
    %228 = vector.broadcast %cst_81 : f32 to vector<8x128xf32>
    %229 = arith.mulf %228, %227 : vector<8x128xf32>
    %cst_82 = arith.constant 5.000000e-01 : f32
    %230 = vector.broadcast %cst_82 : f32 to vector<8x128xf32>
    %231 = arith.addf %229, %230 : vector<8x128xf32>
    %232 = vector.extract_strided_slice %215 {offsets = [0, 256], sizes = [8, 128], strides = [1, 1]} : vector<8x512xf32> to vector<8x128xf32>
    %233 = math.tanh %232 : vector<8x128xf32>
    %234 = vector.extract_strided_slice %215 {offsets = [0, 384], sizes = [8, 128], strides = [1, 1]} : vector<8x512xf32> to vector<8x128xf32>
    %cst_83 = arith.constant 5.000000e-01 : f32
    %235 = vector.broadcast %cst_83 : f32 to vector<8x128xf32>
    %236 = arith.mulf %235, %234 : vector<8x128xf32>
    %237 = math.tanh %236 : vector<8x128xf32>
    %cst_84 = arith.constant 5.000000e-01 : f32
    %238 = vector.broadcast %cst_84 : f32 to vector<8x128xf32>
    %239 = arith.mulf %238, %237 : vector<8x128xf32>
    %cst_85 = arith.constant 5.000000e-01 : f32
    %240 = vector.broadcast %cst_85 : f32 to vector<8x128xf32>
    %241 = arith.addf %239, %240 : vector<8x128xf32>
    %242 = arith.mulf %231, %204 : vector<8x128xf32>
    %243 = arith.mulf %223, %233 : vector<8x128xf32>
    %244 = arith.addf %242, %243 : vector<8x128xf32>
    %245 = math.tanh %244 : vector<8x128xf32>
    %246 = arith.mulf %241, %245 : vector<8x128xf32>
    %247 = arith.index_cast %210 : i32 to index
    %c0_86 = arith.constant 0 : index
    %248 = vector.load %arg10[%247, %c0_86] : memref<64x128xf32, #tpu.memory_space<vmem>>, vector<8x128xf32>
    tpu.vector_store %arg10[%247, %c0_86], %246 {strides = array<i32>} : memref<64x128xf32, #tpu.memory_space<vmem>>, vector<8x128xf32>,
    %c6_i32 = arith.constant 6 : i32
    %c8_i32_87 = arith.constant 8 : i32
    %249 = arith.muli %c6_i32, %c8_i32_87 : i32
    %250 = tpu.assume_multiple %249, 8 : i32
    %251 = arith.index_cast %250 : i32 to index
    %c0_88 = arith.constant 0 : index
    %252 = vector.load %arg9[%251, %c0_88] : memref<64x512xf32, #tpu.memory_space<vmem>>, vector<8x512xf32>
    %253 = arith.truncf %246 : vector<8x128xf32> to vector<8x128xbf16>
    %cst_89 = arith.constant dense<0.000000e+00> : vector<8x512xf32>
    %254 = tpu.matmul %253, %8, %cst_89 {dimension_numbers = #tpu.dot_dimension_numbers<[1], [0], [0], [1], [0, 0, 1, 1], [], []>} : vector<8x128xbf16>, vector<128x512xbf16>, vector<8x512xf32> -> vector<8x512xf32>
    %255 = arith.addf %252, %254 : vector<8x512xf32>
    %256 = vector.extract_strided_slice %255 {offsets = [0, 0], sizes = [8, 128], strides = [1, 1]} : vector<8x512xf32> to vector<8x128xf32>
    %cst_90 = arith.constant 5.000000e-01 : f32
    %257 = vector.broadcast %cst_90 : f32 to vector<8x128xf32>
    %258 = arith.mulf %257, %256 : vector<8x128xf32>
    %259 = math.tanh %258 : vector<8x128xf32>
    %cst_91 = arith.constant 5.000000e-01 : f32
    %260 = vector.broadcast %cst_91 : f32 to vector<8x128xf32>
    %261 = arith.mulf %260, %259 : vector<8x128xf32>
    %cst_92 = arith.constant 5.000000e-01 : f32
    %262 = vector.broadcast %cst_92 : f32 to vector<8x128xf32>
    %263 = arith.addf %261, %262 : vector<8x128xf32>
    %264 = vector.extract_strided_slice %255 {offsets = [0, 128], sizes = [8, 128], strides = [1, 1]} : vector<8x512xf32> to vector<8x128xf32>
    %cst_93 = arith.constant 5.000000e-01 : f32
    %265 = vector.broadcast %cst_93 : f32 to vector<8x128xf32>
    %266 = arith.mulf %265, %264 : vector<8x128xf32>
    %267 = math.tanh %266 : vector<8x128xf32>
    %cst_94 = arith.constant 5.000000e-01 : f32
    %268 = vector.broadcast %cst_94 : f32 to vector<8x128xf32>
    %269 = arith.mulf %268, %267 : vector<8x128xf32>
    %cst_95 = arith.constant 5.000000e-01 : f32
    %270 = vector.broadcast %cst_95 : f32 to vector<8x128xf32>
    %271 = arith.addf %269, %270 : vector<8x128xf32>
    %272 = vector.extract_strided_slice %255 {offsets = [0, 256], sizes = [8, 128], strides = [1, 1]} : vector<8x512xf32> to vector<8x128xf32>
    %273 = math.tanh %272 : vector<8x128xf32>
    %274 = vector.extract_strided_slice %255 {offsets = [0, 384], sizes = [8, 128], strides = [1, 1]} : vector<8x512xf32> to vector<8x128xf32>
    %cst_96 = arith.constant 5.000000e-01 : f32
    %275 = vector.broadcast %cst_96 : f32 to vector<8x128xf32>
    %276 = arith.mulf %275, %274 : vector<8x128xf32>
    %277 = math.tanh %276 : vector<8x128xf32>
    %cst_97 = arith.constant 5.000000e-01 : f32
    %278 = vector.broadcast %cst_97 : f32 to vector<8x128xf32>
    %279 = arith.mulf %278, %277 : vector<8x128xf32>
    %cst_98 = arith.constant 5.000000e-01 : f32
    %280 = vector.broadcast %cst_98 : f32 to vector<8x128xf32>
    %281 = arith.addf %279, %280 : vector<8x128xf32>
    %282 = arith.mulf %271, %244 : vector<8x128xf32>
    %283 = arith.mulf %263, %273 : vector<8x128xf32>
    %284 = arith.addf %282, %283 : vector<8x128xf32>
    %285 = math.tanh %284 : vector<8x128xf32>
    %286 = arith.mulf %281, %285 : vector<8x128xf32>
    %287 = arith.index_cast %250 : i32 to index
    %c0_99 = arith.constant 0 : index
    %288 = vector.load %arg10[%287, %c0_99] : memref<64x128xf32, #tpu.memory_space<vmem>>, vector<8x128xf32>
    tpu.vector_store %arg10[%287, %c0_99], %286 {strides = array<i32>} : memref<64x128xf32, #tpu.memory_space<vmem>>, vector<8x128xf32>,
    %c7_i32 = arith.constant 7 : i32
    %c8_i32_100 = arith.constant 8 : i32
    %289 = arith.muli %c7_i32, %c8_i32_100 : i32
    %290 = tpu.assume_multiple %289, 8 : i32
    %291 = arith.index_cast %290 : i32 to index
    %c0_101 = arith.constant 0 : index
    %292 = vector.load %arg9[%291, %c0_101] : memref<64x512xf32, #tpu.memory_space<vmem>>, vector<8x512xf32>
    %293 = arith.truncf %286 : vector<8x128xf32> to vector<8x128xbf16>
    %cst_102 = arith.constant dense<0.000000e+00> : vector<8x512xf32>
    %294 = tpu.matmul %293, %8, %cst_102 {dimension_numbers = #tpu.dot_dimension_numbers<[1], [0], [0], [1], [0, 0, 1, 1], [], []>} : vector<8x128xbf16>, vector<128x512xbf16>, vector<8x512xf32> -> vector<8x512xf32>
    %295 = arith.addf %292, %294 : vector<8x512xf32>
    %296 = vector.extract_strided_slice %295 {offsets = [0, 0], sizes = [8, 128], strides = [1, 1]} : vector<8x512xf32> to vector<8x128xf32>
    %cst_103 = arith.constant 5.000000e-01 : f32
    %297 = vector.broadcast %cst_103 : f32 to vector<8x128xf32>
    %298 = arith.mulf %297, %296 : vector<8x128xf32>
    %299 = math.tanh %298 : vector<8x128xf32>
    %cst_104 = arith.constant 5.000000e-01 : f32
    %300 = vector.broadcast %cst_104 : f32 to vector<8x128xf32>
    %301 = arith.mulf %300, %299 : vector<8x128xf32>
    %cst_105 = arith.constant 5.000000e-01 : f32
    %302 = vector.broadcast %cst_105 : f32 to vector<8x128xf32>
    %303 = arith.addf %301, %302 : vector<8x128xf32>
    %304 = vector.extract_strided_slice %295 {offsets = [0, 128], sizes = [8, 128], strides = [1, 1]} : vector<8x512xf32> to vector<8x128xf32>
    %cst_106 = arith.constant 5.000000e-01 : f32
    %305 = vector.broadcast %cst_106 : f32 to vector<8x128xf32>
    %306 = arith.mulf %305, %304 : vector<8x128xf32>
    %307 = math.tanh %306 : vector<8x128xf32>
    %cst_107 = arith.constant 5.000000e-01 : f32
    %308 = vector.broadcast %cst_107 : f32 to vector<8x128xf32>
    %309 = arith.mulf %308, %307 : vector<8x128xf32>
    %cst_108 = arith.constant 5.000000e-01 : f32
    %310 = vector.broadcast %cst_108 : f32 to vector<8x128xf32>
    %311 = arith.addf %309, %310 : vector<8x128xf32>
    %312 = vector.extract_strided_slice %295 {offsets = [0, 256], sizes = [8, 128], strides = [1, 1]} : vector<8x512xf32> to vector<8x128xf32>
    %313 = math.tanh %312 : vector<8x128xf32>
    %314 = vector.extract_strided_slice %295 {offsets = [0, 384], sizes = [8, 128], strides = [1, 1]} : vector<8x512xf32> to vector<8x128xf32>
    %cst_109 = arith.constant 5.000000e-01 : f32
    %315 = vector.broadcast %cst_109 : f32 to vector<8x128xf32>
    %316 = arith.mulf %315, %314 : vector<8x128xf32>
    %317 = math.tanh %316 : vector<8x128xf32>
    %cst_110 = arith.constant 5.000000e-01 : f32
    %318 = vector.broadcast %cst_110 : f32 to vector<8x128xf32>
    %319 = arith.mulf %318, %317 : vector<8x128xf32>
    %cst_111 = arith.constant 5.000000e-01 : f32
    %320 = vector.broadcast %cst_111 : f32 to vector<8x128xf32>
    %321 = arith.addf %319, %320 : vector<8x128xf32>
    %322 = arith.mulf %311, %284 : vector<8x128xf32>
    %323 = arith.mulf %303, %313 : vector<8x128xf32>
    %324 = arith.addf %322, %323 : vector<8x128xf32>
    %325 = math.tanh %324 : vector<8x128xf32>
    %326 = arith.mulf %321, %325 : vector<8x128xf32>
    %327 = arith.index_cast %290 : i32 to index
    %c0_112 = arith.constant 0 : index
    %328 = vector.load %arg10[%327, %c0_112] : memref<64x128xf32, #tpu.memory_space<vmem>>, vector<8x128xf32>
    tpu.vector_store %arg10[%327, %c0_112], %326 {strides = array<i32>} : memref<64x128xf32, #tpu.memory_space<vmem>>, vector<8x128xf32>,
    %c8_i32_113 = arith.constant 8 : i32
    tpu.wait_dma2 semaphore(%arg12 : memref<!tpu.dma_semaphore, #tpu.memory_space<semaphore_mem>>) src(%arg4 : memref<256x512xbf16, #tpu.memory_space<any>>) dst(%arg11 : memref<256x512xbf16, #tpu.memory_space<vmem>>)
    %c0_114 = arith.constant 0 : index
    %c0_115 = arith.constant 0 : index
    %329 = vector.load %arg11[%c0_114, %c0_115] : memref<256x512xbf16, #tpu.memory_space<vmem>>, vector<256x512xbf16>
    %c0_116 = arith.constant 0 : index
    %c0_117 = arith.constant 0 : index
    %330 = vector.load %arg5[%c0_116, %c0_117] : memref<1x512xf32, #tpu.memory_space<vmem>>, vector<1x512xf32>
    %331 = vector.shape_cast %330 : vector<1x512xf32> to vector<1x512xf32>
    %332 = vector.broadcast %331 : vector<1x512xf32> to vector<8x512xf32>
    %c0_i32_118 = arith.constant 0 : i32
    %c8_i32_119 = arith.constant 8 : i32
    %333 = arith.muli %c0_i32_118, %c8_i32_119 : i32
    %334 = tpu.assume_multiple %333, 8 : i32
    %335 = arith.index_cast %334 : i32 to index
    %c0_120 = arith.constant 0 : index
    %336 = vector.load %arg10[%335, %c0_120] : memref<64x128xf32, #tpu.memory_space<vmem>>, vector<8x128xf32>
    %337 = arith.truncf %336 : vector<8x128xf32> to vector<8x128xbf16>
    %338 = arith.truncf %7 : vector<8x128xf32> to vector<8x128xbf16>
    %339 = tpu.concatenate %337, %338 in 1 : vector<8x128xbf16>, vector<8x128xbf16> -> vector<8x256xbf16>
    %cst_121 = arith.constant dense<0.000000e+00> : vector<8x512xf32>
    %340 = tpu.matmul %339, %329, %cst_121 {dimension_numbers = #tpu.dot_dimension_numbers<[1], [0], [0], [1], [0, 0, 1, 1], [], []>} : vector<8x256xbf16>, vector<256x512xbf16>, vector<8x512xf32> -> vector<8x512xf32>
    %341 = arith.addf %340, %332 : vector<8x512xf32>
    %342 = vector.extract_strided_slice %341 {offsets = [0, 0], sizes = [8, 128], strides = [1, 1]} : vector<8x512xf32> to vector<8x128xf32>
    %cst_122 = arith.constant 5.000000e-01 : f32
    %343 = vector.broadcast %cst_122 : f32 to vector<8x128xf32>
    %344 = arith.mulf %343, %342 : vector<8x128xf32>
    %345 = math.tanh %344 : vector<8x128xf32>
    %cst_123 = arith.constant 5.000000e-01 : f32
    %346 = vector.broadcast %cst_123 : f32 to vector<8x128xf32>
    %347 = arith.mulf %346, %345 : vector<8x128xf32>
    %cst_124 = arith.constant 5.000000e-01 : f32
    %348 = vector.broadcast %cst_124 : f32 to vector<8x128xf32>
    %349 = arith.addf %347, %348 : vector<8x128xf32>
    %350 = vector.extract_strided_slice %341 {offsets = [0, 128], sizes = [8, 128], strides = [1, 1]} : vector<8x512xf32> to vector<8x128xf32>
    %cst_125 = arith.constant 5.000000e-01 : f32
    %351 = vector.broadcast %cst_125 : f32 to vector<8x128xf32>
    %352 = arith.mulf %351, %350 : vector<8x128xf32>
    %353 = math.tanh %352 : vector<8x128xf32>
    %cst_126 = arith.constant 5.000000e-01 : f32
    %354 = vector.broadcast %cst_126 : f32 to vector<8x128xf32>
    %355 = arith.mulf %354, %353 : vector<8x128xf32>
    %cst_127 = arith.constant 5.000000e-01 : f32
    %356 = vector.broadcast %cst_127 : f32 to vector<8x128xf32>
    %357 = arith.addf %355, %356 : vector<8x128xf32>
    %358 = vector.extract_strided_slice %341 {offsets = [0, 256], sizes = [8, 128], strides = [1, 1]} : vector<8x512xf32> to vector<8x128xf32>
    %359 = math.tanh %358 : vector<8x128xf32>
    %360 = vector.extract_strided_slice %341 {offsets = [0, 384], sizes = [8, 128], strides = [1, 1]} : vector<8x512xf32> to vector<8x128xf32>
    %cst_128 = arith.constant 5.000000e-01 : f32
    %361 = vector.broadcast %cst_128 : f32 to vector<8x128xf32>
    %362 = arith.mulf %361, %360 : vector<8x128xf32>
    %363 = math.tanh %362 : vector<8x128xf32>
    %cst_129 = arith.constant 5.000000e-01 : f32
    %364 = vector.broadcast %cst_129 : f32 to vector<8x128xf32>
    %365 = arith.mulf %364, %363 : vector<8x128xf32>
    %cst_130 = arith.constant 5.000000e-01 : f32
    %366 = vector.broadcast %cst_130 : f32 to vector<8x128xf32>
    %367 = arith.addf %365, %366 : vector<8x128xf32>
    %368 = arith.mulf %357, %7 : vector<8x128xf32>
    %369 = arith.mulf %349, %359 : vector<8x128xf32>
    %370 = arith.addf %368, %369 : vector<8x128xf32>
    %371 = math.tanh %370 : vector<8x128xf32>
    %372 = arith.mulf %367, %371 : vector<8x128xf32>
    %c1_i32_131 = arith.constant 1 : i32
    %c8_i32_132 = arith.constant 8 : i32
    %373 = arith.muli %c1_i32_131, %c8_i32_132 : i32
    %374 = tpu.assume_multiple %373, 8 : i32
    %375 = arith.index_cast %374 : i32 to index
    %c0_133 = arith.constant 0 : index
    %376 = vector.load %arg10[%375, %c0_133] : memref<64x128xf32, #tpu.memory_space<vmem>>, vector<8x128xf32>
    %377 = arith.truncf %376 : vector<8x128xf32> to vector<8x128xbf16>
    %378 = arith.truncf %372 : vector<8x128xf32> to vector<8x128xbf16>
    %379 = tpu.concatenate %377, %378 in 1 : vector<8x128xbf16>, vector<8x128xbf16> -> vector<8x256xbf16>
    %cst_134 = arith.constant dense<0.000000e+00> : vector<8x512xf32>
    %380 = tpu.matmul %379, %329, %cst_134 {dimension_numbers = #tpu.dot_dimension_numbers<[1], [0], [0], [1], [0, 0, 1, 1], [], []>} : vector<8x256xbf16>, vector<256x512xbf16>, vector<8x512xf32> -> vector<8x512xf32>
    %381 = arith.addf %380, %332 : vector<8x512xf32>
    %382 = vector.extract_strided_slice %381 {offsets = [0, 0], sizes = [8, 128], strides = [1, 1]} : vector<8x512xf32> to vector<8x128xf32>
    %cst_135 = arith.constant 5.000000e-01 : f32
    %383 = vector.broadcast %cst_135 : f32 to vector<8x128xf32>
    %384 = arith.mulf %383, %382 : vector<8x128xf32>
    %385 = math.tanh %384 : vector<8x128xf32>
    %cst_136 = arith.constant 5.000000e-01 : f32
    %386 = vector.broadcast %cst_136 : f32 to vector<8x128xf32>
    %387 = arith.mulf %386, %385 : vector<8x128xf32>
    %cst_137 = arith.constant 5.000000e-01 : f32
    %388 = vector.broadcast %cst_137 : f32 to vector<8x128xf32>
    %389 = arith.addf %387, %388 : vector<8x128xf32>
    %390 = vector.extract_strided_slice %381 {offsets = [0, 128], sizes = [8, 128], strides = [1, 1]} : vector<8x512xf32> to vector<8x128xf32>
    %cst_138 = arith.constant 5.000000e-01 : f32
    %391 = vector.broadcast %cst_138 : f32 to vector<8x128xf32>
    %392 = arith.mulf %391, %390 : vector<8x128xf32>
    %393 = math.tanh %392 : vector<8x128xf32>
    %cst_139 = arith.constant 5.000000e-01 : f32
    %394 = vector.broadcast %cst_139 : f32 to vector<8x128xf32>
    %395 = arith.mulf %394, %393 : vector<8x128xf32>
    %cst_140 = arith.constant 5.000000e-01 : f32
    %396 = vector.broadcast %cst_140 : f32 to vector<8x128xf32>
    %397 = arith.addf %395, %396 : vector<8x128xf32>
    %398 = vector.extract_strided_slice %381 {offsets = [0, 256], sizes = [8, 128], strides = [1, 1]} : vector<8x512xf32> to vector<8x128xf32>
    %399 = math.tanh %398 : vector<8x128xf32>
    %400 = vector.extract_strided_slice %381 {offsets = [0, 384], sizes = [8, 128], strides = [1, 1]} : vector<8x512xf32> to vector<8x128xf32>
    %cst_141 = arith.constant 5.000000e-01 : f32
    %401 = vector.broadcast %cst_141 : f32 to vector<8x128xf32>
    %402 = arith.mulf %401, %400 : vector<8x128xf32>
    %403 = math.tanh %402 : vector<8x128xf32>
    %cst_142 = arith.constant 5.000000e-01 : f32
    %404 = vector.broadcast %cst_142 : f32 to vector<8x128xf32>
    %405 = arith.mulf %404, %403 : vector<8x128xf32>
    %cst_143 = arith.constant 5.000000e-01 : f32
    %406 = vector.broadcast %cst_143 : f32 to vector<8x128xf32>
    %407 = arith.addf %405, %406 : vector<8x128xf32>
    %408 = arith.mulf %397, %370 : vector<8x128xf32>
    %409 = arith.mulf %389, %399 : vector<8x128xf32>
    %410 = arith.addf %408, %409 : vector<8x128xf32>
    %411 = math.tanh %410 : vector<8x128xf32>
    %412 = arith.mulf %407, %411 : vector<8x128xf32>
    %c2_i32_144 = arith.constant 2 : i32
    %c8_i32_145 = arith.constant 8 : i32
    %413 = arith.muli %c2_i32_144, %c8_i32_145 : i32
    %414 = tpu.assume_multiple %413, 8 : i32
    %415 = arith.index_cast %414 : i32 to index
    %c0_146 = arith.constant 0 : index
    %416 = vector.load %arg10[%415, %c0_146] : memref<64x128xf32, #tpu.memory_space<vmem>>, vector<8x128xf32>
    %417 = arith.truncf %416 : vector<8x128xf32> to vector<8x128xbf16>
    %418 = arith.truncf %412 : vector<8x128xf32> to vector<8x128xbf16>
    %419 = tpu.concatenate %417, %418 in 1 : vector<8x128xbf16>, vector<8x128xbf16> -> vector<8x256xbf16>
    %cst_147 = arith.constant dense<0.000000e+00> : vector<8x512xf32>
    %420 = tpu.matmul %419, %329, %cst_147 {dimension_numbers = #tpu.dot_dimension_numbers<[1], [0], [0], [1], [0, 0, 1, 1], [], []>} : vector<8x256xbf16>, vector<256x512xbf16>, vector<8x512xf32> -> vector<8x512xf32>
    %421 = arith.addf %420, %332 : vector<8x512xf32>
    %422 = vector.extract_strided_slice %421 {offsets = [0, 0], sizes = [8, 128], strides = [1, 1]} : vector<8x512xf32> to vector<8x128xf32>
    %cst_148 = arith.constant 5.000000e-01 : f32
    %423 = vector.broadcast %cst_148 : f32 to vector<8x128xf32>
    %424 = arith.mulf %423, %422 : vector<8x128xf32>
    %425 = math.tanh %424 : vector<8x128xf32>
    %cst_149 = arith.constant 5.000000e-01 : f32
    %426 = vector.broadcast %cst_149 : f32 to vector<8x128xf32>
    %427 = arith.mulf %426, %425 : vector<8x128xf32>
    %cst_150 = arith.constant 5.000000e-01 : f32
    %428 = vector.broadcast %cst_150 : f32 to vector<8x128xf32>
    %429 = arith.addf %427, %428 : vector<8x128xf32>
    %430 = vector.extract_strided_slice %421 {offsets = [0, 128], sizes = [8, 128], strides = [1, 1]} : vector<8x512xf32> to vector<8x128xf32>
    %cst_151 = arith.constant 5.000000e-01 : f32
    %431 = vector.broadcast %cst_151 : f32 to vector<8x128xf32>
    %432 = arith.mulf %431, %430 : vector<8x128xf32>
    %433 = math.tanh %432 : vector<8x128xf32>
    %cst_152 = arith.constant 5.000000e-01 : f32
    %434 = vector.broadcast %cst_152 : f32 to vector<8x128xf32>
    %435 = arith.mulf %434, %433 : vector<8x128xf32>
    %cst_153 = arith.constant 5.000000e-01 : f32
    %436 = vector.broadcast %cst_153 : f32 to vector<8x128xf32>
    %437 = arith.addf %435, %436 : vector<8x128xf32>
    %438 = vector.extract_strided_slice %421 {offsets = [0, 256], sizes = [8, 128], strides = [1, 1]} : vector<8x512xf32> to vector<8x128xf32>
    %439 = math.tanh %438 : vector<8x128xf32>
    %440 = vector.extract_strided_slice %421 {offsets = [0, 384], sizes = [8, 128], strides = [1, 1]} : vector<8x512xf32> to vector<8x128xf32>
    %cst_154 = arith.constant 5.000000e-01 : f32
    %441 = vector.broadcast %cst_154 : f32 to vector<8x128xf32>
    %442 = arith.mulf %441, %440 : vector<8x128xf32>
    %443 = math.tanh %442 : vector<8x128xf32>
    %cst_155 = arith.constant 5.000000e-01 : f32
    %444 = vector.broadcast %cst_155 : f32 to vector<8x128xf32>
    %445 = arith.mulf %444, %443 : vector<8x128xf32>
    %cst_156 = arith.constant 5.000000e-01 : f32
    %446 = vector.broadcast %cst_156 : f32 to vector<8x128xf32>
    %447 = arith.addf %445, %446 : vector<8x128xf32>
    %448 = arith.mulf %437, %410 : vector<8x128xf32>
    %449 = arith.mulf %429, %439 : vector<8x128xf32>
    %450 = arith.addf %448, %449 : vector<8x128xf32>
    %451 = math.tanh %450 : vector<8x128xf32>
    %452 = arith.mulf %447, %451 : vector<8x128xf32>
    %c3_i32_157 = arith.constant 3 : i32
    %c8_i32_158 = arith.constant 8 : i32
    %453 = arith.muli %c3_i32_157, %c8_i32_158 : i32
    %454 = tpu.assume_multiple %453, 8 : i32
    %455 = arith.index_cast %454 : i32 to index
    %c0_159 = arith.constant 0 : index
    %456 = vector.load %arg10[%455, %c0_159] : memref<64x128xf32, #tpu.memory_space<vmem>>, vector<8x128xf32>
    %457 = arith.truncf %456 : vector<8x128xf32> to vector<8x128xbf16>
    %458 = arith.truncf %452 : vector<8x128xf32> to vector<8x128xbf16>
    %459 = tpu.concatenate %457, %458 in 1 : vector<8x128xbf16>, vector<8x128xbf16> -> vector<8x256xbf16>
    %cst_160 = arith.constant dense<0.000000e+00> : vector<8x512xf32>
    %460 = tpu.matmul %459, %329, %cst_160 {dimension_numbers = #tpu.dot_dimension_numbers<[1], [0], [0], [1], [0, 0, 1, 1], [], []>} : vector<8x256xbf16>, vector<256x512xbf16>, vector<8x512xf32> -> vector<8x512xf32>
    %461 = arith.addf %460, %332 : vector<8x512xf32>
    %462 = vector.extract_strided_slice %461 {offsets = [0, 0], sizes = [8, 128], strides = [1, 1]} : vector<8x512xf32> to vector<8x128xf32>
    %cst_161 = arith.constant 5.000000e-01 : f32
    %463 = vector.broadcast %cst_161 : f32 to vector<8x128xf32>
    %464 = arith.mulf %463, %462 : vector<8x128xf32>
    %465 = math.tanh %464 : vector<8x128xf32>
    %cst_162 = arith.constant 5.000000e-01 : f32
    %466 = vector.broadcast %cst_162 : f32 to vector<8x128xf32>
    %467 = arith.mulf %466, %465 : vector<8x128xf32>
    %cst_163 = arith.constant 5.000000e-01 : f32
    %468 = vector.broadcast %cst_163 : f32 to vector<8x128xf32>
    %469 = arith.addf %467, %468 : vector<8x128xf32>
    %470 = vector.extract_strided_slice %461 {offsets = [0, 128], sizes = [8, 128], strides = [1, 1]} : vector<8x512xf32> to vector<8x128xf32>
    %cst_164 = arith.constant 5.000000e-01 : f32
    %471 = vector.broadcast %cst_164 : f32 to vector<8x128xf32>
    %472 = arith.mulf %471, %470 : vector<8x128xf32>
    %473 = math.tanh %472 : vector<8x128xf32>
    %cst_165 = arith.constant 5.000000e-01 : f32
    %474 = vector.broadcast %cst_165 : f32 to vector<8x128xf32>
    %475 = arith.mulf %474, %473 : vector<8x128xf32>
    %cst_166 = arith.constant 5.000000e-01 : f32
    %476 = vector.broadcast %cst_166 : f32 to vector<8x128xf32>
    %477 = arith.addf %475, %476 : vector<8x128xf32>
    %478 = vector.extract_strided_slice %461 {offsets = [0, 256], sizes = [8, 128], strides = [1, 1]} : vector<8x512xf32> to vector<8x128xf32>
    %479 = math.tanh %478 : vector<8x128xf32>
    %480 = vector.extract_strided_slice %461 {offsets = [0, 384], sizes = [8, 128], strides = [1, 1]} : vector<8x512xf32> to vector<8x128xf32>
    %cst_167 = arith.constant 5.000000e-01 : f32
    %481 = vector.broadcast %cst_167 : f32 to vector<8x128xf32>
    %482 = arith.mulf %481, %480 : vector<8x128xf32>
    %483 = math.tanh %482 : vector<8x128xf32>
    %cst_168 = arith.constant 5.000000e-01 : f32
    %484 = vector.broadcast %cst_168 : f32 to vector<8x128xf32>
    %485 = arith.mulf %484, %483 : vector<8x128xf32>
    %cst_169 = arith.constant 5.000000e-01 : f32
    %486 = vector.broadcast %cst_169 : f32 to vector<8x128xf32>
    %487 = arith.addf %485, %486 : vector<8x128xf32>
    %488 = arith.mulf %477, %450 : vector<8x128xf32>
    %489 = arith.mulf %469, %479 : vector<8x128xf32>
    %490 = arith.addf %488, %489 : vector<8x128xf32>
    %491 = math.tanh %490 : vector<8x128xf32>
    %492 = arith.mulf %487, %491 : vector<8x128xf32>
    %c4_i32_170 = arith.constant 4 : i32
    %c8_i32_171 = arith.constant 8 : i32
    %493 = arith.muli %c4_i32_170, %c8_i32_171 : i32
    %494 = tpu.assume_multiple %493, 8 : i32
    %495 = arith.index_cast %494 : i32 to index
    %c0_172 = arith.constant 0 : index
    %496 = vector.load %arg10[%495, %c0_172] : memref<64x128xf32, #tpu.memory_space<vmem>>, vector<8x128xf32>
    %497 = arith.truncf %496 : vector<8x128xf32> to vector<8x128xbf16>
    %498 = arith.truncf %492 : vector<8x128xf32> to vector<8x128xbf16>
    %499 = tpu.concatenate %497, %498 in 1 : vector<8x128xbf16>, vector<8x128xbf16> -> vector<8x256xbf16>
    %cst_173 = arith.constant dense<0.000000e+00> : vector<8x512xf32>
    %500 = tpu.matmul %499, %329, %cst_173 {dimension_numbers = #tpu.dot_dimension_numbers<[1], [0], [0], [1], [0, 0, 1, 1], [], []>} : vector<8x256xbf16>, vector<256x512xbf16>, vector<8x512xf32> -> vector<8x512xf32>
    %501 = arith.addf %500, %332 : vector<8x512xf32>
    %502 = vector.extract_strided_slice %501 {offsets = [0, 0], sizes = [8, 128], strides = [1, 1]} : vector<8x512xf32> to vector<8x128xf32>
    %cst_174 = arith.constant 5.000000e-01 : f32
    %503 = vector.broadcast %cst_174 : f32 to vector<8x128xf32>
    %504 = arith.mulf %503, %502 : vector<8x128xf32>
    %505 = math.tanh %504 : vector<8x128xf32>
    %cst_175 = arith.constant 5.000000e-01 : f32
    %506 = vector.broadcast %cst_175 : f32 to vector<8x128xf32>
    %507 = arith.mulf %506, %505 : vector<8x128xf32>
    %cst_176 = arith.constant 5.000000e-01 : f32
    %508 = vector.broadcast %cst_176 : f32 to vector<8x128xf32>
    %509 = arith.addf %507, %508 : vector<8x128xf32>
    %510 = vector.extract_strided_slice %501 {offsets = [0, 128], sizes = [8, 128], strides = [1, 1]} : vector<8x512xf32> to vector<8x128xf32>
    %cst_177 = arith.constant 5.000000e-01 : f32
    %511 = vector.broadcast %cst_177 : f32 to vector<8x128xf32>
    %512 = arith.mulf %511, %510 : vector<8x128xf32>
    %513 = math.tanh %512 : vector<8x128xf32>
    %cst_178 = arith.constant 5.000000e-01 : f32
    %514 = vector.broadcast %cst_178 : f32 to vector<8x128xf32>
    %515 = arith.mulf %514, %513 : vector<8x128xf32>
    %cst_179 = arith.constant 5.000000e-01 : f32
    %516 = vector.broadcast %cst_179 : f32 to vector<8x128xf32>
    %517 = arith.addf %515, %516 : vector<8x128xf32>
    %518 = vector.extract_strided_slice %501 {offsets = [0, 256], sizes = [8, 128], strides = [1, 1]} : vector<8x512xf32> to vector<8x128xf32>
    %519 = math.tanh %518 : vector<8x128xf32>
    %520 = vector.extract_strided_slice %501 {offsets = [0, 384], sizes = [8, 128], strides = [1, 1]} : vector<8x512xf32> to vector<8x128xf32>
    %cst_180 = arith.constant 5.000000e-01 : f32
    %521 = vector.broadcast %cst_180 : f32 to vector<8x128xf32>
    %522 = arith.mulf %521, %520 : vector<8x128xf32>
    %523 = math.tanh %522 : vector<8x128xf32>
    %cst_181 = arith.constant 5.000000e-01 : f32
    %524 = vector.broadcast %cst_181 : f32 to vector<8x128xf32>
    %525 = arith.mulf %524, %523 : vector<8x128xf32>
    %cst_182 = arith.constant 5.000000e-01 : f32
    %526 = vector.broadcast %cst_182 : f32 to vector<8x128xf32>
    %527 = arith.addf %525, %526 : vector<8x128xf32>
    %528 = arith.mulf %517, %490 : vector<8x128xf32>
    %529 = arith.mulf %509, %519 : vector<8x128xf32>
    %530 = arith.addf %528, %529 : vector<8x128xf32>
    %531 = math.tanh %530 : vector<8x128xf32>
    %532 = arith.mulf %527, %531 : vector<8x128xf32>
    %c5_i32_183 = arith.constant 5 : i32
    %c8_i32_184 = arith.constant 8 : i32
    %533 = arith.muli %c5_i32_183, %c8_i32_184 : i32
    %534 = tpu.assume_multiple %533, 8 : i32
    %535 = arith.index_cast %534 : i32 to index
    %c0_185 = arith.constant 0 : index
    %536 = vector.load %arg10[%535, %c0_185] : memref<64x128xf32, #tpu.memory_space<vmem>>, vector<8x128xf32>
    %537 = arith.truncf %536 : vector<8x128xf32> to vector<8x128xbf16>
    %538 = arith.truncf %532 : vector<8x128xf32> to vector<8x128xbf16>
    %539 = tpu.concatenate %537, %538 in 1 : vector<8x128xbf16>, vector<8x128xbf16> -> vector<8x256xbf16>
    %cst_186 = arith.constant dense<0.000000e+00> : vector<8x512xf32>
    %540 = tpu.matmul %539, %329, %cst_186 {dimension_numbers = #tpu.dot_dimension_numbers<[1], [0], [0], [1], [0, 0, 1, 1], [], []>} : vector<8x256xbf16>, vector<256x512xbf16>, vector<8x512xf32> -> vector<8x512xf32>
    %541 = arith.addf %540, %332 : vector<8x512xf32>
    %542 = vector.extract_strided_slice %541 {offsets = [0, 0], sizes = [8, 128], strides = [1, 1]} : vector<8x512xf32> to vector<8x128xf32>
    %cst_187 = arith.constant 5.000000e-01 : f32
    %543 = vector.broadcast %cst_187 : f32 to vector<8x128xf32>
    %544 = arith.mulf %543, %542 : vector<8x128xf32>
    %545 = math.tanh %544 : vector<8x128xf32>
    %cst_188 = arith.constant 5.000000e-01 : f32
    %546 = vector.broadcast %cst_188 : f32 to vector<8x128xf32>
    %547 = arith.mulf %546, %545 : vector<8x128xf32>
    %cst_189 = arith.constant 5.000000e-01 : f32
    %548 = vector.broadcast %cst_189 : f32 to vector<8x128xf32>
    %549 = arith.addf %547, %548 : vector<8x128xf32>
    %550 = vector.extract_strided_slice %541 {offsets = [0, 128], sizes = [8, 128], strides = [1, 1]} : vector<8x512xf32> to vector<8x128xf32>
    %cst_190 = arith.constant 5.000000e-01 : f32
    %551 = vector.broadcast %cst_190 : f32 to vector<8x128xf32>
    %552 = arith.mulf %551, %550 : vector<8x128xf32>
    %553 = math.tanh %552 : vector<8x128xf32>
    %cst_191 = arith.constant 5.000000e-01 : f32
    %554 = vector.broadcast %cst_191 : f32 to vector<8x128xf32>
    %555 = arith.mulf %554, %553 : vector<8x128xf32>
    %cst_192 = arith.constant 5.000000e-01 : f32
    %556 = vector.broadcast %cst_192 : f32 to vector<8x128xf32>
    %557 = arith.addf %555, %556 : vector<8x128xf32>
    %558 = vector.extract_strided_slice %541 {offsets = [0, 256], sizes = [8, 128], strides = [1, 1]} : vector<8x512xf32> to vector<8x128xf32>
    %559 = math.tanh %558 : vector<8x128xf32>
    %560 = vector.extract_strided_slice %541 {offsets = [0, 384], sizes = [8, 128], strides = [1, 1]} : vector<8x512xf32> to vector<8x128xf32>
    %cst_193 = arith.constant 5.000000e-01 : f32
    %561 = vector.broadcast %cst_193 : f32 to vector<8x128xf32>
    %562 = arith.mulf %561, %560 : vector<8x128xf32>
    %563 = math.tanh %562 : vector<8x128xf32>
    %cst_194 = arith.constant 5.000000e-01 : f32
    %564 = vector.broadcast %cst_194 : f32 to vector<8x128xf32>
    %565 = arith.mulf %564, %563 : vector<8x128xf32>
    %cst_195 = arith.constant 5.000000e-01 : f32
    %566 = vector.broadcast %cst_195 : f32 to vector<8x128xf32>
    %567 = arith.addf %565, %566 : vector<8x128xf32>
    %568 = arith.mulf %557, %530 : vector<8x128xf32>
    %569 = arith.mulf %549, %559 : vector<8x128xf32>
    %570 = arith.addf %568, %569 : vector<8x128xf32>
    %571 = math.tanh %570 : vector<8x128xf32>
    %572 = arith.mulf %567, %571 : vector<8x128xf32>
    %c6_i32_196 = arith.constant 6 : i32
    %c8_i32_197 = arith.constant 8 : i32
    %573 = arith.muli %c6_i32_196, %c8_i32_197 : i32
    %574 = tpu.assume_multiple %573, 8 : i32
    %575 = arith.index_cast %574 : i32 to index
    %c0_198 = arith.constant 0 : index
    %576 = vector.load %arg10[%575, %c0_198] : memref<64x128xf32, #tpu.memory_space<vmem>>, vector<8x128xf32>
    %577 = arith.truncf %576 : vector<8x128xf32> to vector<8x128xbf16>
    %578 = arith.truncf %572 : vector<8x128xf32> to vector<8x128xbf16>
    %579 = tpu.concatenate %577, %578 in 1 : vector<8x128xbf16>, vector<8x128xbf16> -> vector<8x256xbf16>
    %cst_199 = arith.constant dense<0.000000e+00> : vector<8x512xf32>
    %580 = tpu.matmul %579, %329, %cst_199 {dimension_numbers = #tpu.dot_dimension_numbers<[1], [0], [0], [1], [0, 0, 1, 1], [], []>} : vector<8x256xbf16>, vector<256x512xbf16>, vector<8x512xf32> -> vector<8x512xf32>
    %581 = arith.addf %580, %332 : vector<8x512xf32>
    %582 = vector.extract_strided_slice %581 {offsets = [0, 0], sizes = [8, 128], strides = [1, 1]} : vector<8x512xf32> to vector<8x128xf32>
    %cst_200 = arith.constant 5.000000e-01 : f32
    %583 = vector.broadcast %cst_200 : f32 to vector<8x128xf32>
    %584 = arith.mulf %583, %582 : vector<8x128xf32>
    %585 = math.tanh %584 : vector<8x128xf32>
    %cst_201 = arith.constant 5.000000e-01 : f32
    %586 = vector.broadcast %cst_201 : f32 to vector<8x128xf32>
    %587 = arith.mulf %586, %585 : vector<8x128xf32>
    %cst_202 = arith.constant 5.000000e-01 : f32
    %588 = vector.broadcast %cst_202 : f32 to vector<8x128xf32>
    %589 = arith.addf %587, %588 : vector<8x128xf32>
    %590 = vector.extract_strided_slice %581 {offsets = [0, 128], sizes = [8, 128], strides = [1, 1]} : vector<8x512xf32> to vector<8x128xf32>
    %cst_203 = arith.constant 5.000000e-01 : f32
    %591 = vector.broadcast %cst_203 : f32 to vector<8x128xf32>
    %592 = arith.mulf %591, %590 : vector<8x128xf32>
    %593 = math.tanh %592 : vector<8x128xf32>
    %cst_204 = arith.constant 5.000000e-01 : f32
    %594 = vector.broadcast %cst_204 : f32 to vector<8x128xf32>
    %595 = arith.mulf %594, %593 : vector<8x128xf32>
    %cst_205 = arith.constant 5.000000e-01 : f32
    %596 = vector.broadcast %cst_205 : f32 to vector<8x128xf32>
    %597 = arith.addf %595, %596 : vector<8x128xf32>
    %598 = vector.extract_strided_slice %581 {offsets = [0, 256], sizes = [8, 128], strides = [1, 1]} : vector<8x512xf32> to vector<8x128xf32>
    %599 = math.tanh %598 : vector<8x128xf32>
    %600 = vector.extract_strided_slice %581 {offsets = [0, 384], sizes = [8, 128], strides = [1, 1]} : vector<8x512xf32> to vector<8x128xf32>
    %cst_206 = arith.constant 5.000000e-01 : f32
    %601 = vector.broadcast %cst_206 : f32 to vector<8x128xf32>
    %602 = arith.mulf %601, %600 : vector<8x128xf32>
    %603 = math.tanh %602 : vector<8x128xf32>
    %cst_207 = arith.constant 5.000000e-01 : f32
    %604 = vector.broadcast %cst_207 : f32 to vector<8x128xf32>
    %605 = arith.mulf %604, %603 : vector<8x128xf32>
    %cst_208 = arith.constant 5.000000e-01 : f32
    %606 = vector.broadcast %cst_208 : f32 to vector<8x128xf32>
    %607 = arith.addf %605, %606 : vector<8x128xf32>
    %608 = arith.mulf %597, %570 : vector<8x128xf32>
    %609 = arith.mulf %589, %599 : vector<8x128xf32>
    %610 = arith.addf %608, %609 : vector<8x128xf32>
    %611 = math.tanh %610 : vector<8x128xf32>
    %612 = arith.mulf %607, %611 : vector<8x128xf32>
    %c7_i32_209 = arith.constant 7 : i32
    %c8_i32_210 = arith.constant 8 : i32
    %613 = arith.muli %c7_i32_209, %c8_i32_210 : i32
    %614 = tpu.assume_multiple %613, 8 : i32
    %615 = arith.index_cast %614 : i32 to index
    %c0_211 = arith.constant 0 : index
    %616 = vector.load %arg10[%615, %c0_211] : memref<64x128xf32, #tpu.memory_space<vmem>>, vector<8x128xf32>
    %617 = arith.truncf %616 : vector<8x128xf32> to vector<8x128xbf16>
    %618 = arith.truncf %612 : vector<8x128xf32> to vector<8x128xbf16>
    %619 = tpu.concatenate %617, %618 in 1 : vector<8x128xbf16>, vector<8x128xbf16> -> vector<8x256xbf16>
    %cst_212 = arith.constant dense<0.000000e+00> : vector<8x512xf32>
    %620 = tpu.matmul %619, %329, %cst_212 {dimension_numbers = #tpu.dot_dimension_numbers<[1], [0], [0], [1], [0, 0, 1, 1], [], []>} : vector<8x256xbf16>, vector<256x512xbf16>, vector<8x512xf32> -> vector<8x512xf32>
    %621 = arith.addf %620, %332 : vector<8x512xf32>
    %622 = vector.extract_strided_slice %621 {offsets = [0, 0], sizes = [8, 128], strides = [1, 1]} : vector<8x512xf32> to vector<8x128xf32>
    %cst_213 = arith.constant 5.000000e-01 : f32
    %623 = vector.broadcast %cst_213 : f32 to vector<8x128xf32>
    %624 = arith.mulf %623, %622 : vector<8x128xf32>
    %625 = math.tanh %624 : vector<8x128xf32>
    %cst_214 = arith.constant 5.000000e-01 : f32
    %626 = vector.broadcast %cst_214 : f32 to vector<8x128xf32>
    %627 = arith.mulf %626, %625 : vector<8x128xf32>
    %cst_215 = arith.constant 5.000000e-01 : f32
    %628 = vector.broadcast %cst_215 : f32 to vector<8x128xf32>
    %629 = arith.addf %627, %628 : vector<8x128xf32>
    %630 = vector.extract_strided_slice %621 {offsets = [0, 128], sizes = [8, 128], strides = [1, 1]} : vector<8x512xf32> to vector<8x128xf32>
    %cst_216 = arith.constant 5.000000e-01 : f32
    %631 = vector.broadcast %cst_216 : f32 to vector<8x128xf32>
    %632 = arith.mulf %631, %630 : vector<8x128xf32>
    %633 = math.tanh %632 : vector<8x128xf32>
    %cst_217 = arith.constant 5.000000e-01 : f32
    %634 = vector.broadcast %cst_217 : f32 to vector<8x128xf32>
    %635 = arith.mulf %634, %633 : vector<8x128xf32>
    %cst_218 = arith.constant 5.000000e-01 : f32
    %636 = vector.broadcast %cst_218 : f32 to vector<8x128xf32>
    %637 = arith.addf %635, %636 : vector<8x128xf32>
    %638 = vector.extract_strided_slice %621 {offsets = [0, 256], sizes = [8, 128], strides = [1, 1]} : vector<8x512xf32> to vector<8x128xf32>
    %639 = math.tanh %638 : vector<8x128xf32>
    %640 = vector.extract_strided_slice %621 {offsets = [0, 384], sizes = [8, 128], strides = [1, 1]} : vector<8x512xf32> to vector<8x128xf32>
    %cst_219 = arith.constant 5.000000e-01 : f32
    %641 = vector.broadcast %cst_219 : f32 to vector<8x128xf32>
    %642 = arith.mulf %641, %640 : vector<8x128xf32>
    %643 = math.tanh %642 : vector<8x128xf32>
    %cst_220 = arith.constant 5.000000e-01 : f32
    %644 = vector.broadcast %cst_220 : f32 to vector<8x128xf32>
    %645 = arith.mulf %644, %643 : vector<8x128xf32>
    %cst_221 = arith.constant 5.000000e-01 : f32
    %646 = vector.broadcast %cst_221 : f32 to vector<8x128xf32>
    %647 = arith.addf %645, %646 : vector<8x128xf32>
    %648 = arith.mulf %637, %610 : vector<8x128xf32>
    %649 = arith.mulf %629, %639 : vector<8x128xf32>
    %650 = arith.addf %648, %649 : vector<8x128xf32>
    %651 = math.tanh %650 : vector<8x128xf32>
    %652 = arith.mulf %647, %651 : vector<8x128xf32>
    %c8_i32_222 = arith.constant 8 : i32
    %653 = arith.truncf %652 : vector<8x128xf32> to vector<8x128xbf16>
    %c0_223 = arith.constant 0 : index
    %c0_224 = arith.constant 0 : index
    %654 = vector.load %arg6[%c0_223, %c0_224] : memref<128x128xbf16, #tpu.memory_space<vmem>>, vector<128x128xbf16>
    %cst_225 = arith.constant dense<0.000000e+00> : vector<8x128xf32>
    %655 = tpu.matmul %653, %654, %cst_225 {dimension_numbers = #tpu.dot_dimension_numbers<[1], [0], [0], [1], [0, 0, 1, 1], [], []>} : vector<8x128xbf16>, vector<128x128xbf16>, vector<8x128xf32> -> vector<8x128xf32>
    %c0_226 = arith.constant 0 : index
    %c0_227 = arith.constant 0 : index
    %656 = vector.load %arg7[%c0_226, %c0_227] : memref<1x128xf32, #tpu.memory_space<vmem>>, vector<1x128xf32>
    %657 = vector.broadcast %656 : vector<1x128xf32> to vector<8x128xf32>
    %658 = arith.addf %655, %657 : vector<8x128xf32>
    %c0_228 = arith.constant 0 : index
    %c0_229 = arith.constant 0 : index
    %659 = vector.load %arg8[%c0_228, %c0_229] : memref<8x128xf32, #tpu.memory_space<vmem>>, vector<8x128xf32>
    tpu.vector_store %arg8[%c0_228, %c0_229], %658 {strides = array<i32>} : memref<8x128xf32, #tpu.memory_space<vmem>>, vector<8x128xf32>,
    return
  }
}

</mosaic_0001>

<bundles_post_ra>
// kernel: lstm_forward.1
= control target key start
LH: loop header
LB: loop body
LE: loop exit
PB: predicated region body
PF: predicated region fallthrough
CT: control target
= control target key end

     0   :  { %s5357_s0 = inlined_call_operand.vmem [shape: bf16[64,32], index: 0, kind: input, shape index: {}]   ;;  %s5358_s1 = inlined_call_operand.vmem [shape: bf16[32,512], index: 1, kind: input, shape index: {}]   ;;  %s5359_s2 = inlined_call_operand.vmem [shape: bf16[128,512], index: 2, kind: input, shape index: {}]   ;;  %s5360_s3 = inlined_call_operand.vmem [shape: f32[1,512], index: 3, kind: input, shape index: {}]   ;;  %s5361_s4 = inlined_call_operand.vmem [shape: bf16[256,512], index: 4, kind: input, shape index: {}]   ;;  %s5362_s5 = inlined_call_operand.vmem [shape: f32[1,512], index: 5, kind: input, shape index: {}]   ;;  %s5363_s6 = inlined_call_operand.vmem [shape: bf16[128,128], index: 6, kind: input, shape index: {}]   ;;  %s5364_s7 = inlined_call_operand.vmem [shape: f32[1,128], index: 7, kind: input, shape index: {}]   ;;  %s5365_s8 = inlined_call_operand.vmem [shape: f32[8,128], index: 8, kind: output, shape index: {}]  }
   0x1   :  { %v38_v0 = vld [vmem:[%s5361_s4] sm:$0xff]  ;;  %v40_v1 = vld [vmem:[%s5361_s4 + $0x8] sm:$0xff]  ;;  %v42_v2 = vld [vmem:[%s5361_s4 + $0x10] sm:$0xff] }
   0x2   :  { %39 = vst [vmem:[#allocation4] sm:$0xff] %v38_v0  ;;  %v44_v3 = vld [vmem:[%s5361_s4 + $0x18] sm:$0xff]  ;;  %v46_v4 = vld [vmem:[%s5361_s4 + $0x20] sm:$0xff]  ;;  %v48_v5 = vld [vmem:[%s5361_s4 + $0x28] sm:$0xff] }
   0x3   :  { %41 = vst [vmem:[#allocation4 + $0x8] sm:$0xff] %v40_v1  ;;  %v50_v6 = vld [vmem:[%s5361_s4 + $0x30] sm:$0xff]  ;;  %v52_v7 = vld [vmem:[%s5361_s4 + $0x38] sm:$0xff]  ;;  %v54_v8 = vld [vmem:[%s5361_s4 + $0x40] sm:$0xff] }
   0x4   :  { %43 = vst [vmem:[#allocation4 + $0x10] sm:$0xff] %v42_v2  ;;  %v56_v9 = vld [vmem:[%s5361_s4 + $0x48] sm:$0xff]  ;;  %v58_v10 = vld [vmem:[%s5361_s4 + $0x50] sm:$0xff]  ;;  %v60_v11 = vld [vmem:[%s5361_s4 + $0x58] sm:$0xff] }
   0x5   :  { %45 = vst [vmem:[#allocation4 + $0x18] sm:$0xff] %v44_v3  ;;  %v62_v12 = vld [vmem:[%s5361_s4 + $0x60] sm:$0xff]  ;;  %v64_v13 = vld [vmem:[%s5361_s4 + $0x68] sm:$0xff]  ;;  %v66_v14 = vld [vmem:[%s5361_s4 + $0x70] sm:$0xff] }
   0x6   :  { %47 = vst [vmem:[#allocation4 + $0x20] sm:$0xff] %v46_v4  ;;  %v68_v15 = vld [vmem:[%s5361_s4 + $0x78] sm:$0xff]  ;;  %v70_v16 = vld [vmem:[%s5361_s4 + $0x80] sm:$0xff]  ;;  %v72_v17 = vld [vmem:[%s5361_s4 + $0x88] sm:$0xff] }
   0x7   :  { %49 = vst [vmem:[#allocation4 + $0x28] sm:$0xff] %v48_v5  ;;  %v74_v18 = vld [vmem:[%s5361_s4 + $0x90] sm:$0xff]  ;;  %v76_v19 = vld [vmem:[%s5361_s4 + $0x98] sm:$0xff]  ;;  %v78_v20 = vld [vmem:[%s5361_s4 + $0xa0] sm:$0xff] }
   0x8   :  { %51 = vst [vmem:[#allocation4 + $0x30] sm:$0xff] %v50_v6  ;;  %v80_v21 = vld [vmem:[%s5361_s4 + $0xa8] sm:$0xff]  ;;  %v82_v22 = vld [vmem:[%s5361_s4 + $0xb0] sm:$0xff]  ;;  %v84_v23 = vld [vmem:[%s5361_s4 + $0xb8] sm:$0xff] }
   0x9   :  { %53 = vst [vmem:[#allocation4 + $0x38] sm:$0xff] %v52_v7  ;;  %v86_v24 = vld [vmem:[%s5361_s4 + $0xc0] sm:$0xff]  ;;  %v88_v25 = vld [vmem:[%s5361_s4 + $0xc8] sm:$0xff]  ;;  %v90_v26 = vld [vmem:[%s5361_s4 + $0xd0] sm:$0xff] }
   0xa   :  { %55 = vst [vmem:[#allocation4 + $0x40] sm:$0xff] %v54_v8  ;;  %v92_v27 = vld [vmem:[%s5361_s4 + $0xd8] sm:$0xff]  ;;  %v94_v28 = vld [vmem:[%s5361_s4 + $0xe0] sm:$0xff]  ;;  %v96_v29 = vld [vmem:[%s5361_s4 + $0xe8] sm:$0xff] }
   0xb   :  { %57 = vst [vmem:[#allocation4 + $0x48] sm:$0xff] %v56_v9  ;;  %v98_v30 = vld [vmem:[%s5361_s4 + $0xf0] sm:$0xff]  ;;  %v100_v31 = vld [vmem:[%s5361_s4 + $0xf8] sm:$0xff]  ;;  %v102_v32 = vld [vmem:[%s5361_s4 + $0x100] sm:$0xff] }
   0xc   :  { %59 = vst [vmem:[#allocation4 + $0x50] sm:$0xff] %v58_v10  ;;  %v104_v33 = vld [vmem:[%s5361_s4 + $0x108] sm:$0xff]  ;;  %v106_v34 = vld [vmem:[%s5361_s4 + $0x110] sm:$0xff]  ;;  %v108_v35 = vld [vmem:[%s5361_s4 + $0x118] sm:$0xff] }
   0xd   :  { %61 = vst [vmem:[#allocation4 + $0x58] sm:$0xff] %v60_v11  ;;  %v110_v36 = vld [vmem:[%s5361_s4 + $0x120] sm:$0xff]  ;;  %v112_v37 = vld [vmem:[%s5361_s4 + $0x128] sm:$0xff]  ;;  %v114_v38 = vld [vmem:[%s5361_s4 + $0x130] sm:$0xff] }
   0xe   :  { %63 = vst [vmem:[#allocation4 + $0x60] sm:$0xff] %v62_v12  ;;  %v116_v39 = vld [vmem:[%s5361_s4 + $0x138] sm:$0xff]  ;;  %v118_v40 = vld [vmem:[%s5361_s4 + $0x140] sm:$0xff]  ;;  %v120_v41 = vld [vmem:[%s5361_s4 + $0x148] sm:$0xff] }
   0xf   :  { %65 = vst [vmem:[#allocation4 + $0x68] sm:$0xff] %v64_v13  ;;  %v122_v42 = vld [vmem:[%s5361_s4 + $0x150] sm:$0xff]  ;;  %v124_v43 = vld [vmem:[%s5361_s4 + $0x158] sm:$0xff]  ;;  %v126_v44 = vld [vmem:[%s5361_s4 + $0x160] sm:$0xff] }
  0x10   :  { %67 = vst [vmem:[#allocation4 + $0x70] sm:$0xff] %v66_v14  ;;  %v128_v45 = vld [vmem:[%s5361_s4 + $0x168] sm:$0xff]  ;;  %v130_v46 = vld [vmem:[%s5361_s4 + $0x170] sm:$0xff]  ;;  %v132_v47 = vld [vmem:[%s5361_s4 + $0x178] sm:$0xff] }
  0x11   :  { %69 = vst [vmem:[#allocation4 + $0x78] sm:$0xff] %v68_v15  ;;  %v134_v48 = vld [vmem:[%s5361_s4 + $0x180] sm:$0xff]  ;;  %v136_v49 = vld [vmem:[%s5361_s4 + $0x188] sm:$0xff]  ;;  %v138_v50 = vld [vmem:[%s5361_s4 + $0x190] sm:$0xff] }
  0x12   :  { %71 = vst [vmem:[#allocation4 + $0x80] sm:$0xff] %v70_v16  ;;  %v140_v51 = vld [vmem:[%s5361_s4 + $0x198] sm:$0xff]  ;;  %v142_v52 = vld [vmem:[%s5361_s4 + $0x1a0] sm:$0xff]  ;;  %v144_v53 = vld [vmem:[%s5361_s4 + $0x1a8] sm:$0xff] }
  0x13   :  { %73 = vst [vmem:[#allocation4 + $0x88] sm:$0xff] %v72_v17  ;;  %v146_v54 = vld [vmem:[%s5361_s4 + $0x1b0] sm:$0xff]  ;;  %v148_v55 = vld [vmem:[%s5361_s4 + $0x1b8] sm:$0xff]  ;;  %v150_v56 = vld [vmem:[%s5361_s4 + $0x1c0] sm:$0xff] }
  0x14   :  { %75 = vst [vmem:[#allocation4 + $0x90] sm:$0xff] %v74_v18  ;;  %v152_v57 = vld [vmem:[%s5361_s4 + $0x1c8] sm:$0xff]  ;;  %v154_v58 = vld [vmem:[%s5361_s4 + $0x1d0] sm:$0xff]  ;;  %v156_v59 = vld [vmem:[%s5361_s4 + $0x1d8] sm:$0xff] }
  0x15   :  { %77 = vst [vmem:[#allocation4 + $0x98] sm:$0xff] %v76_v19  ;;  %v158_v60 = vld [vmem:[%s5361_s4 + $0x1e0] sm:$0xff]  ;;  %v160_v61 = vld [vmem:[%s5361_s4 + $0x1e8] sm:$0xff]  ;;  %v162_v62 = vld [vmem:[%s5361_s4 + $0x1f0] sm:$0xff] }
  0x16   :  { %79 = vst [vmem:[#allocation4 + $0xa0] sm:$0xff] %v78_v20  ;;  %v164_v63 = vld [vmem:[%s5361_s4 + $0x1f8] sm:$0xff] }
  0x17   :  { %81 = vst [vmem:[#allocation4 + $0xa8] sm:$0xff] %v80_v21 }
  0x18   :  { %83 = vst [vmem:[#allocation4 + $0xb0] sm:$0xff] %v82_v22 }
  0x19   :  { %85 = vst [vmem:[#allocation4 + $0xb8] sm:$0xff] %v84_v23 }
  0x1a   :  { %87 = vst [vmem:[#allocation4 + $0xc0] sm:$0xff] %v86_v24 }
  0x1b   :  { %89 = vst [vmem:[#allocation4 + $0xc8] sm:$0xff] %v88_v25 }
  0x1c   :  { %91 = vst [vmem:[#allocation4 + $0xd0] sm:$0xff] %v90_v26 }
  0x1d   :  { %93 = vst [vmem:[#allocation4 + $0xd8] sm:$0xff] %v92_v27 }
  0x1e   :  { %95 = vst [vmem:[#allocation4 + $0xe0] sm:$0xff] %v94_v28 }
  0x1f   :  { %97 = vst [vmem:[#allocation4 + $0xe8] sm:$0xff] %v96_v29 }
  0x20   :  { %99 = vst [vmem:[#allocation4 + $0xf0] sm:$0xff] %v98_v30 }
  0x21   :  { %101 = vst [vmem:[#allocation4 + $0xf8] sm:$0xff] %v100_v31 }
  0x22   :  { %103 = vst [vmem:[#allocation4 + $0x100] sm:$0xff] %v102_v32 }
  0x23   :  { %105 = vst [vmem:[#allocation4 + $0x108] sm:$0xff] %v104_v33 }
  0x24   :  { %107 = vst [vmem:[#allocation4 + $0x110] sm:$0xff] %v106_v34 }
  0x25   :  { %109 = vst [vmem:[#allocation4 + $0x118] sm:$0xff] %v108_v35 }
  0x26   :  { %111 = vst [vmem:[#allocation4 + $0x120] sm:$0xff] %v110_v36 }
  0x27   :  { %113 = vst [vmem:[#allocation4 + $0x128] sm:$0xff] %v112_v37 }
  0x28   :  { %115 = vst [vmem:[#allocation4 + $0x130] sm:$0xff] %v114_v38 }
  0x29   :  { %117 = vst [vmem:[#allocation4 + $0x138] sm:$0xff] %v116_v39 }
  0x2a   :  { %119 = vst [vmem:[#allocation4 + $0x140] sm:$0xff] %v118_v40 }
  0x2b   :  { %121 = vst [vmem:[#allocation4 + $0x148] sm:$0xff] %v120_v41 }
  0x2c   :  { %123 = vst [vmem:[#allocation4 + $0x150] sm:$0xff] %v122_v42 }
  0x2d   :  { %125 = vst [vmem:[#allocation4 + $0x158] sm:$0xff] %v124_v43 }
  0x2e   :  { %127 = vst [vmem:[#allocation4 + $0x160] sm:$0xff] %v126_v44 }
  0x2f   :  { %129 = vst [vmem:[#allocation4 + $0x168] sm:$0xff] %v128_v45 }
  0x30   :  { %131 = vst [vmem:[#allocation4 + $0x170] sm:$0xff] %v130_v46 }
  0x31   :  { %133 = vst [vmem:[#allocation4 + $0x178] sm:$0xff] %v132_v47 }
  0x32   :  { %135 = vst [vmem:[#allocation4 + $0x180] sm:$0xff] %v134_v48 }
  0x33   :  { %137 = vst [vmem:[#allocation4 + $0x188] sm:$0xff] %v136_v49 }
  0x34   :  { %139 = vst [vmem:[#allocation4 + $0x190] sm:$0xff] %v138_v50 }
  0x35   :  { %141 = vst [vmem:[#allocation4 + $0x198] sm:$0xff] %v140_v51 }
  0x36   :  { %143 = vst [vmem:[#allocation4 + $0x1a0] sm:$0xff] %v142_v52 }
  0x37   :  { %145 = vst [vmem:[#allocation4 + $0x1a8] sm:$0xff] %v144_v53 }
  0x38   :  { %147 = vst [vmem:[#allocation4 + $0x1b0] sm:$0xff] %v146_v54 }
  0x39   :  { %149 = vst [vmem:[#allocation4 + $0x1b8] sm:$0xff] %v148_v55 }
  0x3a   :  { %151 = vst [vmem:[#allocation4 + $0x1c0] sm:$0xff] %v150_v56 }
  0x3b   :  { %153 = vst [vmem:[#allocation4 + $0x1c8] sm:$0xff] %v152_v57 }
  0x3c   :  { %155 = vst [vmem:[#allocation4 + $0x1d0] sm:$0xff] %v154_v58 }
  0x3d   :  { %157 = vst [vmem:[#allocation4 + $0x1d8] sm:$0xff] %v156_v59 }
  0x3e   :  { %159 = vst [vmem:[#allocation4 + $0x1e0] sm:$0xff] %v158_v60 }
  0x3f   :  { %161 = vst [vmem:[#allocation4 + $0x1e8] sm:$0xff] %v160_v61 }
  0x40   :  { %163 = vst [vmem:[#allocation4 + $0x1f0] sm:$0xff] %v162_v62 }
  0x41   :  { %165 = vst [vmem:[#allocation4 + $0x1f8] sm:$0xff] %v164_v63 }
  0x42   :  { %171 = vsyncadd [#allocation5], 8192  ;;  %v2816_v0 = vld [vmem:[%s5358_s1 + $0x20] sm:$0xf]  ;;  %v3273_v1 = vld [vmem:[%s5358_s1 + $0x2c] sm:$0xf0] }
  0x43   :  { %v2817_v2 = vor.u32 %v3273_v1, %v2816_v0  ;;  %v2824_v3 = vld [vmem:[%s5358_s1 + $0x28] sm:$0xf]  ;;  %v3274_v4 = vld [vmem:[%s5358_s1 + $0x34] sm:$0xf0]  ;;  %v3272_v5 = vld [vmem:[%s5358_s1 + $0x2c] sm:$0xf] }
  0x44   :  { %v2825_v6 = vor.u32 %v3274_v4, %v2824_v3  ;;  %v2826_v7 = vld [vmem:[%s5358_s1 + $0x38] sm:$0xf0]  ;;  %v2800_v8 = vld [vmem:[%s5358_s1] sm:$0xf]  ;;  %v3269_v9 = vld [vmem:[%s5358_s1 + $0xc] sm:$0xf0] }
  0x45   :  { %277 = vmatpush.bf16.msra.mxu0 %v2817_v2  ;;  %3379 = vmatpush.bf16.msra.mxu1 %v2817_v2  ;;  %v2829_v10 = vor.u32 %v3272_v5, %v2826_v7  ;;  %v2801_v11 = vor.u32 %v3269_v9, %v2800_v8  ;;  %v2808_v12 = vld [vmem:[%s5358_s1 + $0x8] sm:$0xf]  ;;  %v3270_v13 = vld [vmem:[%s5358_s1 + $0x14] sm:$0xf0]  ;;  %v3268_v14 = vld [vmem:[%s5358_s1 + $0xc] sm:$0xf] }
  0x46   :  { %335 = vmatpush.bf16.msra.mxu2 %v2825_v6  ;;  %v2809_v15 = vor.u32 %v3270_v13, %v2808_v12  ;;  %v2810_v16 = vld [vmem:[%s5358_s1 + $0x18] sm:$0xf0]  ;;  %v3822_v17 = vld [vmem:[%s5357_s0] sm:$0xff]  ;;  %v2818_v20 = vld [vmem:[%s5358_s1 + $0x30] sm:$0xf0]  ;;  %vm258_vm0 = vcmask 261120  }
  0x47   :  { %364 = vmatpush.bf16.msra.mxu3 %v2829_v10  ;;  %v2813_v18 = vor.u32 %v3268_v14, %v2810_v16  ;;  %v3271_v19 = vld [vmem:[%s5358_s1 + $0x24] sm:$0xf]  ;;  %v3836_v22 = vld [vmem:[%s5357_s0 + $0x18] sm:$0xff]  ;;  %v2802_v24 = vld [vmem:[%s5358_s1 + $0x10] sm:$0xf0] }
  0x48   :  { %v3267_v21 = vld [vmem:[%s5358_s1 + $0x4] sm:$0xf]  ;;  %v2821_v23 = vor.u32 %v3271_v19, %v2818_v20  ;;  %v2962_v26 = vld [vmem:[%s5359_s2 + $0xf0] sm:$0xf0]  ;;  %v2968_v27 = vld [vmem:[%s5359_s2 + $0xe8] sm:$0xf] }
  0x49   :  { %v3303_v25 = vld [vmem:[%s5359_s2 + $0xe4] sm:$0xf]  ;;  %278 = vmatpush.bf16.msra.mxu0 %v2801_v11  ;;  %3380 = vmatpush.bf16.msra.mxu1 %v2801_v11  ;;  %v3306_v28 = vld [vmem:[%s5359_s2 + $0xf4] sm:$0xf0]  ;;  %v2805_v29 = vor.u32 %v3267_v21, %v2802_v24  ;;  %v2960_v30 = vld [vmem:[%s5359_s2 + $0xe0] sm:$0xf] }
  0x4a   :  { %336 = vmatpush.bf16.msra.mxu2 %v2809_v15  ;;  %v3305_v31 = vld [vmem:[%s5359_s2 + $0xec] sm:$0xf0]  ;;  %v2944_v32 = vld [vmem:[%s5359_s2 + $0xc0] sm:$0xf]  ;;  %v3862_v33 = vor.u32 %v3303_v25, %v2962_v26  ;;  %v3864_v34 = vor.u32 %v3306_v28, %v2968_v27  ;;  %v3304_v37 = vld [vmem:[%s5359_s2 + $0xec] sm:$0xf] }
  0x4b   :  { %365 = vmatpush.bf16.msra.mxu3 %v2813_v18  ;;  %v3866_v35 = vor.u32 %v3305_v31, %v2960_v30  ;;  %v3301_v36 = vld [vmem:[%s5359_s2 + $0xcc] sm:$0xf0]  ;;  %v2970_v38 = vld [vmem:[%s5359_s2 + $0xf8] sm:$0xf0]  ;;  %v3299_v40 = vld [vmem:[%s5359_s2 + $0xc4] sm:$0xf] }
  0x4c   :  { %2830 = vmatmul.msk.bf16.vlgmr.msra.gmra.mxu0 %vm258_vm0, %v3822_v17  ;;  %2833 = vmatmul.msk.bf16.vlgmr.msra.gmra.mxu1 %vm258_vm0, %v3836_v22  ;;  %v3881_v39 = vor.u32 %v3304_v37, %v2970_v38  ;;  %v2946_v41 = vld [vmem:[%s5359_s2 + $0xd0] sm:$0xf0]  ;;  %v2952_v42 = vld [vmem:[%s5359_s2 + $0xc8] sm:$0xf]  ;;  %v3895_v43 = vor.u32 %v3301_v36, %v2944_v32  ;;  %v3302_v44 = vld [vmem:[%s5359_s2 + $0xd4] sm:$0xf0] }
  0x4d   :  { %306 = vmatpush.bf16.msrb.mxu1 %v2821_v23  ;;  %2838 = vmatmul.msk.bf16.vlgmr.msra.gmra.mxu2 %vm258_vm0, %v3822_v17  ;;  %v2928_v45 = vld [vmem:[%s5359_s2 + $0xa0] sm:$0xf]  ;;  %v3297_v46 = vld [vmem:[%s5359_s2 + $0xac] sm:$0xf0]  ;;  %v3300_v47 = vld [vmem:[%s5359_s2 + $0xcc] sm:$0xf]  ;;  %v3913_v48 = vor.u32 %v3299_v40, %v2946_v41  ;;  %v3915_v49 = vor.u32 %v3302_v44, %v2952_v42 }
  0x4e   :  { %618 = vmatpush.bf16.msrb.mxu0 %v3866_v35  ;;  %2842 = vmatmul.msk.bf16.vlgmr.msra.gmra.mxu3 %vm258_vm0, %v3822_v17  ;;  %v2954_v50 = vld [vmem:[%s5359_s2 + $0xd8] sm:$0xf0]  ;;  %v3295_v51 = vld [vmem:[%s5359_s2 + $0xa4] sm:$0xf]  ;;  %v2930_v53 = vld [vmem:[%s5359_s2 + $0xb0] sm:$0xf0]  ;;  %v3936_v56 = vor.u32 %v3297_v46, %v2928_v45 }
  0x4f   :  { %644 = vmatpush.bf16.msrb.mxu2 %v3864_v34  ;;  %657 = vmatpush.bf16.msrb.mxu3 %v3881_v39  ;;  %v3924_v52 = vor.u32 %v3300_v47, %v2954_v50  ;;  %v2936_v54 = vld [vmem:[%s5359_s2 + $0xa8] sm:$0xf]  ;;  %v3298_v55 = vld [vmem:[%s5359_s2 + $0xb4] sm:$0xf0]  ;;  %v2912_v57 = vld [vmem:[%s5359_s2 + $0x80] sm:$0xf]  ;;  %v3952_v61 = vor.u32 %v3295_v51, %v2930_v53 }
  0x50   :  { %v3293_v58 = vld [vmem:[%s5359_s2 + $0x8c] sm:$0xf0]  ;;  %v3296_v59 = vld [vmem:[%s5359_s2 + $0xac] sm:$0xf]  ;;  %v2938_v60 = vld [vmem:[%s5359_s2 + $0xb8] sm:$0xf0]  ;;  %v3954_v62 = vor.u32 %v3298_v55, %v2936_v54 }
  0x51   :  { %307 = vmatpush.bf16.msrb.mxu1 %v2805_v29  ;;  %v3291_v63 = vld [vmem:[%s5359_s2 + $0x84] sm:$0xf]  ;;  %v3960_v0 = vor.u32 %v3296_v59, %v2938_v60  ;;  %v2914_v1 = vld [vmem:[%s5359_s2 + $0x90] sm:$0xf0]  ;;  %v2920_v2 = vld [vmem:[%s5359_s2 + $0x88] sm:$0xf]  ;;  %v3972_v4 = vor.u32 %v3293_v58, %v2912_v57 }
  0x52   :  { %619 = vmatpush.bf16.msrb.mxu0 %v3895_v43  ;;  %v3294_v3 = vld [vmem:[%s5359_s2 + $0x94] sm:$0xf0]  ;;  %v2896_v5 = vld [vmem:[%s5359_s2 + $0x60] sm:$0xf]  ;;  %v3289_v6 = vld [vmem:[%s5359_s2 + $0x6c] sm:$0xf0]  ;;  %v3982_v7 = vor.u32 %v3291_v63, %v2914_v1 }
  0x53   :  { %645 = vmatpush.bf16.msrb.mxu2 %v3915_v49  ;;  %658 = vmatpush.bf16.msrb.mxu3 %v3924_v52  ;;  %v3984_v8 = vor.u32 %v3294_v3, %v2920_v2  ;;  %v3989_v9 = vld [vmem:[%s5357_s0 + $0x8] sm:$0xff]  ;;  %v2922_v11 = vld [vmem:[%s5359_s2 + $0x98] sm:$0xf0]  ;;  %v3999_v12 = vor.u32 %v3289_v6, %v2896_v5  ;;  %v2880_v13 = vld [vmem:[%s5359_s2 + $0x40] sm:$0xf] }
  0x54   :  { %v3292_v10 = vld [vmem:[%s5359_s2 + $0x8c] sm:$0xf]  ;;  %v3285_v14 = vld [vmem:[%s5359_s2 + $0x4c] sm:$0xf0]  ;;  %v2904_v16 = vld [vmem:[%s5359_s2 + $0x68] sm:$0xf] }
  0x55   :  { %631 = vmatpush.bf16.msra.mxu1 %v3862_v33  ;;  %v4009_v15 = vor.u32 %v3292_v10, %v2922_v11  ;;  %v3290_v18 = vld [vmem:[%s5359_s2 + $0x74] sm:$0xf0]  ;;  %v3288_v19 = vld [vmem:[%s5359_s2 + $0x6c] sm:$0xf]  ;;  %v4027_v20 = vor.u32 %v3285_v14, %v2880_v13  ;;  %v3281_v21 = vld [vmem:[%s5359_s2 + $0x2c] sm:$0xf0] }
  0x56   :  { %620 = vmatpush.bf16.msrb.mxu0 %v3936_v56  ;;  %v4035_v23 = vor.u32 %v3290_v18, %v2904_v16  ;;  %v2906_v24 = vld [vmem:[%s5359_s2 + $0x78] sm:$0xf0]  ;;  %v3287_v25 = vld [vmem:[%s5359_s2 + $0x64] sm:$0xf]  ;;  %v2898_v26 = vld [vmem:[%s5359_s2 + $0x70] sm:$0xf0] }
  0x57   :  { %646 = vmatpush.bf16.msrb.mxu2 %v3954_v62  ;;  %659 = vmatpush.bf16.msrb.mxu3 %v3960_v0  ;;  %v2888_v27 = vld [vmem:[%s5359_s2 + $0x48] sm:$0xf]  ;;  %v4052_v28 = vor.u32 %v3287_v25, %v2898_v26  ;;  %v4055_v29 = vor.u32 %v3288_v19, %v2906_v24  ;;  %v3286_v30 = vld [vmem:[%s5359_s2 + $0x54] sm:$0xf0]  ;;  %v3284_v31 = vld [vmem:[%s5359_s2 + $0x4c] sm:$0xf] }
  0x58   :  { %v2890_v32 = vld [vmem:[%s5359_s2 + $0x58] sm:$0xf0]  ;;  %v4066_v36 = vor.u32 %v3286_v30, %v2888_v27  ;;  %v3283_v37 = vld [vmem:[%s5359_s2 + $0x44] sm:$0xf]  ;;  %v2882_v38 = vld [vmem:[%s5359_s2 + $0x50] sm:$0xf0] }
  0x59   :  { %632 = vmatpush.bf16.msra.mxu1 %v3913_v48  ;;  %v2872_v40 = vld [vmem:[%s5359_s2 + $0x28] sm:$0xf]  ;;  %v4081_v42 = vor.u32 %v3283_v37, %v2882_v38  ;;  %v3282_v44 = vld [vmem:[%s5359_s2 + $0x34] sm:$0xf0]  ;;  %v2848_v45 = vld [vmem:[%s5359_s2] sm:$0xf]  ;;  %v4094_v47 = vor.u32 %v3284_v31, %v2890_v32 }
  0x5a   :  { %621 = vmatpush.bf16.msrb.mxu0 %v3972_v4  ;;  %v3277_v46 = vld [vmem:[%s5359_s2 + $0xc] sm:$0xf0]  ;;  %v4096_v50 = vor.u32 %v3282_v44, %v2872_v40  ;;  %v3280_v51 = vld [vmem:[%s5359_s2 + $0x2c] sm:$0xf]  ;;  %v2874_v53 = vld [vmem:[%s5359_s2 + $0x38] sm:$0xf0] }
  0x5b   :  { %647 = vmatpush.bf16.msrb.mxu2 %v3984_v8  ;;  %660 = vmatpush.bf16.msrb.mxu3 %v4009_v15  ;;  %v2856_v54 = vld [vmem:[%s5359_s2 + $0x8] sm:$0xf]  ;;  %v3278_v55 = vld [vmem:[%s5359_s2 + $0x14] sm:$0xf0]  ;;  %v4111_v57 = vor.u32 %v3277_v46, %v2848_v45  ;;  %v4116_v58 = vor.u32 %v3280_v51, %v2874_v53  ;;  %v3265_v60 = vld [vmem:[%s5357_s0 + $0x10] sm:$0xff]  ;;  %v5366_v13 = vmov 0  }
  0x5c   :  { %2831 = vmatmul.msk.bf16.gmra.mxu0 %vm258_vm0, %v3989_v9  ;;  %2834 = vmatmul.msk.bf16.vlgmr.msrb.gmra.mxu1 %vm258_vm0, %v3822_v17  ;;  %v2864_v17 = vld [vmem:[%s5359_s2 + $0x20] sm:$0xf]  ;;  %v4118_v59 = vor.u32 %v3278_v55, %v2856_v54  ;;  %v3276_v63 = vld [vmem:[%s5359_s2 + $0xc] sm:$0xf]  ;;  %v2858_v1 = vld [vmem:[%s5359_s2 + $0x18] sm:$0xf0] }
  0x5d   :  { %633 = vmatpush.bf16.msra.mxu1 %v3952_v61  ;;  %2839 = vmatmul.msk.bf16.gmra.mxu2 %vm258_vm0, %v3989_v9  ;;  %v4078_v41 = vor.u32 %v3281_v21, %v2864_v17  ;;  %v4133_v2 = vor.u32 %v3276_v63, %v2858_v1  ;;  %v3279_v3 = vld [vmem:[%s5359_s2 + $0x24] sm:$0xf]  ;;  %v2866_v5 = vld [vmem:[%s5359_s2 + $0x30] sm:$0xf0] }
  0x5e   :  { %622 = vmatpush.bf16.msrb.mxu0 %v3999_v12  ;;  %2843 = vmatmul.msk.bf16.gmra.mxu3 %vm258_vm0, %v3989_v9  ;;  %v4145_v6 = vor.u32 %v3279_v3, %v2866_v5  ;;  %v3275_v10 = vld [vmem:[%s5359_s2 + $0x4] sm:$0xf] }
  0x5f   :  { %648 = vmatpush.bf16.msrb.mxu2 %v4035_v23  ;;  %661 = vmatpush.bf16.msrb.mxu3 %v4055_v29 }
  0x61   :  { %634 = vmatpush.bf16.msra.mxu1 %v3982_v7 }
  0x62   :  { %623 = vmatpush.bf16.msrb.mxu0 %v4027_v20 }
  0x63   :  { %649 = vmatpush.bf16.msrb.mxu2 %v4066_v36  ;;  %662 = vmatpush.bf16.msrb.mxu3 %v4094_v47 }
  0x65   :  { %635 = vmatpush.bf16.msra.mxu1 %v4052_v28 }
  0x66   :  { %624 = vmatpush.bf16.msrb.mxu0 %v4078_v41 }
  0x67   :  { %650 = vmatpush.bf16.msrb.mxu2 %v4096_v50  ;;  %663 = vmatpush.bf16.msrb.mxu3 %v4116_v58 }
  0x69   :  { %636 = vmatpush.bf16.msra.mxu1 %v4081_v42 }
  0x6a   :  { %625 = vmatpush.bf16.msrb.mxu0 %v4111_v57 }
  0x6b   :  { %651 = vmatpush.bf16.msrb.mxu2 %v4118_v59  ;;  %664 = vmatpush.bf16.msrb.mxu3 %v4133_v2 }
  0x6c   :  { %2832 = vmatmul.msk.bf16.gmra.mxu0 %vm258_vm0, %v3265_v60  ;;  %2835 = vmatmul.msk.bf16.gmra.mxu1 %vm258_vm0, %v3989_v9  ;;  %v2850_v9 = vld [vmem:[%s5359_s2 + $0x10] sm:$0xf0] }
  0x6d   :  { %2840 = vmatmul.msk.bf16.gmra.mxu2 %vm258_vm0, %v3265_v60  ;;  %637 = vmatpush.bf16.msra.mxu1 %v4145_v6  ;;  %v4157_v11 = vor.u32 %v3275_v10, %v2850_v9 }
  0x6e   :  { %701 = vmatpush.bf16.msra.mxu0 %v3866_v35  ;;  %2844 = vmatmul.msk.bf16.gmra.mxu3 %vm258_vm0, %v3265_v60 }
  0x6f   :  { %727 = vmatpush.bf16.msra.mxu2 %v3864_v34  ;;  %740 = vmatpush.bf16.msra.mxu3 %v3881_v39 }
  0x71   :  { %638 = vmatpush.bf16.msra.mxu1 %v4157_v11 }
  0x72   :  { %702 = vmatpush.bf16.msra.mxu0 %v3895_v43 }
  0x73   :  { %728 = vmatpush.bf16.msra.mxu2 %v3915_v49  ;;  %741 = vmatpush.bf16.msra.mxu3 %v3924_v52 }
  0x75   :  { %714 = vmatpush.bf16.msrb.mxu1 %v3862_v33 }
  0x76   :  { %703 = vmatpush.bf16.msra.mxu0 %v3936_v56 }
  0x77   :  { %729 = vmatpush.bf16.msra.mxu2 %v3954_v62  ;;  %742 = vmatpush.bf16.msra.mxu3 %v3960_v0 }
  0x79   :  { %715 = vmatpush.bf16.msrb.mxu1 %v3913_v48 }
  0x7a   :  { %704 = vmatpush.bf16.msra.mxu0 %v3972_v4 }
  0x7b   :  { %730 = vmatpush.bf16.msra.mxu2 %v3984_v8  ;;  %743 = vmatpush.bf16.msra.mxu3 %v4009_v15 }
  0x7c   :  { %2836 = vmatmul.msk.bf16.gmra.mxu1 %vm258_vm0, %v3265_v60  ;;  %626 = vmatmul.bf16.vlgmr.msrb.gmra.mxu0 %v5366_v13 }
  0x7d   :  { %2841 = vmatmul.msk.bf16.gmra.mxu2 %vm258_vm0, %v3836_v22  ;;  %716 = vmatpush.bf16.msrb.mxu1 %v3952_v61 }
  0x7e   :  { %2845 = vmatmul.msk.bf16.gmra.mxu3 %vm258_vm0, %v3836_v22  ;;  %705 = vmatpush.bf16.msra.mxu0 %v3999_v12 }
  0x7f   :  { %731 = vmatpush.bf16.msra.mxu2 %v4035_v23  ;;  %744 = vmatpush.bf16.msra.mxu3 %v4055_v29 }
  0x81   :  { %717 = vmatpush.bf16.msrb.mxu1 %v3982_v7 }
  0x82   :  { %706 = vmatpush.bf16.msra.mxu0 %v4027_v20 }
  0x83   :  { %732 = vmatpush.bf16.msra.mxu2 %v4066_v36  ;;  %745 = vmatpush.bf16.msra.mxu3 %v4094_v47 }
  0x85   :  { %718 = vmatpush.bf16.msrb.mxu1 %v4052_v28 }
  0x86   :  { %707 = vmatpush.bf16.msra.mxu0 %v4078_v41 }
  0x87   :  { %733 = vmatpush.bf16.msra.mxu2 %v4096_v50  ;;  %746 = vmatpush.bf16.msra.mxu3 %v4116_v58 }
  0x89   :  { %719 = vmatpush.bf16.msrb.mxu1 %v4081_v42 }
  0x8a   :  { %708 = vmatpush.bf16.msra.mxu0 %v4111_v57 }
  0x8b   :  { %734 = vmatpush.bf16.msra.mxu2 %v4118_v59  ;;  %747 = vmatpush.bf16.msra.mxu3 %v4133_v2 }
  0x8c   :  { %2837 = vmatmul.msk.bf16.gmra.mxu1 %vm258_vm0, %v3836_v22  ;;  %v188_v22 = vld [vmem:[%s5360_s3] sm:$0xf] }
  0x8d   :  { %652 = vmatmul.bf16.vlgmr.msrb.gmra.mxu2 %v5366_v13  ;;  %720 = vmatpush.bf16.msrb.mxu1 %v4145_v6  ;;  %v4236_v14 = vperm.slane %v188_v22, 0  ;;  %v192_v27 = vperm.slane %v188_v22, 2  ;;  %v4250_v30 = vperm.slane %v188_v22, 3  ;;  %v191_v51 = vperm.slane %v188_v22, 1 }
  0x8e   :  { %785 = vmatpush.bf16.msrb.mxu0 %v3866_v35  ;;  %665 = vmatmul.bf16.vlgmr.msrb.gmra.mxu3 %v5366_v13 }
  0x8f   :  { %811 = vmatpush.bf16.msrb.mxu2 %v3864_v34  ;;  %824 = vmatpush.bf16.msrb.mxu3 %v3881_v39  ;;  %5436 = vst [vmem:[#allocation8_spill] sm:$0xff] %v4236_v14 }
  0x91   :  { %721 = vmatpush.bf16.msrb.mxu1 %v4157_v11 }
  0x92   :  { %786 = vmatpush.bf16.msrb.mxu0 %v3895_v43 }
  0x93   :  { %812 = vmatpush.bf16.msrb.mxu2 %v3915_v49  ;;  %825 = vmatpush.bf16.msrb.mxu3 %v3924_v52 }
  0x96   :  { %787 = vmatpush.bf16.msrb.mxu0 %v3936_v56 }
  0x97   :  { %813 = vmatpush.bf16.msrb.mxu2 %v3954_v62  ;;  %826 = vmatpush.bf16.msrb.mxu3 %v3960_v0 }
  0x9a   :  { %788 = vmatpush.bf16.msrb.mxu0 %v3972_v4 }
  0x9b   :  { %814 = vmatpush.bf16.msrb.mxu2 %v3984_v8  ;;  %827 = vmatpush.bf16.msrb.mxu3 %v4009_v15 }
  0x9c   :  { %639 = vmatmul.bf16.vlgmr.msra.gmra.mxu1 %v5366_v13 }
  0x9d   :  { %798 = vmatpush.bf16.msra.mxu1 %v3862_v33 }
  0x9e   :  { %789 = vmatpush.bf16.msrb.mxu0 %v3999_v12 }
  0x9f   :  { %815 = vmatpush.bf16.msrb.mxu2 %v4035_v23  ;;  %828 = vmatpush.bf16.msrb.mxu3 %v4055_v29 }
  0xa1   :  { %799 = vmatpush.bf16.msra.mxu1 %v3913_v48 }
  0xa2   :  { %790 = vmatpush.bf16.msrb.mxu0 %v4027_v20 }
  0xa3   :  { %816 = vmatpush.bf16.msrb.mxu2 %v4066_v36  ;;  %829 = vmatpush.bf16.msrb.mxu3 %v4094_v47 }
  0xa5   :  { %800 = vmatpush.bf16.msra.mxu1 %v3952_v61 }
  0xa6   :  { %791 = vmatpush.bf16.msrb.mxu0 %v4078_v41 }
  0xa7   :  { %817 = vmatpush.bf16.msrb.mxu2 %v4096_v50  ;;  %830 = vmatpush.bf16.msrb.mxu3 %v4116_v58 }
  0xa9   :  { %801 = vmatpush.bf16.msra.mxu1 %v3982_v7 }
  0xaa   :  { %792 = vmatpush.bf16.msrb.mxu0 %v4111_v57 }
  0xab   :  { %818 = vmatpush.bf16.msrb.mxu2 %v4118_v59  ;;  %831 = vmatpush.bf16.msrb.mxu3 %v4133_v2 }
  0xad   :  { %802 = vmatpush.bf16.msra.mxu1 %v4052_v28 }
  0xb1   :  { %803 = vmatpush.bf16.msra.mxu1 %v4081_v42 }
  0xb5   :  { %804 = vmatpush.bf16.msra.mxu1 %v4145_v6 }
  0xb9   :  { %805 = vmatpush.bf16.msra.mxu1 %v4157_v11 }
  0xc9   :  { %v280_v16 = vpop.f32.mrf.mxu0  ;;  %v295_v18 = vpop.f32.mrf.mxu1 }
  0xca   :  { %v4239_v19 = vadd.f32 %v295_v18, %v4236_v14 }
  0xcc   :  { %5437 = vst [vmem:[#allocation9_spill] sm:$0xff] %v4239_v19 }
  0xd0   :  { %v4241_v17 = vpop.f32.mrf.mxu2 }
  0xd1   :  { %v4243_v21 = vpop.f32.mrf.mxu3  ;;  %v282_v24 = vpop.f32.mrf.mxu0 }
  0xd2   :  { %v4246_v25 = vadd.f32 %v282_v24, %v4236_v14  ;;  %v4248_v26 = vpop.f32.mrf.mxu1 }
  0xd3   :  { %5438 = vst [vmem:[#allocation10_spill] sm:$0xff] %v4248_v26 }
  0xd8   :  { %v340_v31 = vpop.f32.mrf.mxu2 }
  0xd9   :  { %v4252_v32 = vadd.f32 %v340_v31, %v192_v27  ;;  %v369_v37 = vpop.f32.mrf.mxu3  ;;  %v285_v38 = vpop.f32.mrf.mxu0 }
  0xda   :  { %v4255_v40 = vadd.f32 %v369_v37, %v4250_v30  ;;  %v4258_v44 = vadd.f32 %v285_v38, %v4236_v14  ;;  %v309_v45 = vpop.f32.mrf.mxu1 }
  0xe0   :  { %v343_v46 = vpop.f32.mrf.mxu2 }
  0xe1   :  { %v4260_v53 = vadd.f32 %v343_v46, %v192_v27  ;;  %v372_v54 = vpop.f32.mrf.mxu3  ;;  %v287_v55 = vpop.f32.mrf.mxu0 }
  0xe2   :  { %v4263_v60 = vadd.f32 %v372_v54, %v4250_v30  ;;  %v4266_v63 = vadd.f32 %v287_v55, %v4236_v14  ;;  %v311_v1 = vpop.f32.mrf.mxu1 }
  0xe3   :  { %v4268_v3 = vadd.f32 %v311_v1, %v191_v51 }
  0xe8   :  { %v345_v5 = vpop.f32.mrf.mxu2 }
  0xe9   :  { %v4270_v10 = vadd.f32 %v345_v5, %v192_v27  ;;  %v374_v9 = vpop.f32.mrf.mxu3  ;;  %v290_v18 = vpop.f32.mrf.mxu0 }
  0xea   :  { %v4273_v22 = vadd.f32 %v374_v9, %v4250_v30  ;;  %v4276_v24 = vadd.f32 %v290_v18, %v4236_v14  ;;  %v314_v31 = vpop.f32.mrf.mxu1 }
  0xeb   :  { %5439 = vst [vmem:[#allocation11_spill] sm:$0xff] %v4270_v10  ;;  %v4278_v37 = vadd.f32 %v314_v31, %v191_v51 }
  0xec   :  { %5440 = vst [vmem:[#allocation12_spill] sm:$0xff] %v4273_v22 }
  0xed   :  { %5441 = vst [vmem:[#allocation13_spill] sm:$0xff] %v4276_v24 }
  0xf0   :  { %v348_v38 = vpop.f32.mrf.mxu2 }
  0xf1   :  { %v4280_v46 = vadd.f32 %v348_v38, %v192_v27  ;;  %v377_v54 = vpop.f32.mrf.mxu3  ;;  %v292_v55 = vpop.f32.mrf.mxu0 }
  0xf2   :  { %v4283_v1 = vadd.f32 %v377_v54, %v4250_v30  ;;  %v4286_v5 = vadd.f32 %v292_v55, %v4236_v14  ;;  %v316_v13 = vpop.f32.mrf.mxu1  ;;  %v281_v54 = vadd.f32 %v280_v16, %v4236_v14 }
  0xf3   :  { %5442 = vst [vmem:[#allocation14_spill] sm:$0xff] %v4280_v46  ;;  %v4288_v9 = vadd.f32 %v316_v13, %v191_v51 }
  0xf4   :  { %5443 = vst [vmem:[#allocation15_spill] sm:$0xff] %v4283_v1 }
  0xf5   :  { %5444 = vst [vmem:[#allocation16_spill] sm:$0xff] %v4286_v5 }
  0xf6   :  { %5445 = vst [vmem:[#allocation17_spill] sm:$0xff] %v4288_v9 }
  0xf8   :  { %v350_v26 = vpop.f32.mrf.mxu2 }
  0xf9   :  { %v4290_v18 = vadd.f32 %v350_v26, %v192_v27  ;;  %v379_v19 = vpop.f32.mrf.mxu3  ;;  %v627_v31 = vpop.f32.mrf.mxu0 }
  0xfa   :  { %v4293_v24 = vadd.f32 %v379_v19, %v4250_v30  ;;  %v319_v38 = vpop.f32.mrf.mxu1 }
  0xfb   :  { %5446 = vst [vmem:[#allocation18_spill] sm:$0xff] %v4290_v18  ;;  %v4295_v46 = vadd.f32 %v319_v38, %v191_v51  ;;  %v670_v18 = vadd.f32 %v627_v31, %v281_v54 }
  0xfc   :  { %5447 = vst [vmem:[#allocation19_spill] sm:$0xff] %v4293_v24 }
  0xfd   :  { %5448 = vst [vmem:[#allocation20_spill] sm:$0xff] %v4295_v46  ;;  %v674_v9 = vmul.f32 0.5, %v670_v18 }
  0xff   :  { %3382 = vtanh.f32 %v674_v9 }
 0x100   :  { %v353_v22 = vpop.f32.mrf.mxu2 }
 0x101   :  { %v4298_v1 = vadd.f32 %v353_v22, %v192_v27  ;;  %v382_v55 = vpop.f32.mrf.mxu3  ;;  %v629_v5 = vpop.f32.mrf.mxu0 }
 0x102   :  { %v4301_v13 = vadd.f32 %v382_v55, %v4250_v30  ;;  %v321_v26 = vpop.f32.mrf.mxu1  ;;  %v339_v5 = vadd.f32 %v4241_v17, %v192_v27  ;;  %v368_v17 = vadd.f32 %v4243_v21, %v4250_v30 }
 0x103   :  { %5449 = vst [vmem:[#allocation21_spill] sm:$0xff] %v4298_v1  ;;  %v4303_v10 = vadd.f32 %v321_v26, %v191_v51 }
 0x104   :  { %5450 = vst [vmem:[#allocation22_spill] sm:$0xff] %v4301_v13 }
 0x105   :  { %5451 = vst [vmem:[#allocation23_spill] sm:$0xff] %v4303_v10  ;;  %v3383_v14 = vpop.eup %3382 }
 0x106   :  { %v676_v26 = vmul.f32 0.5, %v3383_v14 }
 0x108   :  { %v355_v19 = vpop.f32.mrf.mxu2 }
 0x109   :  { %v4305_v24 = vadd.f32 %v355_v19, %v192_v27  ;;  %v384_v38 = vpop.f32.mrf.mxu3  ;;  %v677_v19 = vadd.f32 0.5, %v676_v26 }
 0x10a   :  { %v4308_v46 = vadd.f32 %v384_v38, %v4250_v30  ;;  %v324_v16 = vpop.f32.mrf.mxu1  ;;  %v310_v38 = vadd.f32 %v309_v45, %v191_v51 }
 0x10b   :  { %5452 = vst [vmem:[#allocation24_spill] sm:$0xff] %v4305_v24  ;;  %v4310_v22 = vadd.f32 %v324_v16, %v191_v51 }
 0x10c   :  { %5453 = vst [vmem:[#allocation25_spill] sm:$0xff] %v4308_v46 }
 0x10d   :  { %5454 = vst [vmem:[#allocation26_spill] sm:$0xff] %v4310_v22 }
 0x110   :  { %v653_v55 = vpop.f32.mrf.mxu2 }
 0x111   :  { %v672_v13 = vadd.f32 %v653_v55, %v339_v5  ;;  %v666_v31 = vpop.f32.mrf.mxu3 }
 0x112   :  { %v326_v54 = vpop.f32.mrf.mxu1  ;;  %v673_v22 = vadd.f32 %v666_v31, %v368_v17 }
 0x113   :  { %3384 = vtanh.f32 %v672_v13  ;;  %v4313_v18 = vadd.f32 %v326_v54, %v191_v51 }
 0x114   :  { %v683_v5 = vmul.f32 0.5, %v673_v22 }
 0x115   :  { %5455 = vst [vmem:[#allocation27_spill] sm:$0xff] %v4313_v18 }
 0x118   :  { %v655_v24 = vpop.f32.mrf.mxu2 }
 0x119   :  { %v3385_v1 = vpop.eup %3384  ;;  %v668_v46 = vpop.f32.mrf.mxu3 }
 0x11a   :  { %v688_v10 = vmul.f32 %v3385_v1, %v677_v19  ;;  %v640_v9 = vpop.f32.mrf.mxu1 }
 0x11b   :  { %v671_v16 = vadd.f32 %v640_v9, %v310_v38 }
 0x11d   :  { %v678_v27 = vmul.f32 0.5, %v671_v16 }
 0x11f   :  { %3386 = vtanh.f32 %v678_v27 }
 0x120   :  { %3388 = vtanh.f32 %v683_v5 }
 0x122   :  { %v642_v55 = vpop.f32.mrf.mxu1 }
 0x125   :  { %v3387_v13 = vpop.eup %3386 }
 0x126   :  { %v680_v54 = vmul.f32 0.5, %v3387_v13  ;;  %v3389_v24 = vpop.eup %3388 }
 0x127   :  { %v685_v45 = vmul.f32 0.5, %v3389_v24 }
 0x128   :  { %v681_v14 = vadd.f32 0.5, %v680_v54 }
 0x129   :  { %v686_v51 = vadd.f32 0.5, %v685_v45 }
 0x12a   :  { %v687_v26 = vmul.f32 0.0, %v681_v14 }
 0x12c   :  { %v4317_v18 = vadd.f32 %v688_v10, %v687_v26 }
 0x12e   :  { %3390 = vtanh.f32 %v4317_v18 }
 0x134   :  { %v3391_v46 = vpop.eup %3390 }
 0x135   :  { %v691_v1 = vmul.f32 %v3391_v46, %v686_v51 }
 0x137   :  { %v4320_v21 = vpack.c.bf16 %v691_v1, %v691_v1 }
 0x139   :  { %709 = vmatmul.bf16.vlgmr.msra.gmra.mxu0 %v4320_v21  ;;  %722 = vmatmul.bf16.vlgmr.msrb.gmra.mxu1 %v4320_v21 }
 0x13a   :  { %735 = vmatmul.bf16.vlgmr.msra.gmra.mxu2 %v4320_v21  ;;  %748 = vmatmul.bf16.vlgmr.msra.gmra.mxu3 %v4320_v21 }
 0x13b   :  { %869 = vmatpush.bf16.msra.mxu0 %v3866_v35  ;;  %882 = vmatpush.bf16.msrb.mxu1 %v3862_v33 }
 0x13c   :  { %895 = vmatpush.bf16.msra.mxu2 %v3864_v34  ;;  %908 = vmatpush.bf16.msra.mxu3 %v3881_v39 }
 0x13f   :  { %870 = vmatpush.bf16.msra.mxu0 %v3895_v43  ;;  %883 = vmatpush.bf16.msrb.mxu1 %v3913_v48 }
 0x140   :  { %896 = vmatpush.bf16.msra.mxu2 %v3915_v49  ;;  %909 = vmatpush.bf16.msra.mxu3 %v3924_v52 }
 0x143   :  { %871 = vmatpush.bf16.msra.mxu0 %v3936_v56  ;;  %884 = vmatpush.bf16.msrb.mxu1 %v3952_v61 }
 0x144   :  { %897 = vmatpush.bf16.msra.mxu2 %v3954_v62  ;;  %910 = vmatpush.bf16.msra.mxu3 %v3960_v0 }
 0x147   :  { %872 = vmatpush.bf16.msra.mxu0 %v3972_v4  ;;  %885 = vmatpush.bf16.msrb.mxu1 %v3982_v7 }
 0x148   :  { %898 = vmatpush.bf16.msra.mxu2 %v3984_v8  ;;  %911 = vmatpush.bf16.msra.mxu3 %v4009_v15 }
 0x14b   :  { %873 = vmatpush.bf16.msra.mxu0 %v3999_v12  ;;  %886 = vmatpush.bf16.msrb.mxu1 %v4052_v28 }
 0x14c   :  { %899 = vmatpush.bf16.msra.mxu2 %v4035_v23  ;;  %912 = vmatpush.bf16.msra.mxu3 %v4055_v29 }
 0x14f   :  { %874 = vmatpush.bf16.msra.mxu0 %v4027_v20  ;;  %887 = vmatpush.bf16.msrb.mxu1 %v4081_v42 }
 0x150   :  { %900 = vmatpush.bf16.msra.mxu2 %v4066_v36  ;;  %913 = vmatpush.bf16.msra.mxu3 %v4094_v47 }
 0x153   :  { %875 = vmatpush.bf16.msra.mxu0 %v4078_v41  ;;  %888 = vmatpush.bf16.msrb.mxu1 %v4145_v6 }
 0x154   :  { %901 = vmatpush.bf16.msra.mxu2 %v4096_v50  ;;  %914 = vmatpush.bf16.msra.mxu3 %v4116_v58 }
 0x157   :  { %876 = vmatpush.bf16.msra.mxu0 %v4111_v57  ;;  %889 = vmatpush.bf16.msrb.mxu1 %v4157_v11 }
 0x158   :  { %902 = vmatpush.bf16.msra.mxu2 %v4118_v59  ;;  %915 = vmatpush.bf16.msra.mxu3 %v4133_v2 }
 0x1b6   :  { %v710_v30 = vpop.f32.mrf.mxu0  ;;  %v723_v10 = vpop.f32.mrf.mxu1 }
 0x1b7   :  { %v753_v22 = vadd.f32 %v710_v30, %v4246_v25  ;;  %v754_v31 = vadd.f32 %v723_v10, %v4268_v3 }
 0x1b9   :  { %v757_v19 = vmul.f32 0.5, %v753_v22  ;;  %v761_v38 = vmul.f32 0.5, %v754_v31 }
 0x1bb   :  { %3392 = vtanh.f32 %v757_v19 }
 0x1bc   :  { %3394 = vtanh.f32 %v761_v38 }
 0x1bd   :  { %v736_v9 = vpop.f32.mrf.mxu2  ;;  %v749_v16 = vpop.f32.mrf.mxu3 }
 0x1be   :  { %v755_v17 = vadd.f32 %v736_v9, %v4252_v32  ;;  %v756_v27 = vadd.f32 %v749_v16, %v4255_v40  ;;  %v712_v5 = vpop.f32.mrf.mxu0  ;;  %v725_v55 = vpop.f32.mrf.mxu1 }
 0x1c0   :  { %3396 = vtanh.f32 %v755_v17  ;;  %v766_v13 = vmul.f32 0.5, %v756_v27 }
 0x1c1   :  { %v3393_v54 = vpop.eup %3392 }
 0x1c2   :  { %v3395_v14 = vpop.eup %3394  ;;  %v759_v26 = vmul.f32 0.5, %v3393_v54  ;;  %3398 = vtanh.f32 %v766_v13 }
 0x1c3   :  { %v763_v25 = vmul.f32 0.5, %v3395_v14 }
 0x1c4   :  { %v760_v3 = vadd.f32 0.5, %v759_v26 }
 0x1c5   :  { %v764_v24 = vadd.f32 0.5, %v763_v25  ;;  %v738_v45 = vpop.f32.mrf.mxu2  ;;  %v751_v51 = vpop.f32.mrf.mxu3 }
 0x1c6   :  { %v3397_v46 = vpop.eup %3396 }
 0x1c7   :  { %v770_v1 = vmul.f32 %v764_v24, %v4317_v18  ;;  %v771_v30 = vmul.f32 %v3397_v46, %v760_v3 }
 0x1c8   :  { %v3399_v32 = vpop.eup %3398 }
 0x1c9   :  { %v4363_v10 = vadd.f32 %v771_v30, %v770_v1  ;;  %v768_v40 = vmul.f32 0.5, %v3399_v32 }
 0x1cb   :  { %3400 = vtanh.f32 %v4363_v10  ;;  %v769_v22 = vadd.f32 0.5, %v768_v40 }
 0x1d1   :  { %v3401_v31 = vpop.eup %3400 }
 0x1d2   :  { %v774_v19 = vmul.f32 %v3401_v31, %v769_v22 }
 0x1d4   :  { %v4366_v38 = vpack.c.bf16 %v774_v19, %v774_v19 }
 0x1d6   :  { %793 = vmatmul.bf16.vlgmr.msrb.gmra.mxu0 %v4366_v38  ;;  %806 = vmatmul.bf16.vlgmr.msra.gmra.mxu1 %v4366_v38 }
 0x1d7   :  { %819 = vmatmul.bf16.vlgmr.msrb.gmra.mxu2 %v4366_v38  ;;  %832 = vmatmul.bf16.vlgmr.msrb.gmra.mxu3 %v4366_v38 }
 0x1d8   :  { %953 = vmatpush.bf16.msrb.mxu0 %v3866_v35  ;;  %966 = vmatpush.bf16.msra.mxu1 %v3862_v33 }
 0x1d9   :  { %979 = vmatpush.bf16.msrb.mxu2 %v3864_v34  ;;  %992 = vmatpush.bf16.msrb.mxu3 %v3881_v39 }
 0x1dc   :  { %954 = vmatpush.bf16.msrb.mxu0 %v3895_v43  ;;  %967 = vmatpush.bf16.msra.mxu1 %v3913_v48 }
 0x1dd   :  { %980 = vmatpush.bf16.msrb.mxu2 %v3915_v49  ;;  %993 = vmatpush.bf16.msrb.mxu3 %v3924_v52 }
 0x1e0   :  { %955 = vmatpush.bf16.msrb.mxu0 %v3936_v56  ;;  %968 = vmatpush.bf16.msra.mxu1 %v3952_v61 }
 0x1e1   :  { %981 = vmatpush.bf16.msrb.mxu2 %v3954_v62  ;;  %994 = vmatpush.bf16.msrb.mxu3 %v3960_v0 }
 0x1e4   :  { %956 = vmatpush.bf16.msrb.mxu0 %v3972_v4  ;;  %969 = vmatpush.bf16.msra.mxu1 %v3982_v7 }
 0x1e5   :  { %982 = vmatpush.bf16.msrb.mxu2 %v3984_v8  ;;  %995 = vmatpush.bf16.msrb.mxu3 %v4009_v15 }
 0x1e8   :  { %957 = vmatpush.bf16.msrb.mxu0 %v3999_v12  ;;  %970 = vmatpush.bf16.msra.mxu1 %v4052_v28 }
 0x1e9   :  { %983 = vmatpush.bf16.msrb.mxu2 %v4035_v23  ;;  %996 = vmatpush.bf16.msrb.mxu3 %v4055_v29 }
 0x1ec   :  { %958 = vmatpush.bf16.msrb.mxu0 %v4027_v20  ;;  %971 = vmatpush.bf16.msra.mxu1 %v4081_v42 }
 0x1ed   :  { %984 = vmatpush.bf16.msrb.mxu2 %v4066_v36  ;;  %997 = vmatpush.bf16.msrb.mxu3 %v4094_v47 }
 0x1f0   :  { %959 = vmatpush.bf16.msrb.mxu0 %v4078_v41  ;;  %972 = vmatpush.bf16.msra.mxu1 %v4145_v6 }
 0x1f1   :  { %985 = vmatpush.bf16.msrb.mxu2 %v4096_v50  ;;  %998 = vmatpush.bf16.msrb.mxu3 %v4116_v58 }
 0x1f4   :  { %960 = vmatpush.bf16.msrb.mxu0 %v4111_v57  ;;  %973 = vmatpush.bf16.msra.mxu1 %v4157_v11 }
 0x1f5   :  { %986 = vmatpush.bf16.msrb.mxu2 %v4118_v59  ;;  %999 = vmatpush.bf16.msrb.mxu3 %v4133_v2 }
 0x253   :  { %v794_v18 = vpop.f32.mrf.mxu0  ;;  %v807_v9 = vpop.f32.mrf.mxu1 }
 0x254   :  { %v837_v16 = vadd.f32 %v794_v18, %v4258_v44  ;;  %v838_v17 = vadd.f32 %v807_v9, %v4278_v37 }
 0x256   :  { %v841_v27 = vmul.f32 0.5, %v837_v16  ;;  %v845_v5 = vmul.f32 0.5, %v838_v17 }
 0x258   :  { %3402 = vtanh.f32 %v841_v27 }
 0x259   :  { %3404 = vtanh.f32 %v845_v5  ;;  %v5457_v5 = vld [vmem:[#allocation17_spill] sm:$0xff] }
 0x25a   :  { %v820_v55 = vpop.f32.mrf.mxu2  ;;  %v833_v13 = vpop.f32.mrf.mxu3 }
 0x25b   :  { %v839_v54 = vadd.f32 %v820_v55, %v4260_v53  ;;  %v840_v14 = vadd.f32 %v833_v13, %v4263_v60  ;;  %v796_v26 = vpop.f32.mrf.mxu0  ;;  %v809_v25 = vpop.f32.mrf.mxu1 }
 0x25c   :  { %v5458_v25 = vld [vmem:[#allocation11_spill] sm:$0xff] }
 0x25d   :  { %3406 = vtanh.f32 %v839_v54  ;;  %v850_v3 = vmul.f32 0.5, %v840_v14 }
 0x25e   :  { %v3403_v24 = vpop.eup %3402 }
 0x25f   :  { %v3405_v45 = vpop.eup %3404  ;;  %v843_v51 = vmul.f32 0.5, %v3403_v24  ;;  %3408 = vtanh.f32 %v850_v3  ;;  %v5459_v24 = vld [vmem:[#allocation12_spill] sm:$0xff] }
 0x260   :  { %v847_v44 = vmul.f32 0.5, %v3405_v45 }
 0x261   :  { %v844_v37 = vadd.f32 0.5, %v843_v51 }
 0x262   :  { %v848_v46 = vadd.f32 0.5, %v847_v44  ;;  %v822_v1 = vpop.f32.mrf.mxu2  ;;  %v835_v30 = vpop.f32.mrf.mxu3 }
 0x263   :  { %v3407_v32 = vpop.eup %3406 }
 0x264   :  { %v854_v40 = vmul.f32 %v848_v46, %v4363_v10  ;;  %v855_v22 = vmul.f32 %v3407_v32, %v844_v37 }
 0x265   :  { %v3409_v53 = vpop.eup %3408 }
 0x266   :  { %v4409_v31 = vadd.f32 %v855_v22, %v854_v40  ;;  %v852_v60 = vmul.f32 0.5, %v3409_v53 }
 0x268   :  { %3410 = vtanh.f32 %v4409_v31  ;;  %v853_v19 = vadd.f32 0.5, %v852_v60 }
 0x26e   :  { %v3411_v18 = vpop.eup %3410 }
 0x26f   :  { %v858_v9 = vmul.f32 %v3411_v18, %v853_v19 }
 0x271   :  { %v4412_v16 = vpack.c.bf16 %v858_v9, %v858_v9 }
 0x273   :  { %5456 = vst [vmem:[#allocation28_spill] sm:$0xff] %v4412_v16  ;;  %877 = vmatmul.bf16.vlgmr.msra.gmra.mxu0 %v4412_v16  ;;  %890 = vmatmul.bf16.vlgmr.msrb.gmra.mxu1 %v4412_v16 }
 0x274   :  { %903 = vmatmul.bf16.vlgmr.msra.gmra.mxu2 %v4412_v16  ;;  %916 = vmatmul.bf16.vlgmr.msra.gmra.mxu3 %v4412_v16 }
 0x275   :  { %1037 = vmatpush.bf16.msra.mxu0 %v3866_v35  ;;  %1050 = vmatpush.bf16.msrb.mxu1 %v3862_v33 }
 0x276   :  { %1063 = vmatpush.bf16.msra.mxu2 %v3864_v34  ;;  %1076 = vmatpush.bf16.msra.mxu3 %v3881_v39 }
 0x279   :  { %1038 = vmatpush.bf16.msra.mxu0 %v3895_v43  ;;  %1051 = vmatpush.bf16.msrb.mxu1 %v3913_v48 }
 0x27a   :  { %1064 = vmatpush.bf16.msra.mxu2 %v3915_v49  ;;  %1077 = vmatpush.bf16.msra.mxu3 %v3924_v52 }
 0x27d   :  { %1039 = vmatpush.bf16.msra.mxu0 %v3936_v56  ;;  %1052 = vmatpush.bf16.msrb.mxu1 %v3952_v61 }
 0x27e   :  { %1065 = vmatpush.bf16.msra.mxu2 %v3954_v62  ;;  %1078 = vmatpush.bf16.msra.mxu3 %v3960_v0 }
 0x281   :  { %1040 = vmatpush.bf16.msra.mxu0 %v3972_v4  ;;  %1053 = vmatpush.bf16.msrb.mxu1 %v3982_v7 }
 0x282   :  { %1066 = vmatpush.bf16.msra.mxu2 %v3984_v8  ;;  %1079 = vmatpush.bf16.msra.mxu3 %v4009_v15 }
 0x285   :  { %1041 = vmatpush.bf16.msra.mxu0 %v3999_v12  ;;  %1054 = vmatpush.bf16.msrb.mxu1 %v4052_v28 }
 0x286   :  { %1067 = vmatpush.bf16.msra.mxu2 %v4035_v23  ;;  %1080 = vmatpush.bf16.msra.mxu3 %v4055_v29 }
 0x289   :  { %1042 = vmatpush.bf16.msra.mxu0 %v4027_v20  ;;  %1055 = vmatpush.bf16.msrb.mxu1 %v4081_v42 }
 0x28a   :  { %1068 = vmatpush.bf16.msra.mxu2 %v4066_v36  ;;  %1081 = vmatpush.bf16.msra.mxu3 %v4094_v47 }
 0x28d   :  { %1043 = vmatpush.bf16.msra.mxu0 %v4078_v41  ;;  %1056 = vmatpush.bf16.msrb.mxu1 %v4145_v6 }
 0x28e   :  { %1069 = vmatpush.bf16.msra.mxu2 %v4096_v50  ;;  %1082 = vmatpush.bf16.msra.mxu3 %v4116_v58 }
 0x291   :  { %1044 = vmatpush.bf16.msra.mxu0 %v4111_v57  ;;  %1057 = vmatpush.bf16.msrb.mxu1 %v4157_v11 }
 0x292   :  { %1070 = vmatpush.bf16.msra.mxu2 %v4118_v59  ;;  %1083 = vmatpush.bf16.msra.mxu3 %v4133_v2 }
 0x2f0   :  { %v878_v10 = vpop.f32.mrf.mxu0  ;;  %v891_v17 = vpop.f32.mrf.mxu1 }
 0x2f1   :  { %v921_v27 = vadd.f32 %v878_v10, %v4266_v63  ;;  %v922_v55 = vadd.f32 %v891_v17, %v5457_v5 }
 0x2f3   :  { %v925_v13 = vmul.f32 0.5, %v921_v27  ;;  %v929_v54 = vmul.f32 0.5, %v922_v55 }
 0x2f5   :  { %3412 = vtanh.f32 %v925_v13 }
 0x2f6   :  { %3414 = vtanh.f32 %v929_v54 }
 0x2f7   :  { %v904_v14 = vpop.f32.mrf.mxu2  ;;  %v917_v26 = vpop.f32.mrf.mxu3 }
 0x2f8   :  { %v923_v3 = vadd.f32 %v904_v14, %v5458_v25  ;;  %v924_v45 = vadd.f32 %v917_v26, %v5459_v24  ;;  %v880_v51 = vpop.f32.mrf.mxu0  ;;  %v893_v44 = vpop.f32.mrf.mxu1  ;;  %v5461_v14 = vld [vmem:[#allocation13_spill] sm:$0xff]  ;;  %v5462_v25 = vld [vmem:[#allocation20_spill] sm:$0xff] }
 0x2fa   :  { %3416 = vtanh.f32 %v923_v3  ;;  %v934_v37 = vmul.f32 0.5, %v924_v45 }
 0x2fb   :  { %v3413_v46 = vpop.eup %3412 }
 0x2fc   :  { %v3415_v1 = vpop.eup %3414  ;;  %v927_v30 = vmul.f32 0.5, %v3413_v46  ;;  %3418 = vtanh.f32 %v934_v37  ;;  %v5463_v37 = vld [vmem:[#allocation14_spill] sm:$0xff] }
 0x2fd   :  { %v931_v63 = vmul.f32 0.5, %v3415_v1  ;;  %v5464_v1 = vld [vmem:[#allocation15_spill] sm:$0xff] }
 0x2fe   :  { %v928_v32 = vadd.f32 0.5, %v927_v30 }
 0x2ff   :  { %v932_v40 = vadd.f32 0.5, %v931_v63  ;;  %v906_v22 = vpop.f32.mrf.mxu2  ;;  %v919_v53 = vpop.f32.mrf.mxu3 }
 0x300   :  { %v3417_v60 = vpop.eup %3416 }
 0x301   :  { %v938_v19 = vmul.f32 %v932_v40, %v4409_v31  ;;  %v939_v18 = vmul.f32 %v3417_v60, %v928_v32 }
 0x302   :  { %v3419_v9 = vpop.eup %3418 }
 0x303   :  { %v4455_v10 = vadd.f32 %v939_v18, %v938_v19  ;;  %v936_v17 = vmul.f32 0.5, %v3419_v9 }
 0x305   :  { %3420 = vtanh.f32 %v4455_v10  ;;  %v937_v27 = vadd.f32 0.5, %v936_v17 }
 0x30b   :  { %v3421_v5 = vpop.eup %3420 }
 0x30c   :  { %v942_v55 = vmul.f32 %v3421_v5, %v937_v27 }
 0x30e   :  { %v4458_v13 = vpack.c.bf16 %v942_v55, %v942_v55 }
 0x310   :  { %5460 = vst [vmem:[#allocation17_spill] sm:$0xff] %v4458_v13  ;;  %961 = vmatmul.bf16.vlgmr.msrb.gmra.mxu0 %v4458_v13  ;;  %974 = vmatmul.bf16.vlgmr.msra.gmra.mxu1 %v4458_v13 }
 0x311   :  { %987 = vmatmul.bf16.vlgmr.msrb.gmra.mxu2 %v4458_v13  ;;  %1000 = vmatmul.bf16.vlgmr.msrb.gmra.mxu3 %v4458_v13 }
 0x312   :  { %1121 = vmatpush.bf16.msrb.mxu0 %v3866_v35  ;;  %1134 = vmatpush.bf16.msra.mxu1 %v3862_v33 }
 0x313   :  { %1147 = vmatpush.bf16.msrb.mxu2 %v3864_v34  ;;  %1160 = vmatpush.bf16.msrb.mxu3 %v3881_v39 }
 0x316   :  { %1122 = vmatpush.bf16.msrb.mxu0 %v3895_v43  ;;  %1135 = vmatpush.bf16.msra.mxu1 %v3913_v48 }
 0x317   :  { %1148 = vmatpush.bf16.msrb.mxu2 %v3915_v49  ;;  %1161 = vmatpush.bf16.msrb.mxu3 %v3924_v52 }
 0x31a   :  { %1123 = vmatpush.bf16.msrb.mxu0 %v3936_v56  ;;  %1136 = vmatpush.bf16.msra.mxu1 %v3952_v61 }
 0x31b   :  { %1149 = vmatpush.bf16.msrb.mxu2 %v3954_v62  ;;  %1162 = vmatpush.bf16.msrb.mxu3 %v3960_v0 }
 0x31e   :  { %1124 = vmatpush.bf16.msrb.mxu0 %v3972_v4  ;;  %1137 = vmatpush.bf16.msra.mxu1 %v3982_v7 }
 0x31f   :  { %1150 = vmatpush.bf16.msrb.mxu2 %v3984_v8  ;;  %1163 = vmatpush.bf16.msrb.mxu3 %v4009_v15 }
 0x322   :  { %1125 = vmatpush.bf16.msrb.mxu0 %v3999_v12  ;;  %1138 = vmatpush.bf16.msra.mxu1 %v4052_v28 }
 0x323   :  { %1151 = vmatpush.bf16.msrb.mxu2 %v4035_v23  ;;  %1164 = vmatpush.bf16.msrb.mxu3 %v4055_v29 }
 0x326   :  { %1126 = vmatpush.bf16.msrb.mxu0 %v4027_v20  ;;  %1139 = vmatpush.bf16.msra.mxu1 %v4081_v42 }
 0x327   :  { %1152 = vmatpush.bf16.msrb.mxu2 %v4066_v36  ;;  %1165 = vmatpush.bf16.msrb.mxu3 %v4094_v47 }
 0x32a   :  { %1127 = vmatpush.bf16.msrb.mxu0 %v4078_v41  ;;  %1140 = vmatpush.bf16.msra.mxu1 %v4145_v6 }
 0x32b   :  { %1153 = vmatpush.bf16.msrb.mxu2 %v4096_v50  ;;  %1166 = vmatpush.bf16.msrb.mxu3 %v4116_v58 }
 0x32e   :  { %1128 = vmatpush.bf16.msrb.mxu0 %v4111_v57  ;;  %1141 = vmatpush.bf16.msra.mxu1 %v4157_v11 }
 0x32f   :  { %1154 = vmatpush.bf16.msrb.mxu2 %v4118_v59  ;;  %1167 = vmatpush.bf16.msrb.mxu3 %v4133_v2 }
 0x38d   :  { %v962_v31 = vpop.f32.mrf.mxu0  ;;  %v975_v54 = vpop.f32.mrf.mxu1 }
 0x38e   :  { %v1005_v26 = vadd.f32 %v962_v31, %v5461_v14  ;;  %v1006_v3 = vadd.f32 %v975_v54, %v5462_v25 }
 0x390   :  { %v1009_v24 = vmul.f32 0.5, %v1005_v26  ;;  %v1013_v45 = vmul.f32 0.5, %v1006_v3 }
 0x392   :  { %3422 = vtanh.f32 %v1009_v24 }
 0x393   :  { %3424 = vtanh.f32 %v1013_v45 }
 0x394   :  { %v988_v51 = vpop.f32.mrf.mxu2  ;;  %v1001_v44 = vpop.f32.mrf.mxu3 }
 0x395   :  { %v1007_v46 = vadd.f32 %v988_v51, %v5463_v37  ;;  %v1008_v30 = vadd.f32 %v1001_v44, %v5464_v1  ;;  %v964_v63 = vpop.f32.mrf.mxu0  ;;  %v977_v32 = vpop.f32.mrf.mxu1  ;;  %v5471_v1 = vld [vmem:[#allocation9_spill] sm:$0xff] }
 0x396   :  { %v5472_v63 = vld [vmem:[#allocation26_spill] sm:$0xff] }
 0x397   :  { %3426 = vtanh.f32 %v1007_v46  ;;  %v1018_v40 = vmul.f32 0.5, %v1008_v30 }
 0x398   :  { %v3423_v22 = vpop.eup %3422 }
 0x399   :  { %v3425_v53 = vpop.eup %3424  ;;  %v1011_v60 = vmul.f32 0.5, %v3423_v22  ;;  %3428 = vtanh.f32 %v1018_v40 }
 0x39a   :  { %v1015_v19 = vmul.f32 0.5, %v3425_v53 }
 0x39b   :  { %v1012_v18 = vadd.f32 0.5, %v1011_v60 }
 0x39c   :  { %v1016_v9 = vadd.f32 0.5, %v1015_v19  ;;  %v990_v17 = vpop.f32.mrf.mxu2  ;;  %v1003_v27 = vpop.f32.mrf.mxu3  ;;  %v5473_v19 = vld [vmem:[#allocation21_spill] sm:$0xff] }
 0x39d   :  { %v3427_v5 = vpop.eup %3426 }
 0x39e   :  { %v1022_v55 = vmul.f32 %v1016_v9, %v4455_v10  ;;  %v1023_v31 = vmul.f32 %v3427_v5, %v1012_v18  ;;  %v5474_v9 = vld [vmem:[#allocation22_spill] sm:$0xff] }
 0x39f   :  { %v3429_v54 = vpop.eup %3428 }
 0x3a0   :  { %v4501_v14 = vadd.f32 %v1023_v31, %v1022_v55  ;;  %v1020_v26 = vmul.f32 0.5, %v3429_v54 }
 0x3a2   :  { %3430 = vtanh.f32 %v4501_v14  ;;  %v1021_v25 = vadd.f32 0.5, %v1020_v26 }
 0x3a8   :  { %v3431_v3 = vpop.eup %3430 }
 0x3a9   :  { %v1026_v24 = vmul.f32 %v3431_v3, %v1021_v25 }
 0x3ab   :  { %v4504_v45 = vpack.c.bf16 %v1026_v24, %v1026_v24 }
 0x3ad   :  { %5465 = vst [vmem:[#allocation11_spill] sm:$0xff] %v4504_v45  ;;  %1045 = vmatmul.bf16.vlgmr.msra.gmra.mxu0 %v4504_v45  ;;  %1058 = vmatmul.bf16.vlgmr.msrb.gmra.mxu1 %v4504_v45 }
 0x3ae   :  { %1071 = vmatmul.bf16.vlgmr.msra.gmra.mxu2 %v4504_v45  ;;  %1084 = vmatmul.bf16.vlgmr.msra.gmra.mxu3 %v4504_v45 }
 0x3af   :  { %1205 = vmatpush.bf16.msra.mxu0 %v3866_v35  ;;  %1218 = vmatpush.bf16.msrb.mxu1 %v3862_v33  ;;  %v5466_v35 = vld [vmem:[#allocation16_spill] sm:$0xff] }
 0x3b0   :  { %1231 = vmatpush.bf16.msra.mxu2 %v3864_v34  ;;  %1244 = vmatpush.bf16.msra.mxu3 %v3881_v39 }
 0x3b3   :  { %1206 = vmatpush.bf16.msra.mxu0 %v3895_v43  ;;  %1219 = vmatpush.bf16.msrb.mxu1 %v3913_v48  ;;  %v5467_v43 = vld [vmem:[#allocation23_spill] sm:$0xff] }
 0x3b4   :  { %1232 = vmatpush.bf16.msra.mxu2 %v3915_v49  ;;  %1245 = vmatpush.bf16.msra.mxu3 %v3924_v52 }
 0x3b7   :  { %1207 = vmatpush.bf16.msra.mxu0 %v3936_v56  ;;  %1220 = vmatpush.bf16.msrb.mxu1 %v3952_v61 }
 0x3b8   :  { %1233 = vmatpush.bf16.msra.mxu2 %v3954_v62  ;;  %1246 = vmatpush.bf16.msra.mxu3 %v3960_v0  ;;  %v5468_v62 = vld [vmem:[#allocation18_spill] sm:$0xff] }
 0x3bb   :  { %1208 = vmatpush.bf16.msra.mxu0 %v3972_v4  ;;  %1221 = vmatpush.bf16.msrb.mxu1 %v3982_v7  ;;  %v5469_v4 = vld [vmem:[#allocation19_spill] sm:$0xff] }
 0x3bc   :  { %1234 = vmatpush.bf16.msra.mxu2 %v3984_v8  ;;  %1247 = vmatpush.bf16.msra.mxu3 %v4009_v15 }
 0x3bf   :  { %1209 = vmatpush.bf16.msra.mxu0 %v3999_v12  ;;  %1222 = vmatpush.bf16.msrb.mxu1 %v4052_v28 }
 0x3c0   :  { %1235 = vmatpush.bf16.msra.mxu2 %v4035_v23  ;;  %1248 = vmatpush.bf16.msra.mxu3 %v4055_v29 }
 0x3c3   :  { %1210 = vmatpush.bf16.msra.mxu0 %v4027_v20  ;;  %1223 = vmatpush.bf16.msrb.mxu1 %v4081_v42 }
 0x3c4   :  { %1236 = vmatpush.bf16.msra.mxu2 %v4066_v36  ;;  %1249 = vmatpush.bf16.msra.mxu3 %v4094_v47 }
 0x3c7   :  { %1211 = vmatpush.bf16.msra.mxu0 %v4078_v41  ;;  %1224 = vmatpush.bf16.msrb.mxu1 %v4145_v6 }
 0x3c8   :  { %1237 = vmatpush.bf16.msra.mxu2 %v4096_v50  ;;  %1250 = vmatpush.bf16.msra.mxu3 %v4116_v58 }
 0x3cb   :  { %1212 = vmatpush.bf16.msra.mxu0 %v4111_v57  ;;  %1225 = vmatpush.bf16.msrb.mxu1 %v4157_v11 }
 0x3cc   :  { %1238 = vmatpush.bf16.msra.mxu2 %v4118_v59  ;;  %1251 = vmatpush.bf16.msra.mxu3 %v4133_v2 }
 0x42a   :  { %v1046_v33 = vpop.f32.mrf.mxu0  ;;  %v1059_v34 = vpop.f32.mrf.mxu1 }
 0x42b   :  { %v1089_v39 = vadd.f32 %v1046_v33, %v5466_v35  ;;  %v1090_v48 = vadd.f32 %v1059_v34, %v5467_v43 }
 0x42d   :  { %v1093_v49 = vmul.f32 0.5, %v1089_v39  ;;  %v1097_v52 = vmul.f32 0.5, %v1090_v48 }
 0x42f   :  { %3432 = vtanh.f32 %v1093_v49 }
 0x430   :  { %3434 = vtanh.f32 %v1097_v52 }
 0x431   :  { %v1072_v56 = vpop.f32.mrf.mxu2  ;;  %v1085_v61 = vpop.f32.mrf.mxu3 }
 0x432   :  { %v1091_v0 = vadd.f32 %v1072_v56, %v5468_v62  ;;  %v1092_v7 = vadd.f32 %v1085_v61, %v5469_v4  ;;  %v1048_v8 = vpop.f32.mrf.mxu0  ;;  %v1061_v12 = vpop.f32.mrf.mxu1  ;;  %v5477_v4 = vld [vmem:[#allocation10_spill] sm:$0xff] }
 0x434   :  { %3436 = vtanh.f32 %v1091_v0  ;;  %v1102_v15 = vmul.f32 0.5, %v1092_v7  ;;  %v5476_v0 = vld [vmem:[#allocation8_spill] sm:$0xff] }
 0x435   :  { %v3433_v20 = vpop.eup %3432  ;;  %v298_v7 = vadd.f32 %v5477_v4, %v5476_v0 }
 0x436   :  { %v3435_v23 = vpop.eup %3434  ;;  %v1095_v28 = vmul.f32 0.5, %v3433_v20  ;;  %3438 = vtanh.f32 %v1102_v15  ;;  %v5478_v20 = vld [vmem:[#allocation27_spill] sm:$0xff] }
 0x437   :  { %v1099_v29 = vmul.f32 0.5, %v3435_v23 }
 0x438   :  { %v1096_v36 = vadd.f32 0.5, %v1095_v28 }
 0x439   :  { %v1100_v41 = vadd.f32 0.5, %v1099_v29  ;;  %v1074_v42 = vpop.f32.mrf.mxu2  ;;  %v1087_v47 = vpop.f32.mrf.mxu3 }
 0x43a   :  { %v3437_v50 = vpop.eup %3436  ;;  %v5479_v42 = vld [vmem:[#allocation24_spill] sm:$0xff] }
 0x43b   :  { %v1106_v57 = vmul.f32 %v1100_v41, %v4501_v14  ;;  %v1107_v58 = vmul.f32 %v3437_v50, %v1096_v36  ;;  %v5480_v50 = vld [vmem:[#allocation25_spill] sm:$0xff] }
 0x43c   :  { %v3439_v59 = vpop.eup %3438 }
 0x43d   :  { %v1108_v2 = vadd.f32 %v1107_v58, %v1106_v57  ;;  %v1104_v6 = vmul.f32 0.5, %v3439_v59 }
 0x43f   :  { %3440 = vtanh.f32 %v1108_v2  ;;  %v1105_v11 = vadd.f32 0.5, %v1104_v6 }
 0x445   :  { %v3441_v10 = vpop.eup %3440 }
 0x446   :  { %v1110_v51 = vmul.f32 %v3441_v10, %v1105_v11 }
 0x448   :  { %v4547_v44 = vpack.c.bf16 %v1110_v51, %v1110_v51 }
 0x44a   :  { %5470 = vst [vmem:[#allocation12_spill] sm:$0xff] %v4547_v44  ;;  %1129 = vmatmul.bf16.vlgmr.msrb.gmra.mxu0 %v4547_v44  ;;  %1142 = vmatmul.bf16.vlgmr.msra.gmra.mxu1 %v4547_v44 }
 0x44b   :  { %1155 = vmatmul.bf16.vlgmr.msrb.gmra.mxu2 %v4547_v44  ;;  %1168 = vmatmul.bf16.vlgmr.msrb.gmra.mxu3 %v4547_v44 }
 0x4c7   :  { %v1130_v37 = vpop.f32.mrf.mxu0  ;;  %v1143_v46 = vpop.f32.mrf.mxu1 }
 0x4c8   :  { %v1173_v30 = vadd.f32 %v1130_v37, %v5471_v1  ;;  %v1174_v32 = vadd.f32 %v1143_v46, %v5472_v63 }
 0x4ca   :  { %v1177_v40 = vmul.f32 0.5, %v1173_v30  ;;  %v1181_v22 = vmul.f32 0.5, %v1174_v32 }
 0x4cc   :  { %3442 = vtanh.f32 %v1177_v40 }
 0x4cd   :  { %3444 = vtanh.f32 %v1181_v22 }
 0x4ce   :  { %v1156_v53 = vpop.f32.mrf.mxu2  ;;  %v1169_v60 = vpop.f32.mrf.mxu3 }
 0x4cf   :  { %v1175_v18 = vadd.f32 %v1156_v53, %v5473_v19  ;;  %v1176_v17 = vadd.f32 %v1169_v60, %v5474_v9  ;;  %v1132_v27 = vpop.f32.mrf.mxu0  ;;  %v1145_v5 = vpop.f32.mrf.mxu1 }
 0x4d1   :  { %3446 = vtanh.f32 %v1175_v18  ;;  %v1186_v55 = vmul.f32 0.5, %v1176_v17 }
 0x4d2   :  { %v3443_v31 = vpop.eup %3442 }
 0x4d3   :  { %v3445_v54 = vpop.eup %3444  ;;  %v1179_v14 = vmul.f32 0.5, %v3443_v31  ;;  %3448 = vtanh.f32 %v1186_v55 }
 0x4d4   :  { %v1183_v26 = vmul.f32 0.5, %v3445_v54 }
 0x4d5   :  { %v1180_v25 = vadd.f32 0.5, %v1179_v14 }
 0x4d6   :  { %v1184_v3 = vadd.f32 0.5, %v1183_v26  ;;  %v1158_v24 = vpop.f32.mrf.mxu2  ;;  %v1171_v33 = vpop.f32.mrf.mxu3 }
 0x4d7   :  { %v3447_v34 = vpop.eup %3446 }
 0x4d8   :  { %v1190_v35 = vmul.f32 %v1184_v3, %v1108_v2  ;;  %v1191_v39 = vmul.f32 %v3447_v34, %v1180_v25 }
 0x4d9   :  { %v3449_v43 = vpop.eup %3448 }
 0x4da   :  { %v1192_v48 = vadd.f32 %v1191_v39, %v1190_v35  ;;  %v1188_v49 = vmul.f32 0.5, %v3449_v43 }
 0x4dc   :  { %3450 = vtanh.f32 %v1192_v48  ;;  %v1189_v52 = vadd.f32 0.5, %v1188_v49 }
 0x4e2   :  { %v3451_v56 = vpop.eup %3450 }
 0x4e3   :  { %v1194_v61 = vmul.f32 %v3451_v56, %v1189_v52 }
 0x4e5   :  { %v4557_v62 = vpack.c.bf16 %v1194_v61, %v1194_v61 }
 0x4e7   :  { %5475 = vst [vmem:[#allocation13_spill] sm:$0xff] %v4557_v62  ;;  %1213 = vmatmul.bf16.vlgmr.msra.gmra.mxu0 %v4557_v62  ;;  %1226 = vmatmul.bf16.vlgmr.msrb.gmra.mxu1 %v4557_v62 }
 0x4e8   :  { %1239 = vmatmul.bf16.vlgmr.msra.gmra.mxu2 %v4557_v62  ;;  %1252 = vmatmul.bf16.vlgmr.msra.gmra.mxu3 %v4557_v62 }
 0x564   :  { %v1214_v8 = vpop.f32.mrf.mxu0  ;;  %v1227_v12 = vpop.f32.mrf.mxu1 }
 0x565   :  { %v1257_v15 = vadd.f32 %v1214_v8, %v298_v7  ;;  %v1258_v23 = vadd.f32 %v1227_v12, %v5478_v20 }
 0x567   :  { %v1261_v28 = vmul.f32 0.5, %v1257_v15  ;;  %v1265_v29 = vmul.f32 0.5, %v1258_v23 }
 0x569   :  { %3452 = vtanh.f32 %v1261_v28 }
 0x56a   :  { %3454 = vtanh.f32 %v1265_v29 }
 0x56b   :  { %v1240_v36 = vpop.f32.mrf.mxu2  ;;  %v1253_v41 = vpop.f32.mrf.mxu3 }
 0x56c   :  { %v1259_v47 = vadd.f32 %v1240_v36, %v5479_v42  ;;  %v1260_v57 = vadd.f32 %v1253_v41, %v5480_v50  ;;  %v1216_v58 = vpop.f32.mrf.mxu0  ;;  %v1229_v59 = vpop.f32.mrf.mxu1 }
 0x56e   :  { %3456 = vtanh.f32 %v1259_v47  ;;  %v1270_v2 = vmul.f32 0.5, %v1260_v57 }
 0x56f   :  { %v3453_v6 = vpop.eup %3452 }
 0x570   :  { %v3455_v11 = vpop.eup %3454  ;;  %v1263_v10 = vmul.f32 0.5, %v3453_v6  ;;  %3458 = vtanh.f32 %v1270_v2 }
 0x571   :  { %v1267_v51 = vmul.f32 0.5, %v3455_v11 }
 0x572   :  { %v1264_v37 = vadd.f32 0.5, %v1263_v10 }
 0x573   :  { %v1268_v46 = vadd.f32 0.5, %v1267_v51  ;;  %v1242_v1 = vpop.f32.mrf.mxu2  ;;  %v1255_v30 = vpop.f32.mrf.mxu3 }
 0x574   :  { %v3457_v63 = vpop.eup %3456 }
 0x575   :  { %v1274_v32 = vmul.f32 %v1268_v46, %v1192_v48  ;;  %v1275_v40 = vmul.f32 %v3457_v63, %v1264_v37 }
 0x576   :  { %v3459_v22 = vpop.eup %3458 }
 0x577   :  { %v1276_v53 = vadd.f32 %v1275_v40, %v1274_v32  ;;  %v1272_v60 = vmul.f32 0.5, %v3459_v22 }
 0x579   :  { %3460 = vtanh.f32 %v1276_v53  ;;  %v1273_v19 = vadd.f32 0.5, %v1272_v60 }
 0x57f   :  { %v3461_v18 = vpop.eup %3460 }
 0x580   :  { %v4568_v9 = vmul.f32 %v3461_v18, %v1273_v19 }
 0x582   :  { %5481 = vst [vmem:[#allocation20_spill] sm:$0xff] %v4568_v9 }
 0x583   :  { %3543 = dma.done.wait [#allocation5], 8192 }
 0x584   :  { %3544 = vsyncadd [#allocation5], 4294959104  ;;  %v3088_v17 = vld [vmem:[#allocation4 + $0xe0] sm:$0xf]  ;;  %v3337_v27 = vld [vmem:[#allocation4 + $0xec] sm:$0xf0] }
 0x585   :  { %v3216_v5 = vld [vmem:[#allocation4 + $0x1e0] sm:$0xf]  ;;  %v4570_v55 = vor.u32 %v3337_v27, %v3088_v17  ;;  %v3369_v31 = vld [vmem:[#allocation4 + $0x1ec] sm:$0xf0]  ;;  %v3335_v54 = vld [vmem:[#allocation4 + $0xe4] sm:$0xf] }
 0x586   :  { %v3090_v14 = vld [vmem:[#allocation4 + $0xf0] sm:$0xf0]  ;;  %v4572_v26 = vor.u32 %v3369_v31, %v3216_v5  ;;  %v3367_v3 = vld [vmem:[#allocation4 + $0x1e4] sm:$0xf]  ;;  %v3072_v33 = vld [vmem:[#allocation4 + $0xc0] sm:$0xf] }
 0x587   :  { %v4574_v25 = vor.u32 %v3335_v54, %v3090_v14  ;;  %v3218_v24 = vld [vmem:[#allocation4 + $0x1f0] sm:$0xf0]  ;;  %1681 = vmatpush.bf16.msrb.mxu0 %v4570_v55  ;;  %v3333_v35 = vld [vmem:[#allocation4 + $0xcc] sm:$0xf0]  ;;  %v3200_v39 = vld [vmem:[#allocation4 + $0x1c0] sm:$0xf] }
 0x588   :  { %v4577_v34 = vor.u32 %v3367_v3, %v3218_v24  ;;  %v3365_v43 = vld [vmem:[#allocation4 + $0x1cc] sm:$0xf0]  ;;  %1694 = vmatpush.bf16.msra.mxu1 %v4572_v26  ;;  %v4581_v48 = vor.u32 %v3333_v35, %v3072_v33  ;;  %v3331_v52 = vld [vmem:[#allocation4 + $0xc4] sm:$0xf]  ;;  %v3074_v56 = vld [vmem:[#allocation4 + $0xd0] sm:$0xf0] }
 0x589   :  { %1707 = vmatpush.bf16.msrb.mxu2 %v4574_v25  ;;  %v4583_v49 = vor.u32 %v3365_v43, %v3200_v39  ;;  %v3363_v61 = vld [vmem:[#allocation4 + $0x1c4] sm:$0xf]  ;;  %v4586_v0 = vor.u32 %v3331_v52, %v3074_v56  ;;  %v3202_v4 = vld [vmem:[#allocation4 + $0x1d0] sm:$0xf0]  ;;  %v3056_v7 = vld [vmem:[#allocation4 + $0xa0] sm:$0xf] }
 0x58a   :  { %1720 = vmatpush.bf16.msrb.mxu3 %v4577_v34  ;;  %v3329_v8 = vld [vmem:[#allocation4 + $0xac] sm:$0xf0]  ;;  %v4588_v12 = vor.u32 %v3363_v61, %v3202_v4  ;;  %v3184_v15 = vld [vmem:[#allocation4 + $0x1a0] sm:$0xf]  ;;  %v3327_v23 = vld [vmem:[#allocation4 + $0xa4] sm:$0xf] }
 0x58b   :  { %v3361_v20 = vld [vmem:[#allocation4 + $0x1ac] sm:$0xf0]  ;;  %1682 = vmatpush.bf16.msrb.mxu0 %v4581_v48  ;;  %v4591_v28 = vor.u32 %v3329_v8, %v3056_v7  ;;  %v3058_v29 = vld [vmem:[#allocation4 + $0xb0] sm:$0xf0]  ;;  %v3359_v36 = vld [vmem:[#allocation4 + $0x1a4] sm:$0xf] }
 0x58c   :  { %v3186_v41 = vld [vmem:[#allocation4 + $0x1b0] sm:$0xf0]  ;;  %1695 = vmatpush.bf16.msra.mxu1 %v4583_v49  ;;  %v4595_v42 = vor.u32 %v3361_v20, %v3184_v15  ;;  %v4597_v47 = vor.u32 %v3327_v23, %v3058_v29  ;;  %v3040_v50 = vld [vmem:[#allocation4 + $0x80] sm:$0xf]  ;;  %v3325_v57 = vld [vmem:[#allocation4 + $0x8c] sm:$0xf0] }
 0x58d   :  { %1708 = vmatpush.bf16.msrb.mxu2 %v4586_v0  ;;  %v3168_v58 = vld [vmem:[#allocation4 + $0x180] sm:$0xf]  ;;  %v4600_v59 = vor.u32 %v3359_v36, %v3186_v41  ;;  %v3357_v2 = vld [vmem:[#allocation4 + $0x18c] sm:$0xf0]  ;;  %v3323_v6 = vld [vmem:[#allocation4 + $0x84] sm:$0xf]  ;;  %v4603_v37 = vor.u32 %v3325_v57, %v3040_v50 }
 0x58e   :  { %5482 = vst [vmem:[#allocation14_spill] sm:$0xff] %v4597_v47  ;;  %1721 = vmatpush.bf16.msrb.mxu3 %v4588_v12  ;;  %v3042_v11 = vld [vmem:[#allocation4 + $0x90] sm:$0xf0]  ;;  %v3355_v10 = vld [vmem:[#allocation4 + $0x184] sm:$0xf]  ;;  %v4607_v46 = vor.u32 %v3357_v2, %v3168_v58 }
 0x58f   :  { %v3170_v51 = vld [vmem:[#allocation4 + $0x190] sm:$0xf0]  ;;  %1683 = vmatpush.bf16.msrb.mxu0 %v4591_v28  ;;  %v4609_v1 = vor.u32 %v3323_v6, %v3042_v11  ;;  %v3024_v30 = vld [vmem:[#allocation4 + $0x60] sm:$0xf]  ;;  %v3321_v63 = vld [vmem:[#allocation4 + $0x6c] sm:$0xf0] }
 0x590   :  { %1696 = vmatpush.bf16.msra.mxu1 %v4595_v42  ;;  %v3152_v32 = vld [vmem:[#allocation4 + $0x160] sm:$0xf]  ;;  %v4612_v40 = vor.u32 %v3355_v10, %v3170_v51  ;;  %v3353_v22 = vld [vmem:[#allocation4 + $0x16c] sm:$0xf0]  ;;  %v3319_v53 = vld [vmem:[#allocation4 + $0x64] sm:$0xf]  ;;  %v4615_v17 = vor.u32 %v3321_v63, %v3024_v30 }
 0x591   :  { %1709 = vmatpush.bf16.msrb.mxu2 %v4597_v47  ;;  %5483 = vst [vmem:[#allocation15_spill] sm:$0xff] %v4609_v1  ;;  %v3026_v60 = vld [vmem:[#allocation4 + $0x70] sm:$0xf0]  ;;  %v3351_v19 = vld [vmem:[#allocation4 + $0x164] sm:$0xf]  ;;  %v4619_v27 = vor.u32 %v3353_v22, %v3152_v32 }
 0x592   :  { %1722 = vmatpush.bf16.msrb.mxu3 %v4600_v59  ;;  %v3154_v18 = vld [vmem:[#allocation4 + $0x170] sm:$0xf0]  ;;  %v4621_v5 = vor.u32 %v3319_v53, %v3026_v60  ;;  %v3008_v31 = vld [vmem:[#allocation4 + $0x40] sm:$0xf]  ;;  %v3317_v54 = vld [vmem:[#allocation4 + $0x4c] sm:$0xf0] }
 0x593   :  { %1684 = vmatpush.bf16.msrb.mxu0 %v4603_v37  ;;  %v3136_v14 = vld [vmem:[#allocation4 + $0x140] sm:$0xf]  ;;  %v4624_v3 = vor.u32 %v3351_v19, %v3154_v18  ;;  %v3349_v24 = vld [vmem:[#allocation4 + $0x14c] sm:$0xf0]  ;;  %v3315_v33 = vld [vmem:[#allocation4 + $0x44] sm:$0xf]  ;;  %v4627_v52 = vor.u32 %v3317_v54, %v3008_v31 }
 0x594   :  { %1697 = vmatpush.bf16.msra.mxu1 %v4607_v46  ;;  %v3010_v35 = vld [vmem:[#allocation4 + $0x50] sm:$0xf0]  ;;  %v3347_v39 = vld [vmem:[#allocation4 + $0x144] sm:$0xf]  ;;  %v4631_v56 = vor.u32 %v3349_v24, %v3136_v14  ;;  %v2992_v4 = vld [vmem:[#allocation4 + $0x20] sm:$0xf] }
 0x595   :  { %1710 = vmatpush.bf16.msrb.mxu2 %v4609_v1  ;;  %v3138_v43 = vld [vmem:[#allocation4 + $0x150] sm:$0xf0]  ;;  %v4633_v61 = vor.u32 %v3315_v33, %v3010_v35  ;;  %v3313_v7 = vld [vmem:[#allocation4 + $0x2c] sm:$0xf0]  ;;  %v3120_v8 = vld [vmem:[#allocation4 + $0x120] sm:$0xf] }
 0x596   :  { %1723 = vmatpush.bf16.msrb.mxu3 %v4612_v40  ;;  %v4636_v15 = vor.u32 %v3347_v39, %v3138_v43  ;;  %v3345_v20 = vld [vmem:[#allocation4 + $0x12c] sm:$0xf0]  ;;  %v3311_v23 = vld [vmem:[#allocation4 + $0x24] sm:$0xf]  ;;  %v2994_v29 = vld [vmem:[#allocation4 + $0x30] sm:$0xf0]  ;;  %v4639_v50 = vor.u32 %v3313_v7, %v2992_v4 }
 0x597   :  { %1685 = vmatpush.bf16.msrb.mxu0 %v4615_v17  ;;  %v3343_v36 = vld [vmem:[#allocation4 + $0x124] sm:$0xf]  ;;  %v3122_v41 = vld [vmem:[#allocation4 + $0x130] sm:$0xf0]  ;;  %v2976_v57 = vld [vmem:[#allocation4] sm:$0xf]  ;;  %v4643_v2 = vor.u32 %v3345_v20, %v3120_v8  ;;  %v4645_v6 = vor.u32 %v3311_v23, %v2994_v29 }
 0x598   :  { %1698 = vmatpush.bf16.msra.mxu1 %v4619_v27  ;;  %v3309_v58 = vld [vmem:[#allocation4 + $0xc] sm:$0xf0]  ;;  %v3104_v11 = vld [vmem:[#allocation4 + $0x100] sm:$0xf]  ;;  %v3307_v51 = vld [vmem:[#allocation4 + $0x4] sm:$0xf]  ;;  %v4648_v30 = vor.u32 %v3343_v36, %v3122_v41 }
 0x599   :  { %1711 = vmatpush.bf16.msrb.mxu2 %v4621_v5  ;;  %v3341_v10 = vld [vmem:[#allocation4 + $0x10c] sm:$0xf0]  ;;  %v2978_v63 = vld [vmem:[#allocation4 + $0x10] sm:$0xf0]  ;;  %v3339_v32 = vld [vmem:[#allocation4 + $0x104] sm:$0xf]  ;;  %v4651_v18 = vor.u32 %v3309_v58, %v2976_v57 }
 0x59a   :  { %1724 = vmatpush.bf16.msrb.mxu3 %v4624_v3  ;;  %v3106_v22 = vld [vmem:[#allocation4 + $0x110] sm:$0xf0]  ;;  %v3096_v53 = vld [vmem:[#allocation4 + $0xe8] sm:$0xf]  ;;  %v3338_v60 = vld [vmem:[#allocation4 + $0xf4] sm:$0xf0]  ;;  %v4655_v24 = vor.u32 %v3341_v10, %v3104_v11  ;;  %v4657_v33 = vor.u32 %v3307_v51, %v2978_v63 }
 0x59b   :  { %1686 = vmatpush.bf16.msrb.mxu0 %v4627_v52  ;;  %v3224_v19 = vld [vmem:[#allocation4 + $0x1e8] sm:$0xf]  ;;  %v3370_v31 = vld [vmem:[#allocation4 + $0x1f4] sm:$0xf0]  ;;  %v3336_v54 = vld [vmem:[#allocation4 + $0xec] sm:$0xf]  ;;  %v4660_v43 = vor.u32 %v3339_v32, %v3106_v22  ;;  %v4662_v4 = vor.u32 %v3338_v60, %v3096_v53 }
 0x59c   :  { %1699 = vmatpush.bf16.msra.mxu1 %v4631_v56  ;;  %v3098_v14 = vld [vmem:[#allocation4 + $0xf8] sm:$0xf0]  ;;  %5484 = vst [vmem:[#allocation16_spill] sm:$0xff] %v4655_v24  ;;  %v3368_v35 = vld [vmem:[#allocation4 + $0x1ec] sm:$0xf]  ;;  %v4664_v7 = vor.u32 %v3370_v31, %v3224_v19 }
 0x59d   :  { %1712 = vmatpush.bf16.msrb.mxu2 %v4633_v61  ;;  %v3226_v39 = vld [vmem:[#allocation4 + $0x1f8] sm:$0xf0]  ;;  %5485 = vst [vmem:[#allocation23_spill] sm:$0xff] %v4660_v43  ;;  %v4666_v8 = vor.u32 %v3336_v54, %v3098_v14  ;;  %v3080_v20 = vld [vmem:[#allocation4 + $0xc8] sm:$0xf] }
 0x59e   :  { %1725 = vmatpush.bf16.msrb.mxu3 %v4636_v15  ;;  %5486 = vst [vmem:[#allocation18_spill] sm:$0xff] %v4664_v7  ;;  %v3334_v23 = vld [vmem:[#allocation4 + $0xd4] sm:$0xf0]  ;;  %v3208_v29 = vld [vmem:[#allocation4 + $0x1c8] sm:$0xf]  ;;  %v4669_v36 = vor.u32 %v3368_v35, %v3226_v39 }
 0x59f   :  { %1687 = vmatpush.bf16.msrb.mxu0 %v4639_v50  ;;  %v3366_v41 = vld [vmem:[#allocation4 + $0x1d4] sm:$0xf0]  ;;  %v3332_v57 = vld [vmem:[#allocation4 + $0xcc] sm:$0xf]  ;;  %v3082_v58 = vld [vmem:[#allocation4 + $0xd8] sm:$0xf0]  ;;  %v4675_v51 = vor.u32 %v3334_v23, %v3080_v20 }
 0x5a0   :  { %1700 = vmatpush.bf16.msra.mxu1 %v4643_v2  ;;  %5487 = vst [vmem:[#allocation19_spill] sm:$0xff] %v4669_v36  ;;  %v3364_v11 = vld [vmem:[#allocation4 + $0x1cc] sm:$0xf]  ;;  %v3210_v10 = vld [vmem:[#allocation4 + $0x1d8] sm:$0xf0]  ;;  %v4679_v63 = vor.u32 %v3366_v41, %v3208_v29  ;;  %v4681_v32 = vor.u32 %v3332_v57, %v3082_v58  ;;  %v5490_v20 = vmov 0  }
 0x5a1   :  { %1713 = vmatpush.bf16.msrb.mxu2 %v4645_v6  ;;  %v3064_v22 = vld [vmem:[#allocation4 + $0xa8] sm:$0xf]  ;;  %v3330_v53 = vld [vmem:[#allocation4 + $0xb4] sm:$0xf0]  ;;  %v4684_v19 = vor.u32 %v3364_v11, %v3210_v10  ;;  %v3328_v54 = vld [vmem:[#allocation4 + $0xac] sm:$0xf] }
 0x5a2   :  { %1726 = vmatpush.bf16.msrb.mxu3 %v4648_v30  ;;  %5488 = vst [vmem:[#allocation9_spill] sm:$0xff] %v4679_v63  ;;  %v3192_v60 = vld [vmem:[#allocation4 + $0x1a8] sm:$0xf]  ;;  %v3362_v31 = vld [vmem:[#allocation4 + $0x1b4] sm:$0xf0]  ;;  %v4690_v23 = vor.u32 %v3330_v53, %v3064_v22 }
 0x5a3   :  { %1688 = vmatpush.bf16.msrb.mxu0 %v4651_v18  ;;  %5489 = vst [vmem:[#allocation26_spill] sm:$0xff] %v4684_v19  ;;  %v3066_v14 = vld [vmem:[#allocation4 + $0xb8] sm:$0xf0]  ;;  %v3360_v35 = vld [vmem:[#allocation4 + $0x1ac] sm:$0xf]  ;;  %v4695_v29 = vor.u32 %v3362_v31, %v3192_v60 }
 0x5a4   :  { %1701 = vmatpush.bf16.msra.mxu1 %v4655_v24  ;;  %v3194_v39 = vld [vmem:[#allocation4 + $0x1b8] sm:$0xf0]  ;;  %5491 = vst [vmem:[#allocation21_spill] sm:$0xff] %v4690_v23  ;;  %v4697_v41 = vor.u32 %v3328_v54, %v3066_v14  ;;  %v3048_v57 = vld [vmem:[#allocation4 + $0x88] sm:$0xf] }
 0x5a5   :  { %1714 = vmatpush.bf16.msrb.mxu2 %v4657_v33  ;;  %5492 = vst [vmem:[#allocation22_spill] sm:$0xff] %v4695_v29  ;;  %v3326_v58 = vld [vmem:[#allocation4 + $0x94] sm:$0xf0]  ;;  %v3176_v11 = vld [vmem:[#allocation4 + $0x188] sm:$0xf]  ;;  %v4700_v10 = vor.u32 %v3360_v35, %v3194_v39 }
 0x5a6   :  { %1727 = vmatpush.bf16.msrb.mxu3 %v4660_v43  ;;  %1689 = vmatmul.bf16.vlgmr.msrb.gmra.mxu0 %v4320_v21  ;;  %v3358_v9 = vld [vmem:[#allocation4 + $0x194] sm:$0xf0]  ;;  %v3324_v22 = vld [vmem:[#allocation4 + $0x8c] sm:$0xf]  ;;  %v3050_v53 = vld [vmem:[#allocation4 + $0x98] sm:$0xf0]  ;;  %v4703_v45 = vor.u32 %v3326_v58, %v3048_v57 }
 0x5a7   :  { %1733 = vmatpush.bf16.msra.mxu0 %v4662_v4  ;;  %1702 = vmatmul.bf16.vlgmr.msra.gmra.mxu1 %v5490_v20  ;;  %5493 = vst [vmem:[#allocation8_spill] sm:$0xff] %v4700_v10  ;;  %v3356_v62 = vld [vmem:[#allocation4 + $0x18c] sm:$0xf]  ;;  %v3178_v44 = vld [vmem:[#allocation4 + $0x198] sm:$0xf0]  ;;  %v4707_v31 = vor.u32 %v3358_v9, %v3176_v11  ;;  %v4709_v54 = vor.u32 %v3324_v22, %v3050_v53 }
 0x5a8   :  { %1746 = vmatpush.bf16.msrb.mxu1 %v4664_v7  ;;  %1715 = vmatmul.bf16.vlgmr.msrb.gmra.mxu2 %v4320_v21  ;;  %5494 = vst [vmem:[#allocation10_spill] sm:$0xff] %v4703_v45  ;;  %v3032_v60 = vld [vmem:[#allocation4 + $0x68] sm:$0xf]  ;;  %v3322_v14 = vld [vmem:[#allocation4 + $0x74] sm:$0xf0]  ;;  %v4712_v13 = vor.u32 %v3356_v62, %v3178_v44 }
 0x5a9   :  { %1759 = vmatpush.bf16.msra.mxu2 %v4666_v8  ;;  %1728 = vmatmul.bf16.vlgmr.msrb.gmra.mxu3 %v5490_v20  ;;  %5495 = vst [vmem:[#allocation27_spill] sm:$0xff] %v4707_v31  ;;  %v3160_v35 = vld [vmem:[#allocation4 + $0x168] sm:$0xf]  ;;  %v3354_v39 = vld [vmem:[#allocation4 + $0x174] sm:$0xf0] }
 0x5aa   :  { %1772 = vmatpush.bf16.msra.mxu3 %v4669_v36  ;;  %5496 = vst [vmem:[#allocation24_spill] sm:$0xff] %v4709_v54  ;;  %v3320_v16 = vld [vmem:[#allocation4 + $0x6c] sm:$0xf]  ;;  %v3162_v58 = vld [vmem:[#allocation4 + $0x178] sm:$0xf0]  ;;  %v4719_v9 = vor.u32 %v3354_v39, %v3160_v35 }
 0x5ab   :  { %1734 = vmatpush.bf16.msra.mxu0 %v4675_v51  ;;  %5497 = vst [vmem:[#allocation25_spill] sm:$0xff] %v4712_v13  ;;  %v3352_v57 = vld [vmem:[#allocation4 + $0x16c] sm:$0xf]  ;;  %v3016_v22 = vld [vmem:[#allocation4 + $0x48] sm:$0xf] }
 0x5ac   :  { %1747 = vmatpush.bf16.msrb.mxu1 %v4679_v63  ;;  %5499 = vst [vmem:[#allocation30_spill] sm:$0xff] %v4719_v9  ;;  %v3318_v53 = vld [vmem:[#allocation4 + $0x54] sm:$0xf0]  ;;  %v3144_v44 = vld [vmem:[#allocation4 + $0x148] sm:$0xf]  ;;  %v4724_v62 = vor.u32 %v3352_v57, %v3162_v58 }
 0x5ad   :  { %1760 = vmatpush.bf16.msra.mxu2 %v4681_v32  ;;  %v3000_v35 = vld [vmem:[#allocation4 + $0x28] sm:$0xf]  ;;  %v3314_v39 = vld [vmem:[#allocation4 + $0x34] sm:$0xf0] }
 0x5ae   :  { %1773 = vmatpush.bf16.msra.mxu3 %v4684_v19  ;;  %5501 = vst [vmem:[#allocation32_spill] sm:$0xff] %v4724_v62  ;;  %v3316_v19 = vld [vmem:[#allocation4 + $0x4c] sm:$0xf]  ;;  %v3128_v57 = vld [vmem:[#allocation4 + $0x128] sm:$0xf] }
 0x5af   :  { %1735 = vmatpush.bf16.msra.mxu0 %v4690_v23  ;;  %v3034_v23 = vld [vmem:[#allocation4 + $0x78] sm:$0xf0] }
 0x5b0   :  { %1748 = vmatpush.bf16.msrb.mxu1 %v4695_v29  ;;  %v4715_v29 = vor.u32 %v3322_v14, %v3032_v60  ;;  %v4721_v11 = vor.u32 %v3320_v16, %v3034_v23  ;;  %v3348_v60 = vld [vmem:[#allocation4 + $0x14c] sm:$0xf]  ;;  %v3146_v14 = vld [vmem:[#allocation4 + $0x158] sm:$0xf0] }
 0x5b1   :  { %1761 = vmatpush.bf16.msra.mxu2 %v4697_v41  ;;  %v4736_v58 = vor.u32 %v3348_v60, %v3146_v14  ;;  %v3112_v60 = vld [vmem:[#allocation4 + $0x108] sm:$0xf] }
 0x5b2   :  { %1774 = vmatpush.bf16.msra.mxu3 %v4700_v10  ;;  %5498 = vst [vmem:[#allocation29_spill] sm:$0xff] %v4715_v29  ;;  %v3350_v10 = vld [vmem:[#allocation4 + $0x154] sm:$0xf0] }
 0x5b3   :  { %1736 = vmatpush.bf16.msra.mxu0 %v4703_v45  ;;  %5500 = vst [vmem:[#allocation31_spill] sm:$0xff] %v4721_v11  ;;  %v3018_v45 = vld [vmem:[#allocation4 + $0x58] sm:$0xf0]  ;;  %v4731_v16 = vor.u32 %v3350_v10, %v3144_v44  ;;  %v2984_v10 = vld [vmem:[#allocation4 + $0x8] sm:$0xf] }
 0x5b4   :  { %1749 = vmatpush.bf16.msrb.mxu1 %v4707_v31  ;;  %v4727_v31 = vor.u32 %v3318_v53, %v3016_v22  ;;  %v4733_v23 = vor.u32 %v3316_v19, %v3018_v45  ;;  %5504 = vst [vmem:[#allocation35_spill] sm:$0xff] %v4736_v58  ;;  %v3344_v22 = vld [vmem:[#allocation4 + $0x12c] sm:$0xf]  ;;  %v3130_v53 = vld [vmem:[#allocation4 + $0x138] sm:$0xf0] }
 0x5b5   :  { %1762 = vmatpush.bf16.msra.mxu2 %v4709_v54  ;;  %5503 = vst [vmem:[#allocation34_spill] sm:$0xff] %v4731_v16  ;;  %v3312_v54 = vld [vmem:[#allocation4 + $0x2c] sm:$0xf]  ;;  %v3310_v44 = vld [vmem:[#allocation4 + $0x14] sm:$0xf0]  ;;  %v4748_v14 = vor.u32 %v3344_v22, %v3130_v53  ;;  %v5515_v22 = vld [vmem:[#allocation10_spill] sm:$0xff] }
 0x5b6   :  { %1775 = vmatpush.bf16.msra.mxu3 %v4712_v13  ;;  %5502 = vst [vmem:[#allocation33_spill] sm:$0xff] %v4727_v31  ;;  %v3346_v13 = vld [vmem:[#allocation4 + $0x134] sm:$0xf0] }
 0x5b7   :  { %1737 = vmatpush.bf16.msra.mxu0 %v4715_v29  ;;  %v3002_v29 = vld [vmem:[#allocation4 + $0x38] sm:$0xf0]  ;;  %v4743_v45 = vor.u32 %v3346_v13, %v3128_v57  ;;  %5506 = vst [vmem:[#allocation37_spill] sm:$0xff] %v4748_v14 }
 0x5b8   :  { %1750 = vmatpush.bf16.msrb.mxu1 %v4719_v9  ;;  %v4739_v9 = vor.u32 %v3314_v39, %v3000_v35  ;;  %v4745_v19 = vor.u32 %v3312_v54, %v3002_v29  ;;  %v3340_v35 = vld [vmem:[#allocation4 + $0x10c] sm:$0xf]  ;;  %v3114_v39 = vld [vmem:[#allocation4 + $0x118] sm:$0xf0] }
 0x5b9   :  { %1763 = vmatpush.bf16.msra.mxu2 %v4721_v11  ;;  %5505 = vst [vmem:[#allocation36_spill] sm:$0xff] %v4743_v45  ;;  %v3308_v11 = vld [vmem:[#allocation4 + $0xc] sm:$0xf]  ;;  %v4760_v54 = vor.u32 %v3340_v35, %v3114_v39  ;;  %v5514_v57 = vld [vmem:[#allocation27_spill] sm:$0xff]  ;;  %v5520_v35 = vld [vmem:[#allocation32_spill] sm:$0xff] }
 0x5ba   :  { %1776 = vmatpush.bf16.msra.mxu3 %v4724_v62  ;;  %v3342_v62 = vld [vmem:[#allocation4 + $0x114] sm:$0xf0] }
 0x5bb   :  { %1738 = vmatpush.bf16.msra.mxu0 %v4727_v31  ;;  %v2986_v31 = vld [vmem:[#allocation4 + $0x18] sm:$0xf0]  ;;  %v4755_v13 = vor.u32 %v3342_v62, %v3112_v60  ;;  %5508 = vst [vmem:[#allocation39_spill] sm:$0xff] %v4760_v54  ;;  %v5513_v62 = vld [vmem:[#allocation8_spill] sm:$0xff]  ;;  %v5519_v60 = vld [vmem:[#allocation29_spill] sm:$0xff] }
 0x5bc   :  { %1751 = vmatpush.bf16.msrb.mxu1 %v4731_v16  ;;  %v4751_v16 = vor.u32 %v3310_v44, %v2984_v10  ;;  %v4757_v29 = vor.u32 %v3308_v11, %v2986_v31  ;;  %v5511_v31 = vld [vmem:[#allocation21_spill] sm:$0xff]  ;;  %v5512_v11 = vld [vmem:[#allocation24_spill] sm:$0xff]  ;;  %v5516_v53 = vld [vmem:[#allocation31_spill] sm:$0xff] }
 0x5bd   :  { %1764 = vmatpush.bf16.msra.mxu2 %v4733_v23  ;;  %5507 = vst [vmem:[#allocation38_spill] sm:$0xff] %v4755_v13  ;;  %v5517_v10 = vld [vmem:[#allocation25_spill] sm:$0xff]  ;;  %v5518_v44 = vld [vmem:[#allocation30_spill] sm:$0xff] }
 0x5be   :  { %1777 = vmatpush.bf16.msra.mxu3 %v4736_v58  ;;  %v5521_v39 = vld [vmem:[#allocation34_spill] sm:$0xff] }
 0x5bf   :  { %1739 = vmatpush.bf16.msra.mxu0 %v4739_v9 }
 0x5c0   :  { %1752 = vmatpush.bf16.msrb.mxu1 %v4743_v45 }
 0x5c1   :  { %1765 = vmatpush.bf16.msra.mxu2 %v4745_v19 }
 0x5c2   :  { %1778 = vmatpush.bf16.msra.mxu3 %v4748_v14 }
 0x5c3   :  { %1740 = vmatpush.bf16.msra.mxu0 %v4751_v16 }
 0x5c4   :  { %1753 = vmatpush.bf16.msrb.mxu1 %v4755_v13 }
 0x5c5   :  { %1766 = vmatpush.bf16.msra.mxu2 %v4757_v29 }
 0x5c6   :  { %1779 = vmatpush.bf16.msra.mxu3 %v4760_v54  ;;  %1741 = vmatmul.bf16.vlgmr.msra.gmra.mxu0 %v4320_v21 }
 0x5c7   :  { %1754 = vmatmul.bf16.vlgmr.msrb.gmra.mxu1 %v5490_v20  ;;  %1806 = vmatpush.bf16.msrb.mxu0 %v4570_v55 }
 0x5c8   :  { %1819 = vmatpush.bf16.msra.mxu1 %v4572_v26  ;;  %1767 = vmatmul.bf16.vlgmr.msra.gmra.mxu2 %v4320_v21  ;;  %v5509_v21 = vld [vmem:[#allocation26_spill] sm:$0xff] }
 0x5c9   :  { %1832 = vmatpush.bf16.msrb.mxu2 %v4574_v25  ;;  %1780 = vmatmul.bf16.vlgmr.msra.gmra.mxu3 %v5490_v20  ;;  %v5510_v20 = vld [vmem:[#allocation22_spill] sm:$0xff] }
 0x5ca   :  { %1845 = vmatpush.bf16.msrb.mxu3 %v4577_v34 }
 0x5cb   :  { %1807 = vmatpush.bf16.msrb.mxu0 %v4581_v48 }
 0x5cc   :  { %1820 = vmatpush.bf16.msra.mxu1 %v4583_v49 }
 0x5cd   :  { %1833 = vmatpush.bf16.msrb.mxu2 %v4586_v0 }
 0x5ce   :  { %1846 = vmatpush.bf16.msrb.mxu3 %v4588_v12 }
 0x5cf   :  { %1808 = vmatpush.bf16.msrb.mxu0 %v4591_v28 }
 0x5d0   :  { %1821 = vmatpush.bf16.msra.mxu1 %v4595_v42 }
 0x5d1   :  { %1834 = vmatpush.bf16.msrb.mxu2 %v4597_v47 }
 0x5d2   :  { %1847 = vmatpush.bf16.msrb.mxu3 %v4600_v59 }
 0x5d3   :  { %1809 = vmatpush.bf16.msrb.mxu0 %v4603_v37 }
 0x5d4   :  { %1822 = vmatpush.bf16.msra.mxu1 %v4607_v46 }
 0x5d5   :  { %1835 = vmatpush.bf16.msrb.mxu2 %v4609_v1 }
 0x5d6   :  { %1848 = vmatpush.bf16.msrb.mxu3 %v4612_v40 }
 0x5d7   :  { %1810 = vmatpush.bf16.msrb.mxu0 %v4615_v17 }
 0x5d8   :  { %1823 = vmatpush.bf16.msra.mxu1 %v4619_v27 }
 0x5d9   :  { %1836 = vmatpush.bf16.msrb.mxu2 %v4621_v5 }
 0x5da   :  { %1849 = vmatpush.bf16.msrb.mxu3 %v4624_v3 }
 0x5db   :  { %1811 = vmatpush.bf16.msrb.mxu0 %v4627_v52 }
 0x5dc   :  { %1824 = vmatpush.bf16.msra.mxu1 %v4631_v56 }
 0x5dd   :  { %1837 = vmatpush.bf16.msrb.mxu2 %v4633_v61 }
 0x5de   :  { %1850 = vmatpush.bf16.msrb.mxu3 %v4636_v15 }
 0x5df   :  { %1812 = vmatpush.bf16.msrb.mxu0 %v4639_v50 }
 0x5e0   :  { %1825 = vmatpush.bf16.msra.mxu1 %v4643_v2 }
 0x5e1   :  { %1838 = vmatpush.bf16.msrb.mxu2 %v4645_v6 }
 0x5e2   :  { %1851 = vmatpush.bf16.msrb.mxu3 %v4648_v30 }
 0x5e3   :  { %1813 = vmatpush.bf16.msrb.mxu0 %v4651_v18 }
 0x5e4   :  { %1826 = vmatpush.bf16.msra.mxu1 %v4655_v24 }
 0x5e5   :  { %1839 = vmatpush.bf16.msrb.mxu2 %v4657_v33 }
 0x5e6   :  { %1852 = vmatpush.bf16.msrb.mxu3 %v4660_v43  ;;  %1814 = vmatmul.bf16.vlgmr.msrb.gmra.mxu0 %v4366_v38 }
 0x5e7   :  { %1858 = vmatpush.bf16.msra.mxu0 %v4662_v4 }
 0x5e8   :  { %1871 = vmatpush.bf16.msrb.mxu1 %v4664_v7  ;;  %1840 = vmatmul.bf16.vlgmr.msrb.gmra.mxu2 %v4366_v38 }
 0x5e9   :  { %1884 = vmatpush.bf16.msra.mxu2 %v4666_v8 }
 0x5ea   :  { %1897 = vmatpush.bf16.msra.mxu3 %v4669_v36 }
 0x5eb   :  { %1859 = vmatpush.bf16.msra.mxu0 %v4675_v51 }
 0x5ec   :  { %1872 = vmatpush.bf16.msrb.mxu1 %v4679_v63 }
 0x5ed   :  { %1885 = vmatpush.bf16.msra.mxu2 %v4681_v32 }
 0x5ee   :  { %1898 = vmatpush.bf16.msra.mxu3 %v5509_v21 }
 0x5ef   :  { %1860 = vmatpush.bf16.msra.mxu0 %v5511_v31 }
 0x5f0   :  { %1873 = vmatpush.bf16.msrb.mxu1 %v5510_v20  ;;  %v5522_v20 = vld [vmem:[#allocation33_spill] sm:$0xff] }
 0x5f1   :  { %1886 = vmatpush.bf16.msra.mxu2 %v4697_v41 }
 0x5f2   :  { %1899 = vmatpush.bf16.msra.mxu3 %v5513_v62 }
 0x5f3   :  { %1861 = vmatpush.bf16.msra.mxu0 %v5515_v22 }
 0x5f4   :  { %1874 = vmatpush.bf16.msrb.mxu1 %v5514_v57 }
 0x5f5   :  { %1887 = vmatpush.bf16.msra.mxu2 %v5512_v11 }
 0x5f6   :  { %1900 = vmatpush.bf16.msra.mxu3 %v5517_v10 }
 0x5f7   :  { %1862 = vmatpush.bf16.msra.mxu0 %v5519_v60 }
 0x5f8   :  { %1875 = vmatpush.bf16.msrb.mxu1 %v5518_v44 }
 0x5f9   :  { %1888 = vmatpush.bf16.msra.mxu2 %v5516_v53 }
 0x5fa   :  { %1901 = vmatpush.bf16.msra.mxu3 %v5520_v35 }
 0x5fb   :  { %1863 = vmatpush.bf16.msra.mxu0 %v5522_v20 }
 0x5fc   :  { %1876 = vmatpush.bf16.msrb.mxu1 %v5521_v39 }
 0x5fd   :  { %1889 = vmatpush.bf16.msra.mxu2 %v4733_v23 }
 0x5fe   :  { %1902 = vmatpush.bf16.msra.mxu3 %v4736_v58 }
 0x5ff   :  { %1864 = vmatpush.bf16.msra.mxu0 %v4739_v9 }
 0x600   :  { %1877 = vmatpush.bf16.msrb.mxu1 %v4743_v45  ;;  %v1349_v45 = vld [vmem:[%s5362_s5] sm:$0xf] }
 0x601   :  { %1890 = vmatpush.bf16.msra.mxu2 %v4745_v19  ;;  %v4868_v39 = vperm.slane %v1349_v45, 1  ;;  %v4871_v44 = vperm.slane %v1349_v45, 0 }
 0x602   :  { %1903 = vmatpush.bf16.msra.mxu3 %v4748_v14 }
 0x603   :  { %1865 = vmatpush.bf16.msra.mxu0 %v4751_v16  ;;  %5524 = vst [vmem:[#allocation21_spill] sm:$0xff] %v4868_v39 }
 0x604   :  { %1878 = vmatpush.bf16.msrb.mxu1 %v4755_v13  ;;  %5525 = vst [vmem:[#allocation24_spill] sm:$0xff] %v4871_v44 }
 0x605   :  { %1891 = vmatpush.bf16.msra.mxu2 %v4757_v29 }
 0x606   :  { %1904 = vmatpush.bf16.msra.mxu3 %v4760_v54  ;;  %1866 = vmatmul.bf16.vlgmr.msra.gmra.mxu0 %v4366_v38 }
 0x607   :  { %1931 = vmatpush.bf16.msrb.mxu0 %v4570_v55 }
 0x608   :  { %1892 = vmatmul.bf16.vlgmr.msra.gmra.mxu2 %v4366_v38  ;;  %v5523_v38 = vld [vmem:[#allocation28_spill] sm:$0xff] }
 0x609   :  { %1957 = vmatpush.bf16.msrb.mxu2 %v4574_v25 }
 0x60b   :  { %1932 = vmatpush.bf16.msrb.mxu0 %v4581_v48 }
 0x60d   :  { %1958 = vmatpush.bf16.msrb.mxu2 %v4586_v0 }
 0x60f   :  { %1933 = vmatpush.bf16.msrb.mxu0 %v4591_v28 }
 0x611   :  { %1959 = vmatpush.bf16.msrb.mxu2 %v4597_v47 }
 0x613   :  { %1934 = vmatpush.bf16.msrb.mxu0 %v4603_v37 }
 0x615   :  { %1960 = vmatpush.bf16.msrb.mxu2 %v4609_v1 }
 0x617   :  { %1935 = vmatpush.bf16.msrb.mxu0 %v4615_v17 }
 0x619   :  { %1961 = vmatpush.bf16.msrb.mxu2 %v4621_v5 }
 0x61b   :  { %1936 = vmatpush.bf16.msrb.mxu0 %v4627_v52 }
 0x61d   :  { %1962 = vmatpush.bf16.msrb.mxu2 %v4633_v61 }
 0x61f   :  { %1937 = vmatpush.bf16.msrb.mxu0 %v4639_v50 }
 0x621   :  { %1963 = vmatpush.bf16.msrb.mxu2 %v4645_v6 }
 0x623   :  { %1938 = vmatpush.bf16.msrb.mxu0 %v4651_v18  ;;  %v1690_v54 = vpop.f32.mrf.mxu0 }
 0x624   :  { %v1703_v13 = vpop.f32.mrf.mxu1  ;;  %v1691_v62 = vadd.f32 %v1690_v54, %v4871_v44 }
 0x625   :  { %1964 = vmatpush.bf16.msrb.mxu2 %v4657_v33 }
 0x626   :  { %1939 = vmatmul.bf16.vlgmr.msrb.gmra.mxu0 %v5523_v38 }
 0x627   :  { %1983 = vmatpush.bf16.msra.mxu0 %v4662_v4 }
 0x628   :  { %1965 = vmatmul.bf16.vlgmr.msrb.gmra.mxu2 %v5523_v38 }
 0x629   :  { %2009 = vmatpush.bf16.msra.mxu2 %v4666_v8 }
 0x62b   :  { %1984 = vmatpush.bf16.msra.mxu0 %v4675_v51  ;;  %v1716_v14 = vpop.f32.mrf.mxu2  ;;  %v1692_v35 = vpop.f32.mrf.mxu0 }
 0x62c   :  { %v1729_v58 = vpop.f32.mrf.mxu3  ;;  %v1705_v10 = vpop.f32.mrf.mxu1  ;;  %v1717_v57 = vadd.f32 %v1716_v14, %v4868_v39  ;;  %v1704_v35 = vadd.f32 %v1703_v13, %v1691_v62 }
 0x62d   :  { %2010 = vmatpush.bf16.msra.mxu2 %v4681_v32 }
 0x62e   :  { %v1730_v36 = vadd.f32 %v1729_v58, %v1717_v57  ;;  %v1785_v14 = vmul.f32 0.5, %v1704_v35 }
 0x62f   :  { %1985 = vmatpush.bf16.msra.mxu0 %v5511_v31 }
 0x630   :  { %v1789_v10 = vmul.f32 0.5, %v1730_v36 }
 0x631   :  { %2011 = vmatpush.bf16.msra.mxu2 %v4697_v41 }
 0x632   :  { %3463 = vtanh.f32 %v1789_v10 }
 0x633   :  { %1986 = vmatpush.bf16.msra.mxu0 %v5515_v22  ;;  %v1718_v21 = vpop.f32.mrf.mxu2  ;;  %3465 = vtanh.f32 %v1785_v14 }
 0x634   :  { %v1731_v63 = vpop.f32.mrf.mxu3 }
 0x635   :  { %2012 = vmatpush.bf16.msra.mxu2 %v5512_v11  ;;  %v4886_v63 = vperm.slane %v1349_v45, 2 }
 0x637   :  { %1987 = vmatpush.bf16.msra.mxu0 %v5519_v60  ;;  %5526 = vst [vmem:[#allocation10_spill] sm:$0xff] %v4886_v63 }
 0x638   :  { %v3464_v58 = vpop.eup %3463 }
 0x639   :  { %2013 = vmatpush.bf16.msra.mxu2 %v5516_v53  ;;  %v3466_v21 = vpop.eup %3465  ;;  %v1791_v57 = vmul.f32 0.5, %v3464_v58 }
 0x63a   :  { %v1787_v35 = vmul.f32 0.5, %v3466_v21 }
 0x63b   :  { %1988 = vmatpush.bf16.msra.mxu0 %v5522_v20  ;;  %v1792_v14 = vadd.f32 0.5, %v1791_v57 }
 0x63d   :  { %2014 = vmatpush.bf16.msra.mxu2 %v4733_v23  ;;  %v1798_v58 = vmul.f32 0.0, %v1792_v14 }
 0x63f   :  { %1989 = vmatpush.bf16.msra.mxu0 %v4739_v9 }
 0x641   :  { %2015 = vmatpush.bf16.msra.mxu2 %v4745_v19 }
 0x643   :  { %1990 = vmatpush.bf16.msra.mxu0 %v4751_v16  ;;  %v1742_v36 = vpop.f32.mrf.mxu0 }
 0x644   :  { %v1743_v13 = vadd.f32 %v1742_v36, %v4886_v63  ;;  %v1755_v54 = vpop.f32.mrf.mxu1 }
 0x645   :  { %2016 = vmatpush.bf16.msra.mxu2 %v4757_v29 }
 0x646   :  { %1991 = vmatmul.bf16.vlgmr.msra.gmra.mxu0 %v5523_v38  ;;  %v1756_v62 = vadd.f32 %v1755_v54, %v1743_v13 }
 0x647   :  { %2056 = vmatpush.bf16.msrb.mxu0 %v4570_v55 }
 0x648   :  { %2017 = vmatmul.bf16.vlgmr.msra.gmra.mxu2 %v5523_v38  ;;  %v4893_v38 = vperm.slane %v1349_v45, 3  ;;  %3467 = vtanh.f32 %v1756_v62 }
 0x649   :  { %2082 = vmatpush.bf16.msrb.mxu2 %v4574_v25 }
 0x64b   :  { %2057 = vmatpush.bf16.msrb.mxu0 %v4581_v48  ;;  %v1768_v10 = vpop.f32.mrf.mxu2  ;;  %v1744_v39 = vpop.f32.mrf.mxu0 }
 0x64c   :  { %v1769_v36 = vadd.f32 %v1768_v10, %v4893_v38  ;;  %v1781_v63 = vpop.f32.mrf.mxu3  ;;  %v1757_v44 = vpop.f32.mrf.mxu1 }
 0x64d   :  { %2083 = vmatpush.bf16.msrb.mxu2 %v4586_v0 }
 0x64e   :  { %v1782_v13 = vadd.f32 %v1781_v63, %v1769_v36  ;;  %v3468_v45 = vpop.eup %3467  ;;  %v5527_v63 = vld [vmem:[#allocation17_spill] sm:$0xff] }
 0x64f   :  { %2058 = vmatpush.bf16.msrb.mxu0 %v4591_v28 }
 0x650   :  { %v1794_v62 = vmul.f32 0.5, %v1782_v13 }
 0x651   :  { %2084 = vmatpush.bf16.msrb.mxu2 %v4597_v47 }
 0x652   :  { %3469 = vtanh.f32 %v1794_v62  ;;  %v5528_v62 = vld [vmem:[#allocation19_spill] sm:$0xff] }
 0x653   :  { %2059 = vmatpush.bf16.msrb.mxu0 %v4603_v37  ;;  %v1770_v57 = vpop.f32.mrf.mxu2 }
 0x654   :  { %v1783_v44 = vpop.f32.mrf.mxu3  ;;  %v5529_v57 = vld [vmem:[#allocation15_spill] sm:$0xff] }
 0x655   :  { %2085 = vmatpush.bf16.msrb.mxu2 %v4609_v1  ;;  %v1788_v1 = vadd.f32 0.5, %v1787_v35  ;;  %v5530_v44 = vld [vmem:[#allocation9_spill] sm:$0xff] }
 0x657   :  { %2060 = vmatpush.bf16.msrb.mxu0 %v4615_v17  ;;  %v1799_v54 = vmul.f32 %v3468_v45, %v1788_v1 }
 0x658   :  { %v3470_v39 = vpop.eup %3469 }
 0x659   :  { %2086 = vmatpush.bf16.msrb.mxu2 %v4621_v5  ;;  %v4901_v21 = vadd.f32 %v1799_v54, %v1798_v58  ;;  %v1796_v1 = vmul.f32 0.5, %v3470_v39  ;;  %v5531_v39 = vld [vmem:[#allocation26_spill] sm:$0xff] }
 0x65b   :  { %2061 = vmatpush.bf16.msrb.mxu0 %v4627_v52  ;;  %3471 = vtanh.f32 %v4901_v21  ;;  %v1797_v10 = vadd.f32 0.5, %v1796_v1  ;;  %v5532_v1 = vld [vmem:[#allocation22_spill] sm:$0xff] }
 0x65d   :  { %2087 = vmatpush.bf16.msrb.mxu2 %v4633_v61 }
 0x65f   :  { %2062 = vmatpush.bf16.msrb.mxu0 %v4639_v50 }
 0x661   :  { %2088 = vmatpush.bf16.msrb.mxu2 %v4645_v6  ;;  %v3472_v35 = vpop.eup %3471 }
 0x662   :  { %v1802_v14 = vmul.f32 %v3472_v35, %v1797_v10  ;;  %v5534_v35 = vld [vmem:[#allocation27_spill] sm:$0xff]  ;;  %v5535_v10 = vld [vmem:[#allocation25_spill] sm:$0xff] }
 0x663   :  { %2063 = vmatpush.bf16.msrb.mxu0 %v4651_v18  ;;  %v4919_v13 = vpop.f32.mrf.mxu0 }
 0x664   :  { %v1805_v36 = vpack.c.bf16 %v1802_v14, %v1802_v14  ;;  %v5536_v14 = vld [vmem:[#allocation30_spill] sm:$0xff] }
 0x665   :  { %2089 = vmatpush.bf16.msrb.mxu2 %v4657_v33 }
 0x666   :  { %2064 = vmatmul.bf16.vlgmr.msrb.gmra.mxu0 %v5527_v63  ;;  %1827 = vmatmul.bf16.vlgmr.msra.gmra.mxu1 %v1805_v36 }
 0x667   :  { %2108 = vmatpush.bf16.msra.mxu0 %v4662_v4  ;;  %1853 = vmatmul.bf16.vlgmr.msrb.gmra.mxu3 %v1805_v36 }
 0x668   :  { %2090 = vmatmul.bf16.vlgmr.msrb.gmra.mxu2 %v5527_v63  ;;  %1944 = vmatpush.bf16.msra.mxu1 %v4572_v26 }
 0x669   :  { %2134 = vmatpush.bf16.msra.mxu2 %v4666_v8  ;;  %1970 = vmatpush.bf16.msrb.mxu3 %v4577_v34 }
 0x66b   :  { %2109 = vmatpush.bf16.msra.mxu0 %v4675_v51  ;;  %v4925_v45 = vpop.f32.mrf.mxu2  ;;  %v1817_v58 = vpop.f32.mrf.mxu0 }
 0x66c   :  { %1945 = vmatpush.bf16.msra.mxu1 %v4583_v49  ;;  %v5538_v58 = vld [vmem:[#allocation34_spill] sm:$0xff] }
 0x66d   :  { %2135 = vmatpush.bf16.msra.mxu2 %v4681_v32  ;;  %1971 = vmatpush.bf16.msrb.mxu3 %v4588_v12 }
 0x66f   :  { %2110 = vmatpush.bf16.msra.mxu0 %v5511_v31 }
 0x670   :  { %1946 = vmatpush.bf16.msra.mxu1 %v4595_v42 }
 0x671   :  { %2136 = vmatpush.bf16.msra.mxu2 %v4697_v41  ;;  %1972 = vmatpush.bf16.msrb.mxu3 %v4600_v59 }
 0x673   :  { %2111 = vmatpush.bf16.msra.mxu0 %v5515_v22  ;;  %v1843_v54 = vpop.f32.mrf.mxu2 }
 0x674   :  { %1947 = vmatpush.bf16.msra.mxu1 %v4607_v46  ;;  %v5539_v54 = vld [vmem:[#allocation35_spill] sm:$0xff] }
 0x675   :  { %2137 = vmatpush.bf16.msra.mxu2 %v5512_v11  ;;  %1973 = vmatpush.bf16.msrb.mxu3 %v4612_v40 }
 0x676   :  { %1879 = vmatmul.bf16.vlgmr.msrb.gmra.mxu1 %v1805_v36 }
 0x677   :  { %2112 = vmatpush.bf16.msra.mxu0 %v5519_v60  ;;  %1905 = vmatmul.bf16.vlgmr.msra.gmra.mxu3 %v1805_v36  ;;  %v5537_v36 = vld [vmem:[#allocation32_spill] sm:$0xff] }
 0x678   :  { %1948 = vmatpush.bf16.msra.mxu1 %v4619_v27 }
 0x679   :  { %2138 = vmatpush.bf16.msra.mxu2 %v5516_v53  ;;  %1974 = vmatpush.bf16.msrb.mxu3 %v4624_v3 }
 0x67b   :  { %2113 = vmatpush.bf16.msra.mxu0 %v5522_v20 }
 0x67c   :  { %1949 = vmatpush.bf16.msra.mxu1 %v4631_v56 }
 0x67d   :  { %2139 = vmatpush.bf16.msra.mxu2 %v4733_v23  ;;  %1975 = vmatpush.bf16.msrb.mxu3 %v4636_v15 }
 0x67f   :  { %2114 = vmatpush.bf16.msra.mxu0 %v4739_v9 }
 0x680   :  { %1950 = vmatpush.bf16.msra.mxu1 %v4643_v2 }
 0x681   :  { %2140 = vmatpush.bf16.msra.mxu2 %v4745_v19  ;;  %1976 = vmatpush.bf16.msrb.mxu3 %v4648_v30 }
 0x683   :  { %2115 = vmatpush.bf16.msra.mxu0 %v4751_v16 }
 0x684   :  { %1951 = vmatpush.bf16.msra.mxu1 %v4655_v24 }
 0x685   :  { %2141 = vmatpush.bf16.msra.mxu2 %v4757_v29  ;;  %1977 = vmatpush.bf16.msrb.mxu3 %v4660_v43 }
 0x686   :  { %2116 = vmatmul.bf16.vlgmr.msra.gmra.mxu0 %v5527_v63 }
 0x687   :  { %2181 = vmatpush.bf16.msrb.mxu0 %v4570_v55 }
 0x688   :  { %2142 = vmatmul.bf16.vlgmr.msra.gmra.mxu2 %v5527_v63  ;;  %1996 = vmatpush.bf16.msrb.mxu1 %v4664_v7  ;;  %v5533_v63 = vld [vmem:[#allocation8_spill] sm:$0xff] }
 0x689   :  { %2207 = vmatpush.bf16.msrb.mxu2 %v4574_v25  ;;  %2022 = vmatpush.bf16.msra.mxu3 %v5528_v62 }
 0x68b   :  { %2182 = vmatpush.bf16.msrb.mxu0 %v4581_v48 }
 0x68c   :  { %1997 = vmatpush.bf16.msrb.mxu1 %v5530_v44 }
 0x68d   :  { %2208 = vmatpush.bf16.msrb.mxu2 %v4586_v0  ;;  %2023 = vmatpush.bf16.msra.mxu3 %v5531_v39 }
 0x68f   :  { %2183 = vmatpush.bf16.msrb.mxu0 %v4591_v28 }
 0x690   :  { %1998 = vmatpush.bf16.msrb.mxu1 %v5532_v1  ;;  %v5547_v1 = vld [vmem:[#allocation21_spill] sm:$0xff] }
 0x691   :  { %2209 = vmatpush.bf16.msrb.mxu2 %v4597_v47  ;;  %2024 = vmatpush.bf16.msra.mxu3 %v5533_v63  ;;  %v1842_v39 = vadd.f32 %v4925_v45, %v5547_v1 }
 0x693   :  { %2184 = vmatpush.bf16.msrb.mxu0 %v4603_v37 }
 0x694   :  { %1999 = vmatpush.bf16.msrb.mxu1 %v5534_v35 }
 0x695   :  { %2210 = vmatpush.bf16.msrb.mxu2 %v5529_v57  ;;  %2025 = vmatpush.bf16.msra.mxu3 %v5535_v10  ;;  %v5540_v10 = vld [vmem:[#allocation11_spill] sm:$0xff] }
 0x697   :  { %2185 = vmatpush.bf16.msrb.mxu0 %v4615_v17 }
 0x698   :  { %2000 = vmatpush.bf16.msrb.mxu1 %v5536_v14  ;;  %v5541_v14 = vld [vmem:[#allocation36_spill] sm:$0xff] }
 0x699   :  { %2211 = vmatpush.bf16.msrb.mxu2 %v4621_v5  ;;  %2026 = vmatpush.bf16.msra.mxu3 %v5537_v36  ;;  %v5542_v36 = vld [vmem:[#allocation37_spill] sm:$0xff] }
 0x69b   :  { %2186 = vmatpush.bf16.msrb.mxu0 %v4627_v52 }
 0x69c   :  { %2001 = vmatpush.bf16.msrb.mxu1 %v5538_v58  ;;  %v5543_v58 = vld [vmem:[#allocation38_spill] sm:$0xff] }
 0x69d   :  { %2212 = vmatpush.bf16.msrb.mxu2 %v4633_v61  ;;  %2027 = vmatpush.bf16.msra.mxu3 %v5539_v54  ;;  %v5544_v54 = vld [vmem:[#allocation39_spill] sm:$0xff] }
 0x69f   :  { %2187 = vmatpush.bf16.msrb.mxu0 %v4639_v50 }
 0x6a0   :  { %2002 = vmatpush.bf16.msrb.mxu1 %v5541_v14 }
 0x6a1   :  { %2213 = vmatpush.bf16.msrb.mxu2 %v4645_v6  ;;  %2028 = vmatpush.bf16.msra.mxu3 %v5542_v36 }
 0x6a3   :  { %2188 = vmatpush.bf16.msrb.mxu0 %v4651_v18 }
 0x6a4   :  { %2003 = vmatpush.bf16.msrb.mxu1 %v5543_v58  ;;  %v5545_v58 = vld [vmem:[#allocation12_spill] sm:$0xff] }
 0x6a5   :  { %2214 = vmatpush.bf16.msrb.mxu2 %v4657_v33  ;;  %2029 = vmatpush.bf16.msra.mxu3 %v5544_v54  ;;  %v1867_v54 = vpop.f32.mrf.mxu0 }
 0x6a6   :  { %2189 = vmatmul.bf16.vlgmr.msrb.gmra.mxu0 %v5540_v10 }
 0x6a7   :  { %2233 = vmatpush.bf16.msra.mxu0 %v4662_v4 }
 0x6a8   :  { %2215 = vmatmul.bf16.vlgmr.msrb.gmra.mxu2 %v5540_v10 }
 0x6a9   :  { %2259 = vmatpush.bf16.msra.mxu2 %v4666_v8 }
 0x6ab   :  { %2234 = vmatpush.bf16.msra.mxu0 %v4675_v51 }
 0x6ad   :  { %2260 = vmatpush.bf16.msra.mxu2 %v4681_v32  ;;  %v1869_v36 = vpop.f32.mrf.mxu0 }
 0x6ae   :  { %v5546_v36 = vld [vmem:[#allocation24_spill] sm:$0xff] }
 0x6af   :  { %2235 = vmatpush.bf16.msra.mxu0 %v5511_v31  ;;  %v1816_v35 = vadd.f32 %v4919_v13, %v5546_v36  ;;  %v5548_v13 = vld [vmem:[#allocation10_spill] sm:$0xff] }
 0x6b0   :  { %v1868_v45 = vadd.f32 %v1867_v54, %v5548_v13 }
 0x6b1   :  { %2261 = vmatpush.bf16.msra.mxu2 %v4697_v41 }
 0x6b3   :  { %2236 = vmatpush.bf16.msra.mxu0 %v5515_v22 }
 0x6b5   :  { %2262 = vmatpush.bf16.msra.mxu2 %v5512_v11  ;;  %v5050_v36 = vpop.f32.mrf.mxu0 }
 0x6b7   :  { %2237 = vmatpush.bf16.msra.mxu0 %v5519_v60 }
 0x6b9   :  { %2263 = vmatpush.bf16.msra.mxu2 %v5516_v53 }
 0x6bb   :  { %2238 = vmatpush.bf16.msra.mxu0 %v5522_v20 }
 0x6bd   :  { %2264 = vmatpush.bf16.msra.mxu2 %v4733_v23 }
 0x6bf   :  { %2239 = vmatpush.bf16.msra.mxu0 %v4739_v9 }
 0x6c1   :  { %2265 = vmatpush.bf16.msra.mxu2 %v4745_v19 }
 0x6c3   :  { %2240 = vmatpush.bf16.msra.mxu0 %v4751_v16 }
 0x6c5   :  { %2266 = vmatpush.bf16.msra.mxu2 %v4757_v29 }
 0x6c6   :  { %2241 = vmatmul.bf16.vlgmr.msra.gmra.mxu0 %v5540_v10 }
 0x6c7   :  { %2306 = vmatpush.bf16.msrb.mxu0 %v4570_v55 }
 0x6c8   :  { %2267 = vmatmul.bf16.vlgmr.msra.gmra.mxu2 %v5540_v10  ;;  %v1893_v10 = vpop.f32.mrf.mxu2 }
 0x6c9   :  { %2332 = vmatpush.bf16.msrb.mxu2 %v4574_v25 }
 0x6cb   :  { %2307 = vmatpush.bf16.msrb.mxu0 %v4581_v48 }
 0x6cd   :  { %2333 = vmatpush.bf16.msrb.mxu2 %v4586_v0 }
 0x6cf   :  { %2308 = vmatpush.bf16.msrb.mxu0 %v4591_v28 }
 0x6d0   :  { %v1895_v14 = vpop.f32.mrf.mxu2 }
 0x6d1   :  { %2334 = vmatpush.bf16.msrb.mxu2 %v4597_v47 }
 0x6d3   :  { %2309 = vmatpush.bf16.msrb.mxu0 %v4603_v37 }
 0x6d5   :  { %2335 = vmatpush.bf16.msrb.mxu2 %v5529_v57 }
 0x6d7   :  { %2310 = vmatpush.bf16.msrb.mxu0 %v4615_v17 }
 0x6d9   :  { %2336 = vmatpush.bf16.msrb.mxu2 %v4621_v5 }
 0x6db   :  { %2311 = vmatpush.bf16.msrb.mxu0 %v4627_v52 }
 0x6dd   :  { %2337 = vmatpush.bf16.msrb.mxu2 %v4633_v61 }
 0x6df   :  { %2312 = vmatpush.bf16.msrb.mxu0 %v4639_v50 }
 0x6e1   :  { %2338 = vmatpush.bf16.msrb.mxu2 %v4645_v6 }
 0x6e3   :  { %2313 = vmatpush.bf16.msrb.mxu0 %v4651_v18  ;;  %v1828_v63 = vpop.f32.mrf.mxu1 }
 0x6e4   :  { %v1829_v14 = vadd.f32 %v1828_v63, %v1816_v35 }
 0x6e5   :  { %2339 = vmatpush.bf16.msrb.mxu2 %v4657_v33 }
 0x6e6   :  { %2314 = vmatmul.bf16.vlgmr.msrb.gmra.mxu0 %v5545_v58  ;;  %v1910_v44 = vmul.f32 0.5, %v1829_v14 }
 0x6e7   :  { %2358 = vmatpush.bf16.msra.mxu0 %v4662_v4 }
 0x6e8   :  { %2340 = vmatmul.bf16.vlgmr.msrb.gmra.mxu2 %v5545_v58  ;;  %3473 = vtanh.f32 %v1910_v44 }
 0x6e9   :  { %2384 = vmatpush.bf16.msra.mxu2 %v4666_v8 }
 0x6ea   :  { %v1854_v62 = vpop.f32.mrf.mxu3 }
 0x6eb   :  { %2359 = vmatpush.bf16.msra.mxu0 %v4675_v51  ;;  %v1855_v7 = vadd.f32 %v1854_v62, %v1842_v39  ;;  %v1830_v43 = vpop.f32.mrf.mxu1 }
 0x6ed   :  { %2385 = vmatpush.bf16.msra.mxu2 %v4681_v32  ;;  %v1914_v24 = vmul.f32 0.5, %v1855_v7 }
 0x6ee   :  { %v3474_v43 = vpop.eup %3473 }
 0x6ef   :  { %2360 = vmatpush.bf16.msra.mxu0 %v5511_v31  ;;  %3475 = vtanh.f32 %v1914_v24  ;;  %v1894_v24 = vadd.f32 %v1893_v10, %v4893_v38  ;;  %v1912_v35 = vmul.f32 0.5, %v3474_v43 }
 0x6f1   :  { %2386 = vmatpush.bf16.msra.mxu2 %v4697_v41  ;;  %v1913_v13 = vadd.f32 0.5, %v1912_v35 }
 0x6f2   :  { %v1856_v63 = vpop.f32.mrf.mxu3 }
 0x6f3   :  { %2361 = vmatpush.bf16.msra.mxu0 %v5515_v22  ;;  %v1880_v7 = vpop.f32.mrf.mxu1 }
 0x6f4   :  { %v1881_v44 = vadd.f32 %v1880_v7, %v1868_v45 }
 0x6f5   :  { %2387 = vmatpush.bf16.msra.mxu2 %v5512_v11  ;;  %v3476_v62 = vpop.eup %3475 }
 0x6f6   :  { %v1916_v39 = vmul.f32 0.5, %v3476_v62  ;;  %3477 = vtanh.f32 %v1881_v44 }
 0x6f7   :  { %2362 = vmatpush.bf16.msra.mxu0 %v5519_v60 }
 0x6f8   :  { %v1917_v54 = vadd.f32 0.5, %v1916_v39 }
 0x6f9   :  { %2388 = vmatpush.bf16.msra.mxu2 %v5516_v53 }
 0x6fa   :  { %v1906_v14 = vpop.f32.mrf.mxu3  ;;  %v1923_v7 = vmul.f32 %v1917_v54, %v4901_v21 }
 0x6fb   :  { %2363 = vmatpush.bf16.msra.mxu0 %v5522_v20  ;;  %v1907_v63 = vadd.f32 %v1906_v14, %v1894_v24  ;;  %v5549_v14 = vld [vmem:[#allocation13_spill] sm:$0xff] }
 0x6fc   :  { %v3478_v1 = vpop.eup %3477 }
 0x6fd   :  { %2389 = vmatpush.bf16.msra.mxu2 %v4733_v23  ;;  %v1919_v45 = vmul.f32 0.5, %v1907_v63  ;;  %v1924_v62 = vmul.f32 %v3478_v1, %v1913_v13  ;;  %v1942_v13 = vpop.f32.mrf.mxu0  ;;  %v5550_v63 = vld [vmem:[#allocation16_spill] sm:$0xff] }
 0x6fe   :  { %v5561_v13 = vld [vmem:[#allocation30_spill] sm:$0xff] }
 0x6ff   :  { %2364 = vmatpush.bf16.msra.mxu0 %v4739_v9  ;;  %3479 = vtanh.f32 %v1919_v45  ;;  %v5056_v10 = vadd.f32 %v1924_v62, %v1923_v7  ;;  %v5552_v45 = vld [vmem:[#allocation18_spill] sm:$0xff]  ;;  %v5553_v7 = vld [vmem:[#allocation19_spill] sm:$0xff]  ;;  %v5554_v62 = vld [vmem:[#allocation9_spill] sm:$0xff] }
 0x701   :  { %2390 = vmatpush.bf16.msra.mxu2 %v4745_v19  ;;  %3481 = vtanh.f32 %v5056_v10 }
 0x702   :  { %v1908_v43 = vpop.f32.mrf.mxu3 }
 0x703   :  { %2365 = vmatpush.bf16.msra.mxu0 %v4751_v16  ;;  %v5555_v43 = vld [vmem:[#allocation26_spill] sm:$0xff] }
 0x705   :  { %2391 = vmatpush.bf16.msra.mxu2 %v4757_v29  ;;  %v3480_v21 = vpop.eup %3479 }
 0x706   :  { %2366 = vmatmul.bf16.vlgmr.msra.gmra.mxu0 %v5545_v58  ;;  %v1921_v1 = vmul.f32 0.5, %v3480_v21  ;;  %v5557_v21 = vld [vmem:[#allocation22_spill] sm:$0xff] }
 0x707   :  { %2431 = vmatpush.bf16.msrb.mxu0 %v4570_v55  ;;  %v3482_v39 = vpop.eup %3481 }
 0x708   :  { %2392 = vmatmul.bf16.vlgmr.msra.gmra.mxu2 %v5545_v58  ;;  %v1882_v58 = vpop.f32.mrf.mxu1  ;;  %v1922_v24 = vadd.f32 0.5, %v1921_v1  ;;  %v5558_v1 = vld [vmem:[#allocation8_spill] sm:$0xff] }
 0x709   :  { %2457 = vmatpush.bf16.msrb.mxu2 %v4574_v25  ;;  %v5551_v58 = vld [vmem:[#allocation23_spill] sm:$0xff] }
 0x70a   :  { %v1927_v35 = vmul.f32 %v3482_v39, %v1922_v24 }
 0x70b   :  { %2432 = vmatpush.bf16.msrb.mxu0 %v4581_v48 }
 0x70c   :  { %v1930_v54 = vpack.c.bf16 %v1927_v35, %v1927_v35 }
 0x70d   :  { %2458 = vmatpush.bf16.msrb.mxu2 %v4586_v0 }
 0x70e   :  { %1952 = vmatmul.bf16.vlgmr.msra.gmra.mxu1 %v1930_v54  ;;  %1978 = vmatmul.bf16.vlgmr.msrb.gmra.mxu3 %v1930_v54 }
 0x70f   :  { %2433 = vmatpush.bf16.msrb.mxu0 %v4591_v28  ;;  %2069 = vmatpush.bf16.msra.mxu1 %v4572_v26 }
 0x710   :  { %2095 = vmatpush.bf16.msrb.mxu3 %v4577_v34 }
 0x711   :  { %2459 = vmatpush.bf16.msrb.mxu2 %v4597_v47  ;;  %v5052_v47 = vpop.f32.mrf.mxu2 }
 0x713   :  { %2434 = vmatpush.bf16.msrb.mxu0 %v4603_v37  ;;  %2070 = vmatpush.bf16.msra.mxu1 %v4583_v49 }
 0x714   :  { %2096 = vmatpush.bf16.msrb.mxu3 %v4588_v12 }
 0x715   :  { %2460 = vmatpush.bf16.msrb.mxu2 %v5529_v57 }
 0x717   :  { %2435 = vmatpush.bf16.msrb.mxu0 %v4615_v17  ;;  %2071 = vmatpush.bf16.msra.mxu1 %v4595_v42 }
 0x718   :  { %2097 = vmatpush.bf16.msrb.mxu3 %v4600_v59 }
 0x719   :  { %2461 = vmatpush.bf16.msrb.mxu2 %v4621_v5  ;;  %v1968_v44 = vpop.f32.mrf.mxu2 }
 0x71a   :  { %v5563_v44 = vld [vmem:[#allocation34_spill] sm:$0xff] }
 0x71b   :  { %2436 = vmatpush.bf16.msrb.mxu0 %v4627_v52  ;;  %2072 = vmatpush.bf16.msra.mxu1 %v4607_v46 }
 0x71c   :  { %2098 = vmatpush.bf16.msrb.mxu3 %v4612_v40 }
 0x71d   :  { %2462 = vmatpush.bf16.msrb.mxu2 %v4633_v61 }
 0x71e   :  { %2004 = vmatmul.bf16.vlgmr.msrb.gmra.mxu1 %v1930_v54  ;;  %2030 = vmatmul.bf16.vlgmr.msra.gmra.mxu3 %v1930_v54 }
 0x71f   :  { %2437 = vmatpush.bf16.msrb.mxu0 %v4639_v50  ;;  %2073 = vmatpush.bf16.msra.mxu1 %v4619_v27 }
 0x720   :  { %2099 = vmatpush.bf16.msrb.mxu3 %v4624_v3 }
 0x721   :  { %2463 = vmatpush.bf16.msrb.mxu2 %v4645_v6 }
 0x723   :  { %2438 = vmatpush.bf16.msrb.mxu0 %v4651_v18  ;;  %2074 = vmatpush.bf16.msra.mxu1 %v4631_v56 }
 0x724   :  { %2100 = vmatpush.bf16.msrb.mxu3 %v4636_v15 }
 0x725   :  { %2464 = vmatpush.bf16.msrb.mxu2 %v4657_v33 }
 0x726   :  { %2439 = vmatmul.bf16.vlgmr.msrb.gmra.mxu0 %v5549_v14 }
 0x727   :  { %2483 = vmatpush.bf16.msra.mxu0 %v4662_v4  ;;  %2075 = vmatpush.bf16.msra.mxu1 %v4643_v2 }
 0x728   :  { %2465 = vmatmul.bf16.vlgmr.msrb.gmra.mxu2 %v5549_v14  ;;  %2101 = vmatpush.bf16.msrb.mxu3 %v4648_v30 }
 0x729   :  { %2509 = vmatpush.bf16.msra.mxu2 %v4666_v8 }
 0x72b   :  { %2484 = vmatpush.bf16.msra.mxu0 %v4675_v51  ;;  %2076 = vmatpush.bf16.msra.mxu1 %v5550_v63 }
 0x72c   :  { %2102 = vmatpush.bf16.msrb.mxu3 %v5551_v58 }
 0x72d   :  { %2510 = vmatpush.bf16.msra.mxu2 %v4681_v32 }
 0x72f   :  { %2485 = vmatpush.bf16.msra.mxu0 %v5511_v31  ;;  %2121 = vmatpush.bf16.msrb.mxu1 %v5552_v45 }
 0x730   :  { %2147 = vmatpush.bf16.msra.mxu3 %v5553_v7 }
 0x731   :  { %2511 = vmatpush.bf16.msra.mxu2 %v4697_v41 }
 0x733   :  { %2486 = vmatpush.bf16.msra.mxu0 %v5515_v22  ;;  %2122 = vmatpush.bf16.msrb.mxu1 %v5554_v62 }
 0x734   :  { %2148 = vmatpush.bf16.msra.mxu3 %v5555_v43 }
 0x735   :  { %2512 = vmatpush.bf16.msra.mxu2 %v5512_v11 }
 0x737   :  { %2487 = vmatpush.bf16.msra.mxu0 %v5519_v60  ;;  %2123 = vmatpush.bf16.msrb.mxu1 %v5557_v21 }
 0x738   :  { %2149 = vmatpush.bf16.msra.mxu3 %v5558_v1 }
 0x739   :  { %2513 = vmatpush.bf16.msra.mxu2 %v5516_v53 }
 0x73b   :  { %2488 = vmatpush.bf16.msra.mxu0 %v5522_v20 }
 0x73d   :  { %2514 = vmatpush.bf16.msra.mxu2 %v4733_v23 }
 0x73f   :  { %2489 = vmatpush.bf16.msra.mxu0 %v4739_v9 }
 0x741   :  { %2515 = vmatpush.bf16.msra.mxu2 %v4745_v19 }
 0x743   :  { %2490 = vmatpush.bf16.msra.mxu0 %v4751_v16 }
 0x745   :  { %2516 = vmatpush.bf16.msra.mxu2 %v4757_v29 }
 0x746   :  { %2491 = vmatmul.bf16.vlgmr.msra.gmra.mxu0 %v5549_v14 }
 0x747   :  { %2556 = vmatpush.bf16.msrb.mxu0 %v4570_v55  ;;  %v5559_v55 = vld [vmem:[#allocation27_spill] sm:$0xff] }
 0x748   :  { %2517 = vmatmul.bf16.vlgmr.msra.gmra.mxu2 %v5549_v14  ;;  %2124 = vmatpush.bf16.msrb.mxu1 %v5559_v55 }
 0x749   :  { %2582 = vmatpush.bf16.msrb.mxu2 %v4574_v25  ;;  %v5556_v25 = vld [vmem:[#allocation14_spill] sm:$0xff] }
 0x74b   :  { %2557 = vmatpush.bf16.msrb.mxu0 %v4581_v48  ;;  %v5562_v48 = vld [vmem:[#allocation32_spill] sm:$0xff] }
 0x74c   :  { %2125 = vmatpush.bf16.msrb.mxu1 %v5561_v13 }
 0x74d   :  { %2583 = vmatpush.bf16.msrb.mxu2 %v4586_v0  ;;  %v5560_v0 = vld [vmem:[#allocation25_spill] sm:$0xff] }
 0x74e   :  { %2150 = vmatpush.bf16.msra.mxu3 %v5560_v0 }
 0x74f   :  { %2558 = vmatpush.bf16.msrb.mxu0 %v4591_v28  ;;  %v5564_v28 = vld [vmem:[#allocation35_spill] sm:$0xff] }
 0x750   :  { %2126 = vmatpush.bf16.msrb.mxu1 %v5563_v44 }
 0x751   :  { %2584 = vmatpush.bf16.msrb.mxu2 %v5556_v25 }
 0x752   :  { %2151 = vmatpush.bf16.msra.mxu3 %v5562_v48 }
 0x753   :  { %2559 = vmatpush.bf16.msrb.mxu0 %v4603_v37  ;;  %v5566_v37 = vld [vmem:[#allocation37_spill] sm:$0xff] }
 0x755   :  { %2585 = vmatpush.bf16.msrb.mxu2 %v5529_v57  ;;  %v5565_v57 = vld [vmem:[#allocation36_spill] sm:$0xff] }
 0x756   :  { %2152 = vmatpush.bf16.msra.mxu3 %v5564_v28  ;;  %2127 = vmatpush.bf16.msrb.mxu1 %v5565_v57 }
 0x757   :  { %2560 = vmatpush.bf16.msrb.mxu0 %v4615_v17  ;;  %v5567_v17 = vld [vmem:[#allocation38_spill] sm:$0xff] }
 0x759   :  { %2586 = vmatpush.bf16.msrb.mxu2 %v4621_v5  ;;  %v5568_v5 = vld [vmem:[#allocation39_spill] sm:$0xff] }
 0x75a   :  { %2153 = vmatpush.bf16.msra.mxu3 %v5566_v37  ;;  %2128 = vmatpush.bf16.msrb.mxu1 %v5567_v17 }
 0x75b   :  { %2561 = vmatpush.bf16.msrb.mxu0 %v4627_v52  ;;  %v1992_v52 = vpop.f32.mrf.mxu0 }
 0x75d   :  { %2587 = vmatpush.bf16.msrb.mxu2 %v4633_v61  ;;  %v2018_v61 = vpop.f32.mrf.mxu2 }
 0x75e   :  { %2154 = vmatpush.bf16.msra.mxu3 %v5568_v5  ;;  %v2019_v39 = vadd.f32 %v2018_v61, %v4893_v38 }
 0x75f   :  { %2562 = vmatpush.bf16.msrb.mxu0 %v4639_v50 }
 0x761   :  { %2588 = vmatpush.bf16.msrb.mxu2 %v4645_v6 }
 0x763   :  { %2563 = vmatpush.bf16.msrb.mxu0 %v4651_v18  ;;  %v1994_v50 = vpop.f32.mrf.mxu0  ;;  %v5569_v18 = vld [vmem:[#allocation24_spill] sm:$0xff] }
 0x765   :  { %2589 = vmatpush.bf16.msrb.mxu2 %v4657_v33  ;;  %v2020_v6 = vpop.f32.mrf.mxu2  ;;  %v1941_v33 = vadd.f32 %v5050_v36, %v5569_v18 }
 0x767   :  { %2608 = vmatpush.bf16.msra.mxu0 %v4662_v4 }
 0x769   :  { %2634 = vmatpush.bf16.msra.mxu2 %v4666_v8 }
 0x76b   :  { %2609 = vmatpush.bf16.msra.mxu0 %v4675_v51  ;;  %v5570_v51 = vld [vmem:[#allocation21_spill] sm:$0xff] }
 0x76d   :  { %2635 = vmatpush.bf16.msra.mxu2 %v4681_v32  ;;  %v1967_v32 = vadd.f32 %v5052_v47, %v5570_v51 }
 0x76f   :  { %2610 = vmatpush.bf16.msra.mxu0 %v5511_v31 }
 0x771   :  { %2636 = vmatpush.bf16.msra.mxu2 %v4697_v41 }
 0x773   :  { %2611 = vmatpush.bf16.msra.mxu0 %v5515_v22 }
 0x775   :  { %2637 = vmatpush.bf16.msra.mxu2 %v5512_v11 }
 0x777   :  { %2612 = vmatpush.bf16.msra.mxu0 %v5519_v60 }
 0x779   :  { %2638 = vmatpush.bf16.msra.mxu2 %v5516_v53 }
 0x77b   :  { %2613 = vmatpush.bf16.msra.mxu0 %v5522_v20 }
 0x77d   :  { %2639 = vmatpush.bf16.msra.mxu2 %v4733_v23 }
 0x77f   :  { %2614 = vmatpush.bf16.msra.mxu0 %v4739_v9 }
 0x781   :  { %2640 = vmatpush.bf16.msra.mxu2 %v4745_v19 }
 0x783   :  { %2615 = vmatpush.bf16.msra.mxu0 %v4751_v16  ;;  %v5571_v16 = vld [vmem:[#allocation10_spill] sm:$0xff] }
 0x785   :  { %2641 = vmatpush.bf16.msra.mxu2 %v4757_v29  ;;  %v1993_v29 = vadd.f32 %v1992_v52, %v5571_v16 }
 0x78b   :  { %v1953_v4 = vpop.f32.mrf.mxu1 }
 0x78c   :  { %v1954_v8 = vadd.f32 %v1953_v4, %v1941_v33  ;;  %v2065_v4 = vpop.f32.mrf.mxu0 }
 0x78e   :  { %v2035_v41 = vmul.f32 0.5, %v1954_v8  ;;  %v2091_v8 = vpop.f32.mrf.mxu2 }
 0x790   :  { %3483 = vtanh.f32 %v2035_v41 }
 0x791   :  { %v1979_v23 = vpop.f32.mrf.mxu3 }
 0x792   :  { %v1980_v19 = vadd.f32 %v1979_v23, %v1967_v32 }
 0x793   :  { %v1955_v9 = vpop.f32.mrf.mxu1 }
 0x794   :  { %v2039_v20 = vmul.f32 0.5, %v1980_v19  ;;  %v2067_v19 = vpop.f32.mrf.mxu0 }
 0x796   :  { %3485 = vtanh.f32 %v2039_v20  ;;  %v3484_v11 = vpop.eup %3483  ;;  %v2093_v9 = vpop.f32.mrf.mxu2 }
 0x797   :  { %v2037_v24 = vmul.f32 0.5, %v3484_v11 }
 0x799   :  { %v1981_v31 = vpop.f32.mrf.mxu3  ;;  %v2038_v14 = vadd.f32 0.5, %v2037_v24 }
 0x79b   :  { %v2005_v22 = vpop.f32.mrf.mxu1 }
 0x79c   :  { %v3486_v53 = vpop.eup %3485  ;;  %v2006_v60 = vadd.f32 %v2005_v22, %v1993_v29 }
 0x79d   :  { %v2041_v36 = vmul.f32 0.5, %v3486_v53 }
 0x79e   :  { %3487 = vtanh.f32 %v2006_v60  ;;  %v2143_v22 = vpop.f32.mrf.mxu2 }
 0x79f   :  { %v2042_v47 = vadd.f32 0.5, %v2041_v36  ;;  %v2066_v36 = vadd.f32 %v2065_v4, %v5569_v18  ;;  %v2144_v4 = vadd.f32 %v2143_v22, %v4893_v38 }
 0x7a1   :  { %v2031_v35 = vpop.f32.mrf.mxu3  ;;  %v2048_v33 = vmul.f32 %v2042_v47, %v5056_v10  ;;  %v2117_v10 = vpop.f32.mrf.mxu0  ;;  %v2092_v47 = vadd.f32 %v2091_v8, %v5570_v51 }
 0x7a2   :  { %v2032_v54 = vadd.f32 %v2031_v35, %v2019_v39 }
 0x7a3   :  { %v2007_v25 = vpop.f32.mrf.mxu1 }
 0x7a4   :  { %v3488_v50 = vpop.eup %3487  ;;  %v2044_v6 = vmul.f32 0.5, %v2032_v54 }
 0x7a5   :  { %v2049_v52 = vmul.f32 %v3488_v50, %v2038_v14 }
 0x7a6   :  { %3489 = vtanh.f32 %v2044_v6  ;;  %v2145_v60 = vpop.f32.mrf.mxu2  ;;  %v2118_v6 = vadd.f32 %v2117_v10, %v5571_v16 }
 0x7a7   :  { %v5157_v32 = vadd.f32 %v2049_v52, %v2048_v33 }
 0x7a9   :  { %3491 = vtanh.f32 %v5157_v32  ;;  %v2033_v61 = vpop.f32.mrf.mxu3  ;;  %v2119_v53 = vpop.f32.mrf.mxu0 }
 0x7ac   :  { %v3490_v41 = vpop.eup %3489 }
 0x7ad   :  { %v2046_v23 = vmul.f32 0.5, %v3490_v41 }
 0x7af   :  { %v3492_v20 = vpop.eup %3491  ;;  %v2047_v29 = vadd.f32 0.5, %v2046_v23 }
 0x7b1   :  { %v2052_v31 = vmul.f32 %v3492_v20, %v2047_v29 }
 0x7b3   :  { %v2055_v11 = vpack.c.bf16 %v2052_v31, %v2052_v31 }
 0x7b5   :  { %2077 = vmatmul.bf16.vlgmr.msra.gmra.mxu1 %v2055_v11  ;;  %2103 = vmatmul.bf16.vlgmr.msrb.gmra.mxu3 %v2055_v11 }
 0x7b6   :  { %2194 = vmatpush.bf16.msra.mxu1 %v4572_v26  ;;  %2220 = vmatpush.bf16.msrb.mxu3 %v4577_v34 }
 0x7ba   :  { %2195 = vmatpush.bf16.msra.mxu1 %v4583_v49  ;;  %2221 = vmatpush.bf16.msrb.mxu3 %v4588_v12 }
 0x7be   :  { %2196 = vmatpush.bf16.msra.mxu1 %v4595_v42  ;;  %2222 = vmatpush.bf16.msrb.mxu3 %v4600_v59 }
 0x7c2   :  { %2197 = vmatpush.bf16.msra.mxu1 %v4607_v46  ;;  %2223 = vmatpush.bf16.msrb.mxu3 %v4612_v40 }
 0x7c5   :  { %2129 = vmatmul.bf16.vlgmr.msrb.gmra.mxu1 %v2055_v11  ;;  %2155 = vmatmul.bf16.vlgmr.msra.gmra.mxu3 %v2055_v11 }
 0x7c6   :  { %2198 = vmatpush.bf16.msra.mxu1 %v4619_v27  ;;  %2224 = vmatpush.bf16.msrb.mxu3 %v4624_v3 }
 0x7ca   :  { %2199 = vmatpush.bf16.msra.mxu1 %v4631_v56  ;;  %2225 = vmatpush.bf16.msrb.mxu3 %v4636_v15 }
 0x7ce   :  { %2200 = vmatpush.bf16.msra.mxu1 %v4643_v2  ;;  %2226 = vmatpush.bf16.msrb.mxu3 %v4648_v30 }
 0x7d2   :  { %2201 = vmatpush.bf16.msra.mxu1 %v5550_v63  ;;  %2227 = vmatpush.bf16.msrb.mxu3 %v5551_v58 }
 0x7d6   :  { %2246 = vmatpush.bf16.msrb.mxu1 %v5552_v45  ;;  %2272 = vmatpush.bf16.msra.mxu3 %v5553_v7 }
 0x7da   :  { %2247 = vmatpush.bf16.msrb.mxu1 %v5554_v62  ;;  %2273 = vmatpush.bf16.msra.mxu3 %v5555_v43 }
 0x7de   :  { %2248 = vmatpush.bf16.msrb.mxu1 %v5557_v21  ;;  %2274 = vmatpush.bf16.msra.mxu3 %v5558_v1 }
 0x7e2   :  { %2249 = vmatpush.bf16.msrb.mxu1 %v5559_v55  ;;  %2275 = vmatpush.bf16.msra.mxu3 %v5560_v0 }
 0x7e6   :  { %2250 = vmatpush.bf16.msrb.mxu1 %v5561_v13  ;;  %2276 = vmatpush.bf16.msra.mxu3 %v5562_v48 }
 0x7ea   :  { %2251 = vmatpush.bf16.msrb.mxu1 %v5563_v44  ;;  %2277 = vmatpush.bf16.msra.mxu3 %v5564_v28 }
 0x7ee   :  { %2252 = vmatpush.bf16.msrb.mxu1 %v5565_v57  ;;  %2278 = vmatpush.bf16.msra.mxu3 %v5566_v37 }
 0x7f2   :  { %2253 = vmatpush.bf16.msrb.mxu1 %v5567_v17  ;;  %2279 = vmatpush.bf16.msra.mxu3 %v5568_v5 }
 0x832   :  { %v2078_v39 = vpop.f32.mrf.mxu1 }
 0x833   :  { %v2079_v24 = vadd.f32 %v2078_v39, %v2066_v36  ;;  %v2190_v39 = vpop.f32.mrf.mxu0 }
 0x835   :  { %v2160_v35 = vmul.f32 0.5, %v2079_v24  ;;  %v2216_v24 = vpop.f32.mrf.mxu2 }
 0x837   :  { %3493 = vtanh.f32 %v2160_v35 }
 0x838   :  { %v2104_v54 = vpop.f32.mrf.mxu3 }
 0x839   :  { %v2105_v14 = vadd.f32 %v2104_v54, %v2092_v47 }
 0x83a   :  { %v2080_v25 = vpop.f32.mrf.mxu1 }
 0x83b   :  { %v2164_v50 = vmul.f32 0.5, %v2105_v14  ;;  %v2192_v14 = vpop.f32.mrf.mxu0 }
 0x83d   :  { %3495 = vtanh.f32 %v2164_v50  ;;  %v3494_v52 = vpop.eup %3493  ;;  %v2218_v25 = vpop.f32.mrf.mxu2 }
 0x83e   :  { %v2162_v9 = vmul.f32 0.5, %v3494_v52 }
 0x840   :  { %v2106_v33 = vpop.f32.mrf.mxu3  ;;  %v2163_v31 = vadd.f32 0.5, %v2162_v9 }
 0x842   :  { %v2130_v61 = vpop.f32.mrf.mxu1 }
 0x843   :  { %v3496_v41 = vpop.eup %3495  ;;  %v2131_v23 = vadd.f32 %v2130_v61, %v2118_v6 }
 0x844   :  { %v2166_v19 = vmul.f32 0.5, %v3496_v41 }
 0x845   :  { %3497 = vtanh.f32 %v2131_v23  ;;  %v2268_v61 = vpop.f32.mrf.mxu2 }
 0x846   :  { %v2167_v8 = vadd.f32 0.5, %v2166_v19  ;;  %v2191_v19 = vadd.f32 %v2190_v39, %v5569_v18  ;;  %v2269_v39 = vadd.f32 %v2268_v61, %v4893_v38 }
 0x848   :  { %v2156_v20 = vpop.f32.mrf.mxu3  ;;  %v2173_v36 = vmul.f32 %v2167_v8, %v5157_v32  ;;  %v2242_v32 = vpop.f32.mrf.mxu0  ;;  %v2217_v8 = vadd.f32 %v2216_v24, %v5570_v51 }
 0x849   :  { %v2157_v29 = vadd.f32 %v2156_v20, %v2144_v4 }
 0x84a   :  { %v2132_v11 = vpop.f32.mrf.mxu1 }
 0x84b   :  { %v3498_v53 = vpop.eup %3497  ;;  %v2169_v60 = vmul.f32 0.5, %v2157_v29 }
 0x84c   :  { %v2174_v10 = vmul.f32 %v3498_v53, %v2163_v31 }
 0x84d   :  { %3499 = vtanh.f32 %v2169_v60  ;;  %v2270_v23 = vpop.f32.mrf.mxu2  ;;  %v2243_v60 = vadd.f32 %v2242_v32, %v5571_v16 }
 0x84e   :  { %v5197_v47 = vadd.f32 %v2174_v10, %v2173_v36 }
 0x850   :  { %3501 = vtanh.f32 %v5197_v47  ;;  %v2158_v22 = vpop.f32.mrf.mxu3  ;;  %v2244_v41 = vpop.f32.mrf.mxu0 }
 0x853   :  { %v3500_v35 = vpop.eup %3499 }
 0x854   :  { %v2171_v54 = vmul.f32 0.5, %v3500_v35 }
 0x856   :  { %v3502_v50 = vpop.eup %3501  ;;  %v2172_v6 = vadd.f32 0.5, %v2171_v54 }
 0x858   :  { %v2177_v33 = vmul.f32 %v3502_v50, %v2172_v6 }
 0x85a   :  { %v2180_v52 = vpack.c.bf16 %v2177_v33, %v2177_v33 }
 0x85c   :  { %2202 = vmatmul.bf16.vlgmr.msra.gmra.mxu1 %v2180_v52  ;;  %2228 = vmatmul.bf16.vlgmr.msrb.gmra.mxu3 %v2180_v52 }
 0x85d   :  { %2319 = vmatpush.bf16.msra.mxu1 %v4572_v26  ;;  %2345 = vmatpush.bf16.msrb.mxu3 %v4577_v34 }
 0x861   :  { %2320 = vmatpush.bf16.msra.mxu1 %v4583_v49  ;;  %2346 = vmatpush.bf16.msrb.mxu3 %v4588_v12 }
 0x865   :  { %2321 = vmatpush.bf16.msra.mxu1 %v4595_v42  ;;  %2347 = vmatpush.bf16.msrb.mxu3 %v4600_v59 }
 0x869   :  { %2322 = vmatpush.bf16.msra.mxu1 %v4607_v46  ;;  %2348 = vmatpush.bf16.msrb.mxu3 %v4612_v40 }
 0x86c   :  { %2254 = vmatmul.bf16.vlgmr.msrb.gmra.mxu1 %v2180_v52  ;;  %2280 = vmatmul.bf16.vlgmr.msra.gmra.mxu3 %v2180_v52 }
 0x86d   :  { %2323 = vmatpush.bf16.msra.mxu1 %v4619_v27  ;;  %2349 = vmatpush.bf16.msrb.mxu3 %v4624_v3 }
 0x871   :  { %2324 = vmatpush.bf16.msra.mxu1 %v4631_v56  ;;  %2350 = vmatpush.bf16.msrb.mxu3 %v4636_v15 }
 0x875   :  { %2325 = vmatpush.bf16.msra.mxu1 %v4643_v2  ;;  %2351 = vmatpush.bf16.msrb.mxu3 %v4648_v30 }
 0x879   :  { %2326 = vmatpush.bf16.msra.mxu1 %v5550_v63  ;;  %2352 = vmatpush.bf16.msrb.mxu3 %v5551_v58 }
 0x87d   :  { %2371 = vmatpush.bf16.msrb.mxu1 %v5552_v45  ;;  %2397 = vmatpush.bf16.msra.mxu3 %v5553_v7 }
 0x881   :  { %2372 = vmatpush.bf16.msrb.mxu1 %v5554_v62  ;;  %2398 = vmatpush.bf16.msra.mxu3 %v5555_v43 }
 0x885   :  { %2373 = vmatpush.bf16.msrb.mxu1 %v5557_v21  ;;  %2399 = vmatpush.bf16.msra.mxu3 %v5558_v1 }
 0x889   :  { %2374 = vmatpush.bf16.msrb.mxu1 %v5559_v55  ;;  %2400 = vmatpush.bf16.msra.mxu3 %v5560_v0 }
 0x88d   :  { %2375 = vmatpush.bf16.msrb.mxu1 %v5561_v13  ;;  %2401 = vmatpush.bf16.msra.mxu3 %v5562_v48 }
 0x891   :  { %2376 = vmatpush.bf16.msrb.mxu1 %v5563_v44  ;;  %2402 = vmatpush.bf16.msra.mxu3 %v5564_v28 }
 0x895   :  { %2377 = vmatpush.bf16.msrb.mxu1 %v5565_v57  ;;  %2403 = vmatpush.bf16.msra.mxu3 %v5566_v37 }
 0x899   :  { %2378 = vmatpush.bf16.msrb.mxu1 %v5567_v17  ;;  %2404 = vmatpush.bf16.msra.mxu3 %v5568_v5 }
 0x8d9   :  { %v2203_v4 = vpop.f32.mrf.mxu1 }
 0x8da   :  { %v2204_v9 = vadd.f32 %v2203_v4, %v2191_v19  ;;  %v2315_v4 = vpop.f32.mrf.mxu0 }
 0x8dc   :  { %v2285_v20 = vmul.f32 0.5, %v2204_v9  ;;  %v2341_v9 = vpop.f32.mrf.mxu2 }
 0x8de   :  { %3503 = vtanh.f32 %v2285_v20 }
 0x8df   :  { %v2229_v29 = vpop.f32.mrf.mxu3 }
 0x8e0   :  { %v2230_v31 = vadd.f32 %v2229_v29, %v2217_v8 }
 0x8e1   :  { %v2205_v11 = vpop.f32.mrf.mxu1 }
 0x8e2   :  { %v2289_v53 = vmul.f32 0.5, %v2230_v31  ;;  %v2317_v31 = vpop.f32.mrf.mxu0 }
 0x8e4   :  { %3505 = vtanh.f32 %v2289_v53  ;;  %v3504_v10 = vpop.eup %3503  ;;  %v2343_v11 = vpop.f32.mrf.mxu2 }
 0x8e5   :  { %v2287_v25 = vmul.f32 0.5, %v3504_v10 }
 0x8e7   :  { %v2231_v36 = vpop.f32.mrf.mxu3  ;;  %v2288_v33 = vadd.f32 0.5, %v2287_v25 }
 0x8e9   :  { %v2255_v22 = vpop.f32.mrf.mxu1 }
 0x8ea   :  { %v3506_v35 = vpop.eup %3505  ;;  %v2256_v54 = vadd.f32 %v2255_v22, %v2243_v60 }
 0x8eb   :  { %v2291_v14 = vmul.f32 0.5, %v3506_v35 }
 0x8ec   :  { %3507 = vtanh.f32 %v2256_v54  ;;  %v2393_v22 = vpop.f32.mrf.mxu2 }
 0x8ed   :  { %v2292_v24 = vadd.f32 0.5, %v2291_v14  ;;  %v2316_v14 = vadd.f32 %v2315_v4, %v5569_v18  ;;  %v2394_v4 = vadd.f32 %v2393_v22, %v4893_v38 }
 0x8ef   :  { %v2281_v50 = vpop.f32.mrf.mxu3  ;;  %v2298_v19 = vmul.f32 %v2292_v24, %v5197_v47  ;;  %v2367_v47 = vpop.f32.mrf.mxu0  ;;  %v2342_v24 = vadd.f32 %v2341_v9, %v5570_v51 }
 0x8f0   :  { %v2282_v6 = vadd.f32 %v2281_v50, %v2269_v39 }
 0x8f1   :  { %v2257_v52 = vpop.f32.mrf.mxu1 }
 0x8f2   :  { %v3508_v41 = vpop.eup %3507  ;;  %v2294_v23 = vmul.f32 0.5, %v2282_v6 }
 0x8f3   :  { %v2299_v32 = vmul.f32 %v3508_v41, %v2288_v33 }
 0x8f4   :  { %3509 = vtanh.f32 %v2294_v23  ;;  %v2395_v54 = vpop.f32.mrf.mxu2  ;;  %v2368_v23 = vadd.f32 %v2367_v47, %v5571_v16 }
 0x8f5   :  { %v5237_v8 = vadd.f32 %v2299_v32, %v2298_v19 }
 0x8f7   :  { %3511 = vtanh.f32 %v5237_v8  ;;  %v2283_v61 = vpop.f32.mrf.mxu3  ;;  %v2369_v35 = vpop.f32.mrf.mxu0 }
 0x8fa   :  { %v3510_v20 = vpop.eup %3509 }
 0x8fb   :  { %v2296_v29 = vmul.f32 0.5, %v3510_v20 }
 0x8fd   :  { %v3512_v53 = vpop.eup %3511  ;;  %v2297_v60 = vadd.f32 0.5, %v2296_v29 }
 0x8ff   :  { %v2302_v36 = vmul.f32 %v3512_v53, %v2297_v60 }
 0x901   :  { %v2305_v10 = vpack.c.bf16 %v2302_v36, %v2302_v36 }
 0x903   :  { %2327 = vmatmul.bf16.vlgmr.msra.gmra.mxu1 %v2305_v10  ;;  %2353 = vmatmul.bf16.vlgmr.msrb.gmra.mxu3 %v2305_v10 }
 0x904   :  { %2444 = vmatpush.bf16.msra.mxu1 %v4572_v26  ;;  %2470 = vmatpush.bf16.msrb.mxu3 %v4577_v34 }
 0x908   :  { %2445 = vmatpush.bf16.msra.mxu1 %v4583_v49  ;;  %2471 = vmatpush.bf16.msrb.mxu3 %v4588_v12 }
 0x90c   :  { %2446 = vmatpush.bf16.msra.mxu1 %v4595_v42  ;;  %2472 = vmatpush.bf16.msrb.mxu3 %v4600_v59 }
 0x910   :  { %2447 = vmatpush.bf16.msra.mxu1 %v4607_v46  ;;  %2473 = vmatpush.bf16.msrb.mxu3 %v4612_v40 }
 0x913   :  { %2379 = vmatmul.bf16.vlgmr.msrb.gmra.mxu1 %v2305_v10  ;;  %2405 = vmatmul.bf16.vlgmr.msra.gmra.mxu3 %v2305_v10 }
 0x914   :  { %2448 = vmatpush.bf16.msra.mxu1 %v4619_v27  ;;  %2474 = vmatpush.bf16.msrb.mxu3 %v4624_v3 }
 0x918   :  { %2449 = vmatpush.bf16.msra.mxu1 %v4631_v56  ;;  %2475 = vmatpush.bf16.msrb.mxu3 %v4636_v15 }
 0x91c   :  { %2450 = vmatpush.bf16.msra.mxu1 %v4643_v2  ;;  %2476 = vmatpush.bf16.msrb.mxu3 %v4648_v30 }
 0x920   :  { %2451 = vmatpush.bf16.msra.mxu1 %v5550_v63  ;;  %2477 = vmatpush.bf16.msrb.mxu3 %v5551_v58 }
 0x924   :  { %2496 = vmatpush.bf16.msrb.mxu1 %v5552_v45  ;;  %2522 = vmatpush.bf16.msra.mxu3 %v5553_v7 }
 0x928   :  { %2497 = vmatpush.bf16.msrb.mxu1 %v5554_v62  ;;  %2523 = vmatpush.bf16.msra.mxu3 %v5555_v43 }
 0x92c   :  { %2498 = vmatpush.bf16.msrb.mxu1 %v5557_v21  ;;  %2524 = vmatpush.bf16.msra.mxu3 %v5558_v1 }
 0x930   :  { %2499 = vmatpush.bf16.msrb.mxu1 %v5559_v55  ;;  %2525 = vmatpush.bf16.msra.mxu3 %v5560_v0 }
 0x934   :  { %2500 = vmatpush.bf16.msrb.mxu1 %v5561_v13  ;;  %2526 = vmatpush.bf16.msra.mxu3 %v5562_v48 }
 0x938   :  { %2501 = vmatpush.bf16.msrb.mxu1 %v5563_v44  ;;  %2527 = vmatpush.bf16.msra.mxu3 %v5564_v28 }
 0x93c   :  { %2502 = vmatpush.bf16.msrb.mxu1 %v5565_v57  ;;  %2528 = vmatpush.bf16.msra.mxu3 %v5566_v37 }
 0x940   :  { %2503 = vmatpush.bf16.msrb.mxu1 %v5567_v17  ;;  %2529 = vmatpush.bf16.msra.mxu3 %v5568_v5 }
 0x980   :  { %v2328_v39 = vpop.f32.mrf.mxu1 }
 0x981   :  { %v2329_v25 = vadd.f32 %v2328_v39, %v2316_v14  ;;  %v2440_v39 = vpop.f32.mrf.mxu0 }
 0x983   :  { %v2410_v50 = vmul.f32 0.5, %v2329_v25  ;;  %v2466_v25 = vpop.f32.mrf.mxu2 }
 0x985   :  { %3513 = vtanh.f32 %v2410_v50 }
 0x986   :  { %v2354_v6 = vpop.f32.mrf.mxu3 }
 0x987   :  { %v2355_v33 = vadd.f32 %v2354_v6, %v2342_v24 }
 0x988   :  { %v2330_v52 = vpop.f32.mrf.mxu1 }
 0x989   :  { %v2414_v41 = vmul.f32 0.5, %v2355_v33  ;;  %v2442_v33 = vpop.f32.mrf.mxu0 }
 0x98b   :  { %3515 = vtanh.f32 %v2414_v41  ;;  %v3514_v32 = vpop.eup %3513  ;;  %v2468_v52 = vpop.f32.mrf.mxu2 }
 0x98c   :  { %v2412_v11 = vmul.f32 0.5, %v3514_v32  ;;  %v3373_v52 = vld [vmem:[%s5363_s6 + $0x10] sm:$0xff] }
 0x98e   :  { %v2356_v19 = vpop.f32.mrf.mxu3  ;;  %v2413_v36 = vadd.f32 0.5, %v2412_v11 }
 0x990   :  { %v2380_v61 = vpop.f32.mrf.mxu1 }
 0x991   :  { %v3516_v20 = vpop.eup %3515  ;;  %v2381_v29 = vadd.f32 %v2380_v61, %v2368_v23 }
 0x992   :  { %v2416_v31 = vmul.f32 0.5, %v3516_v20 }
 0x993   :  { %3517 = vtanh.f32 %v2381_v29 }
 0x994   :  { %v2417_v9 = vadd.f32 0.5, %v2416_v31 }
 0x996   :  { %v2406_v53 = vpop.f32.mrf.mxu3  ;;  %v2423_v14 = vmul.f32 %v2417_v9, %v5237_v8 }
 0x997   :  { %v2407_v60 = vadd.f32 %v2406_v53, %v2394_v4 }
 0x998   :  { %v2382_v10 = vpop.f32.mrf.mxu1 }
 0x999   :  { %v3518_v35 = vpop.eup %3517  ;;  %v2419_v54 = vmul.f32 0.5, %v2407_v60 }
 0x99a   :  { %v2424_v47 = vmul.f32 %v3518_v35, %v2413_v36 }
 0x99b   :  { %3519 = vtanh.f32 %v2419_v54 }
 0x99c   :  { %v5277_v24 = vadd.f32 %v2424_v47, %v2423_v14  ;;  %v3378_v14 = vld [vmem:[%s5363_s6 + $0x38] sm:$0xff] }
 0x99e   :  { %3521 = vtanh.f32 %v5277_v24  ;;  %v2408_v22 = vpop.f32.mrf.mxu3 }
 0x9a1   :  { %v3520_v50 = vpop.eup %3519 }
 0x9a2   :  { %v2421_v6 = vmul.f32 0.5, %v3520_v50  ;;  %v3375_v50 = vld [vmem:[%s5363_s6 + $0x20] sm:$0xff] }
 0x9a4   :  { %v3522_v41 = vpop.eup %3521  ;;  %v2422_v23 = vadd.f32 0.5, %v2421_v6  ;;  %v3374_v6 = vld [vmem:[%s5363_s6 + $0x18] sm:$0xff] }
 0x9a6   :  { %v2427_v19 = vmul.f32 %v3522_v41, %v2422_v23 }
 0x9a8   :  { %v2430_v32 = vpack.c.bf16 %v2427_v19, %v2427_v19  ;;  %v3372_v19 = vld [vmem:[%s5363_s6 + $0x8] sm:$0xff] }
 0x9aa   :  { %2452 = vmatmul.bf16.vlgmr.msra.gmra.mxu1 %v2430_v32  ;;  %2478 = vmatmul.bf16.vlgmr.msrb.gmra.mxu3 %v2430_v32 }
 0x9ab   :  { %2569 = vmatpush.bf16.msra.mxu1 %v4572_v26  ;;  %2595 = vmatpush.bf16.msrb.mxu3 %v4577_v34  ;;  %v2492_v26 = vpop.f32.mrf.mxu0  ;;  %v2518_v34 = vpop.f32.mrf.mxu2 }
 0x9af   :  { %2570 = vmatpush.bf16.msra.mxu1 %v4583_v49  ;;  %2596 = vmatpush.bf16.msrb.mxu3 %v4588_v12 }
 0x9b3   :  { %2571 = vmatpush.bf16.msra.mxu1 %v4595_v42  ;;  %2597 = vmatpush.bf16.msrb.mxu3 %v4600_v59  ;;  %v2494_v49 = vpop.f32.mrf.mxu0  ;;  %v2520_v12 = vpop.f32.mrf.mxu2  ;;  %v2441_v42 = vadd.f32 %v2440_v39, %v5569_v18  ;;  %v5572_v59 = vld [vmem:[#allocation20_spill] sm:$0xff]  ;;  %v3377_v39 = vld [vmem:[%s5363_s6 + $0x30] sm:$0xff] }
 0x9b7   :  { %2572 = vmatpush.bf16.msra.mxu1 %v4607_v46  ;;  %2598 = vmatpush.bf16.msrb.mxu3 %v4612_v40  ;;  %v2554_v46 = vpack.c.bf16 %v5572_v59, %v5572_v59 }
 0x9b9   :  { %2590 = vmatmul.bf16.vlgmr.msrb.gmra.mxu2 %v2554_v46  ;;  %2564 = vmatmul.bf16.vlgmr.msrb.gmra.mxu0 %v2554_v46 }
 0x9ba   :  { %2504 = vmatmul.bf16.vlgmr.msrb.gmra.mxu1 %v2430_v32  ;;  %2530 = vmatmul.bf16.vlgmr.msra.gmra.mxu3 %v2430_v32 }
 0x9bb   :  { %2573 = vmatpush.bf16.msra.mxu1 %v4619_v27  ;;  %2599 = vmatpush.bf16.msrb.mxu3 %v4624_v3  ;;  %v2467_v3 = vadd.f32 %v2466_v25, %v5570_v51 }
 0x9bc   :  { %2747 = vmatpush.bf16.msrb.mxu0 %v3378_v14 }
 0x9bf   :  { %2574 = vmatpush.bf16.msra.mxu1 %v4631_v56  ;;  %2600 = vmatpush.bf16.msrb.mxu3 %v4636_v15 }
 0x9c0   :  { %2748 = vmatpush.bf16.msrb.mxu0 %v3377_v39 }
 0x9c3   :  { %2575 = vmatpush.bf16.msra.mxu1 %v4643_v2  ;;  %2601 = vmatpush.bf16.msrb.mxu3 %v4648_v30 }
 0x9c7   :  { %2576 = vmatpush.bf16.msra.mxu1 %v5550_v63  ;;  %2602 = vmatpush.bf16.msrb.mxu3 %v5551_v58  ;;  %v2493_v58 = vadd.f32 %v2492_v26, %v5571_v16 }
 0x9c9   :  { %2642 = vmatmul.bf16.vlgmr.msra.gmra.mxu2 %v2554_v46  ;;  %2616 = vmatmul.bf16.vlgmr.msra.gmra.mxu0 %v2554_v46 }
 0x9cb   :  { %2621 = vmatpush.bf16.msrb.mxu1 %v5552_v45  ;;  %2647 = vmatpush.bf16.msra.mxu3 %v5553_v7 }
 0x9cf   :  { %2622 = vmatpush.bf16.msrb.mxu1 %v5554_v62  ;;  %2648 = vmatpush.bf16.msra.mxu3 %v5555_v43 }
 0x9d3   :  { %2623 = vmatpush.bf16.msrb.mxu1 %v5557_v21  ;;  %2649 = vmatpush.bf16.msra.mxu3 %v5558_v1 }
 0x9d7   :  { %2624 = vmatpush.bf16.msrb.mxu1 %v5559_v55  ;;  %2650 = vmatpush.bf16.msra.mxu3 %v5560_v0  ;;  %v2519_v55 = vadd.f32 %v2518_v34, %v4893_v38 }
 0x9db   :  { %2625 = vmatpush.bf16.msrb.mxu1 %v5561_v13  ;;  %2651 = vmatpush.bf16.msra.mxu3 %v5562_v48 }
 0x9df   :  { %2626 = vmatpush.bf16.msrb.mxu1 %v5563_v44  ;;  %2652 = vmatpush.bf16.msra.mxu3 %v5564_v28 }
 0x9e3   :  { %2627 = vmatpush.bf16.msrb.mxu1 %v5565_v57  ;;  %2653 = vmatpush.bf16.msra.mxu3 %v5566_v37 }
 0x9e7   :  { %2628 = vmatpush.bf16.msrb.mxu1 %v5567_v17  ;;  %2654 = vmatpush.bf16.msra.mxu3 %v5568_v5 }
 0xa27   :  { %v2453_v40 = vpop.f32.mrf.mxu1 }
 0xa28   :  { %v2454_v27 = vadd.f32 %v2453_v40, %v2441_v42 }
 0xa2a   :  { %v2535_v56 = vmul.f32 0.5, %v2454_v27 }
 0xa2c   :  { %3523 = vtanh.f32 %v2535_v56 }
 0xa2d   :  { %v2479_v15 = vpop.f32.mrf.mxu3 }
 0xa2e   :  { %v2480_v2 = vadd.f32 %v2479_v15, %v2467_v3 }
 0xa2f   :  { %v2455_v30 = vpop.f32.mrf.mxu1 }
 0xa30   :  { %v2539_v63 = vmul.f32 0.5, %v2480_v2 }
 0xa32   :  { %3525 = vtanh.f32 %v2539_v63  ;;  %v3524_v7 = vpop.eup %3523 }
 0xa33   :  { %v2537_v0 = vmul.f32 0.5, %v3524_v7 }
 0xa35   :  { %v2481_v45 = vpop.f32.mrf.mxu3  ;;  %v2538_v28 = vadd.f32 0.5, %v2537_v0 }
 0xa36   :  { %v2565_v60 = vpop.f32.mrf.mxu0 }
 0xa37   :  { %v2505_v62 = vpop.f32.mrf.mxu1  ;;  %v2566_v33 = vadd.f32 %v2565_v60, %v5569_v18  ;;  %v3371_v18 = vld [vmem:[%s5363_s6] sm:$0xff] }
 0xa38   :  { %v3526_v43 = vpop.eup %3525  ;;  %v2506_v21 = vadd.f32 %v2505_v62, %v2493_v58 }
 0xa39   :  { %v2541_v1 = vmul.f32 0.5, %v3526_v43 }
 0xa3a   :  { %3527 = vtanh.f32 %v2506_v21 }
 0xa3b   :  { %v2542_v13 = vadd.f32 0.5, %v2541_v1 }
 0xa3c   :  { %v2591_v36 = vpop.f32.mrf.mxu2 }
 0xa3d   :  { %v2531_v48 = vpop.f32.mrf.mxu3  ;;  %v2548_v5 = vmul.f32 %v2542_v13, %v5277_v24  ;;  %v3376_v24 = vld [vmem:[%s5363_s6 + $0x28] sm:$0xff]  ;;  %v2592_v32 = vadd.f32 %v2591_v36, %v5570_v51 }
 0xa3e   :  { %v2532_v44 = vadd.f32 %v2531_v48, %v2519_v55  ;;  %v2567_v10 = vpop.f32.mrf.mxu0  ;;  %2749 = vmatpush.bf16.msrb.mxu0 %v3376_v24 }
 0xa3f   :  { %v2507_v57 = vpop.f32.mrf.mxu1 }
 0xa40   :  { %v3528_v37 = vpop.eup %3527  ;;  %v2544_v17 = vmul.f32 0.5, %v2532_v44  ;;  %v3462_v57 = vld [vmem:[%s5364_s7] ss:$0 sm:$0xff] }
 0xa41   :  { %v2549_v8 = vmul.f32 %v3528_v37, %v2538_v28 }
 0xa42   :  { %3529 = vtanh.f32 %v2544_v17  ;;  %2750 = vmatpush.bf16.msrb.mxu0 %v3375_v50 }
 0xa43   :  { %v5319_v61 = vadd.f32 %v2549_v8, %v2548_v5 }
 0xa44   :  { %v2593_v35 = vpop.f32.mrf.mxu2 }
 0xa45   :  { %3531 = vtanh.f32 %v5319_v61  ;;  %v2533_v20 = vpop.f32.mrf.mxu3 }
 0xa46   :  { %v2617_v54 = vpop.f32.mrf.mxu0  ;;  %2751 = vmatpush.bf16.msrb.mxu0 %v3374_v6 }
 0xa47   :  { %v2618_v59 = vadd.f32 %v2617_v54, %v5571_v16 }
 0xa48   :  { %v3530_v29 = vpop.eup %3529 }
 0xa49   :  { %v2546_v31 = vmul.f32 0.5, %v3530_v29 }
 0xa4a   :  { %2752 = vmatpush.bf16.msrb.mxu0 %v3373_v52 }
 0xa4b   :  { %v3532_v4 = vpop.eup %3531  ;;  %v2547_v11 = vadd.f32 0.5, %v2546_v31 }
 0xa4c   :  { %v2643_v47 = vpop.f32.mrf.mxu2 }
 0xa4d   :  { %v2552_v9 = vmul.f32 %v3532_v4, %v2547_v11  ;;  %v2644_v15 = vadd.f32 %v2643_v47, %v4893_v38 }
 0xa4e   :  { %v2619_v25 = vpop.f32.mrf.mxu0  ;;  %2753 = vmatpush.bf16.msrb.mxu0 %v3372_v19 }
 0xa4f   :  { %v2555_v53 = vpack.c.bf16 %v2552_v9, %v2552_v9 }
 0xa51   :  { %2577 = vmatmul.bf16.vlgmr.msra.gmra.mxu1 %v2555_v53  ;;  %2603 = vmatmul.bf16.vlgmr.msrb.gmra.mxu3 %v2555_v53 }
 0xa52   :  { %2754 = vmatpush.bf16.msrb.mxu0 %v3371_v18 }
 0xa54   :  { %v2645_v22 = vpop.f32.mrf.mxu2 }
 0xa61   :  { %2629 = vmatmul.bf16.vlgmr.msrb.gmra.mxu1 %v2555_v53  ;;  %2655 = vmatmul.bf16.vlgmr.msra.gmra.mxu3 %v2555_v53 }
 0xace   :  { %v2578_v41 = vpop.f32.mrf.mxu1 }
 0xacf   :  { %v2579_v23 = vadd.f32 %v2578_v41, %v2566_v33 }
 0xad1   :  { %v2660_v26 = vmul.f32 0.5, %v2579_v23 }
 0xad3   :  { %3533 = vtanh.f32 %v2660_v26 }
 0xad4   :  { %v2604_v34 = vpop.f32.mrf.mxu3 }
 0xad5   :  { %v2605_v49 = vadd.f32 %v2604_v34, %v2592_v32 }
 0xad6   :  { %v2580_v12 = vpop.f32.mrf.mxu1 }
 0xad7   :  { %v2664_v42 = vmul.f32 0.5, %v2605_v49 }
 0xad9   :  { %3535 = vtanh.f32 %v2664_v42  ;;  %v3534_v40 = vpop.eup %3533 }
 0xada   :  { %v2662_v2 = vmul.f32 0.5, %v3534_v40 }
 0xadc   :  { %v2606_v46 = vpop.f32.mrf.mxu3  ;;  %v2663_v45 = vadd.f32 0.5, %v2662_v2 }
 0xade   :  { %v2630_v27 = vpop.f32.mrf.mxu1 }
 0xadf   :  { %v3536_v3 = vpop.eup %3535  ;;  %v2631_v51 = vadd.f32 %v2630_v27, %v2618_v59 }
 0xae0   :  { %v2666_v56 = vmul.f32 0.5, %v3536_v3 }
 0xae1   :  { %3537 = vtanh.f32 %v2631_v51 }
 0xae2   :  { %v2667_v30 = vadd.f32 0.5, %v2666_v56 }
 0xae4   :  { %v2656_v63 = vpop.f32.mrf.mxu3  ;;  %v2673_v21 = vmul.f32 %v2667_v30, %v5319_v61 }
 0xae5   :  { %v2657_v58 = vadd.f32 %v2656_v63, %v2644_v15 }
 0xae6   :  { %v2632_v7 = vpop.f32.mrf.mxu1 }
 0xae7   :  { %v3538_v62 = vpop.eup %3537  ;;  %v2669_v43 = vmul.f32 0.5, %v2657_v58 }
 0xae8   :  { %v2674_v16 = vmul.f32 %v3538_v62, %v2663_v45 }
 0xae9   :  { %3539 = vtanh.f32 %v2669_v43 }
 0xaea   :  { %v2675_v1 = vadd.f32 %v2674_v16, %v2673_v21 }
 0xaec   :  { %3541 = vtanh.f32 %v2675_v1  ;;  %v2658_v55 = vpop.f32.mrf.mxu3 }
 0xaef   :  { %v3540_v0 = vpop.eup %3539 }
 0xaf0   :  { %v2671_v13 = vmul.f32 0.5, %v3540_v0 }
 0xaf2   :  { %v3542_v48 = vpop.eup %3541  ;;  %v2672_v38 = vadd.f32 0.5, %v2671_v13 }
 0xaf4   :  { %v2677_v44 = vmul.f32 %v3542_v48, %v2672_v38 }
 0xaf6   :  { %v2678_v28 = vpack.c.bf16 %v2677_v44, %v2677_v44 }
 0xaf8   :  { %2755 = vmatmul.bf16.vlgmr.msrb.gmra.mxu0 %v2678_v28 }
 0xb75   :  { %v2756_v37 = vpop.f32.mrf.mxu0 }
 0xb76   :  { %v2757_v17 = vadd.f32 %v3462_v57, %v2756_v37 }
 0xb78   :  { %2760 = vst [vmem:[%s5365_s8] sm:$0xff] %v2757_v17 }
 0xb7d   :  { %v2758_v5 = vpop.f32.mrf.mxu0 }
 0xb7e   :  { %2765 = vsyncmov [#allocation5] }
 0xb81   :  { %s2766_s19 = vpop.sfrf %2765 }
 0xb82   :  { %p3262_p0 = scmp.ne.s32.totalorder %s2766_s19, 0 }
 0xb84   :  { %2770 = shalt.err (%p3262_p0)  }

</bundles_post_ra>
